<compile_context>
chip_gen: v5e
topology: v5e:2x2
jax: 0.10.0
libtpu: 0.0.40
codegen_flags: <defaults>
</compile_context>

<pallas_src>
import jax
import jax.numpy as jnp
from jax.experimental import pallas as pl
from jax.experimental.pallas import tpu as pltpu

H = 64          # hidden size
G = 4 * H       # 256, gate width
EMB = 768       # text embedding size
PRICE_K = 8     # price feature dim (3) zero-padded to 8


# --------------------------------------------------------------------------
# Single fused kernel: TimeLSTM (batched over days) + text attention
#                    + day LSTM step + day attention
#                    + price LSTM step + price attention
#                    + folded bilinear/linear head.
# --------------------------------------------------------------------------
def fisa_kernel(x_ref,      # (num_text*num_day, 768)  text, step-major rows
                ts_ref,     # (num_day, num_text)      timestamps
                px_ref,     # (num_day, 8)             price features (zero padded)
                ua_ref,     # (768, 256)               U_all^T
                wa2_ref,    # (2, 64, 256)             [W_all^T, W_ih_day^T]
                wsq_ref,    # (8, 64, 64)  [W_d^T, W1t^T, W2t^T, W1d^T, W2d^T, W1p^T, W2p^T, W_eff]
                wpl_ref,    # (8, 256)                 W_ih_price^T (rows 3..7 zero)
                b_ref,      # (11, 256)                biases / V rows (see wrapper)
                out_ref):   # (1, 1)
    nd, nt = ts_ref.shape

    # ---- one-time weight / bias loads --------------------------------------
    wa   = wa2_ref[0]              # TimeLSTM W_all^T       (64, 256)
    wdl  = wa2_ref[1]              # day-LSTM W_ih^T        (64, 256)
    wd   = wsq_ref[0]              # TimeLSTM W_d^T         (64, 64)
    w1t  = wsq_ref[1]
    w2t  = wsq_ref[2]
    w1d  = wsq_ref[3]
    w2d  = wsq_ref[4]
    w1p  = wsq_ref[5]
    w2p  = wsq_ref[6]
    weff = wsq_ref[7]              # folded bilinear+linear_stock

    busum = b_ref[0:1, :]          # b_all + b_u            (1, 256)
    bdl   = b_ref[1:2, :]          # day  LSTM b_ih + b_hh
    bpl   = b_ref[2:3, :]          # price LSTM b_ih + b_hh
    bd    = b_ref[3:4, 0:H]        # TimeLSTM b_d           (1, 64)
    b12t  = b_ref[4:5, 0:H]        # text  attn b1 + b2
    b12d  = b_ref[5:6, 0:H]        # day   attn b1 + b2
    b12p  = b_ref[6:7, 0:H]        # price attn b1 + b2
    vt    = b_ref[7:8, 0:H]        # text  attn V row
    vd    = b_ref[8:9, 0:H]
    vp    = b_ref[9:10, 0:H]
    beff  = b_ref[10:11, 0:1]      # folded bilinear/linear bias (1, 1)

    ts = ts_ref[...]               # (nd, nt)

    # ---- U_all(x) + (b_u + b_all) for every (step, day) row in one matmul ---
    u_all = (jnp.dot(x_ref[...], ua_ref[...],
                     preferred_element_type=jnp.float32) + busum)   # (nt*nd, 256)

    # ---- TimeLSTM recurrence, batched over days, state kept in registers ----
    h = jnp.zeros((nd, H), jnp.float32)
    c = jnp.zeros((nd, H), jnp.float32)
    o_seq = []
    for s in range(nt):                                  # static -> fully unrolled
        c_s1 = jnp.tanh(jnp.dot(c, wd, preferred_element_type=jnp.float32) + bd)
        c_adj = (c - c_s1) + c_s1 * ts[:, s:s + 1]
        outs = (jnp.dot(h, wa, preferred_element_type=jnp.float32)
                + u_all[s * nd:(s + 1) * nd, :])         # (nd, 256)
        # TimeLSTM chunk order: f, i, o, c_tmp
        f_g = jax.nn.sigmoid(outs[:, 0:H])
        i_g = jax.nn.sigmoid(outs[:, H:2 * H])
        o_g = jax.nn.sigmoid(outs[:, 2 * H:3 * H])
        c_t = jnp.tanh(outs[:, 3 * H:4 * H])
        c = f_g * c_adj + i_g * c_t
        h = o_g * jnp.tanh(c)
        o_seq.append(o_g)                                # TimeLSTM "outputs" = o gates

    # ---- text attention: full = tanh(o_seq), last = final h -----------------
    # (V's bias is dropped: adding a constant to every score is softmax-invariant)
    q = jnp.dot(h, w1t, preferred_element_type=jnp.float32) + b12t   # (nd, 64)
    ys, scores = [], []
    for s in range(nt):
        y_s = jnp.tanh(o_seq[s])
        k_s = jnp.dot(y_s, w2t, preferred_element_type=jnp.float32)
        scores.append(jnp.sum(jnp.tanh(q + k_s) * vt, axis=1, keepdims=True))
        ys.append(y_s)
    m_sc = scores[0]
    for s in range(1, nt):
        m_sc = jnp.maximum(m_sc, scores[s])
    es = [jnp.exp(sc - m_sc) for sc in scores]
    denom = es[0]
    for s in range(1, nt):
        denom = denom + es[s]
    inv = 1.0 / denom
    text_vec = (es[0] * inv) * ys[0]
    for s in range(1, nt):
        text_vec = text_vec + (es[s] * inv) * ys[s]      # (nd, 64) per-day context

    # ---- day LSTM: single step, batch = days (PyTorch gate order i,f,g,o) ---
    g = jnp.dot(text_vec, wdl, preferred_element_type=jnp.float32) + bdl
    c_d = jax.nn.sigmoid(g[:, 0:H]) * jnp.tanh(g[:, 2 * H:3 * H])       # c0 == 0
    h_text = jax.nn.sigmoid(g[:, 3 * H:4 * H]) * jnp.tanh(c_d)          # (nd, 64)
    text_full = jnp.tanh(h_text)

    # ---- day attention (full = tanh(h), last = h), softmax over days --------
    sd = jnp.tanh(jnp.dot(h_text, w1d, preferred_element_type=jnp.float32)
                  + jnp.dot(text_full, w2d, preferred_element_type=jnp.float32)
                  + b12d)
    score_d = jnp.sum(sd * vd, axis=1, keepdims=True)                   # (nd, 1)
    aw_d = jax.nn.softmax(score_d, axis=0)
    text_ctx = jnp.sum(aw_d * text_full, axis=0, keepdims=True)         # (1, 64)

    # ---- price LSTM: single step, batch = days -------------------------------
    gp = jnp.dot(px_ref[...], wpl_ref[...], preferred_element_type=jnp.float32) + bpl
    c_p = jax.nn.sigmoid(gp[:, 0:H]) * jnp.tanh(gp[:, 2 * H:3 * H])
    h_price = jax.nn.sigmoid(gp[:, 3 * H:4 * H]) * jnp.tanh(c_p)        # (nd, 64)

    # ---- price attention (full = last = h_price), softmax over days ---------
    sp = jnp.tanh(jnp.dot(h_price, w1p, preferred_element_type=jnp.float32)
                  + jnp.dot(h_price, w2p, preferred_element_type=jnp.float32)
                  + b12p)
    score_p = jnp.sum(sp * vp, axis=1, keepdims=True)
    aw_p = jax.nn.softmax(score_p, axis=0)
    price_ctx = jnp.sum(aw_p * h_price, axis=0, keepdims=True)          # (1, 64)

    # ---- op = 3 * tanh(linear_stock(bilinear(text_ctx, price_ctx))) ---------
    #      exactly folded to   text_ctx @ W_eff @ price_ctx^T + b_eff
    mm = jnp.dot(text_ctx, weff, preferred_element_type=jnp.float32)    # (1, 64)
    s_val = jnp.sum(mm * price_ctx, axis=1, keepdims=True)              # (1, 1)
    out_ref[...] = 3.0 * jnp.tanh(s_val + beff)


# --------------------------------------------------------------------------
# Wrapper: layout plumbing + exact parameter folding, then one pallas_call.
# --------------------------------------------------------------------------
def fisa_forward(params, price_input, text_input, time_inputs, num_layer=0):
    del num_layer  # single stock's parameters are materialised (num_stocks = 1)
    p = params
    f32 = jnp.float32
    num_day, num_text, emb = (text_input.shape[1], text_input.shape[2],
                              text_input.shape[3])

    # text re-ordered step-major:  row = s * num_day + d
    x_flat = (jnp.transpose(text_input[0], (1, 0, 2))
              .reshape(num_text * num_day, emb).astype(f32))
    ts = time_inputs[0].astype(f32)                                  # (num_day, num_text)
    px = price_input[0].astype(f32)                                  # (num_day, 3)
    px_pad = jnp.zeros((num_day, PRICE_K), f32).at[:, :px.shape[1]].set(px)

    ua_t = p["U_all"].T.astype(f32)                                  # (768, 256)
    wa2 = jnp.stack([p["W_all"].T, p["Wih_d"].T]).astype(f32)        # (2, 64, 256)

    # fold Bilinear(64,64,64) followed by Linear(64,1) into one bilinear form
    w_eff = jnp.einsum("k,kab->ab", p["w_ls"][0], p["W_bil"]).astype(f32)
    b_eff = (jnp.dot(p["w_ls"][0], p["b_bil"]) + p["b_ls"][0]).astype(f32)

    wsq = jnp.stack([p["W_d"].T, p["W1t"].T, p["W2t"].T,
                     p["W1d"].T, p["W2d"].T, p["W1p"].T, p["W2p"].T,
                     w_eff]).astype(f32)                             # (8, 64, 64)
    wpl = jnp.zeros((PRICE_K, G), f32).at[:3, :].set(p["Wih_p"].T.astype(f32))

    def row(v):  # one zero-padded (1, 256) bias/V row
        v = jnp.asarray(v, f32).reshape(-1)
        return jnp.zeros((1, G), f32).at[0, :v.shape[0]].set(v)

    bias2d = jnp.concatenate([
        row(p["b_all"] + p["b_u"]),        # 0: TimeLSTM b_all + b_u
        row(p["bih_d"] + p["bhh_d"]),      # 1: day  LSTM biases
        row(p["bih_p"] + p["bhh_p"]),      # 2: price LSTM biases
        row(p["b_d"]),                     # 3
        row(p["b1t"] + p["b2t"]),          # 4
        row(p["b1d"] + p["b2d"]),          # 5
        row(p["b1p"] + p["b2p"]),          # 6
        row(p["Vt"][0]),                   # 7  (V biases dropped: softmax-invariant)
        row(p["Vd"][0]),                   # 8
        row(p["Vp"][0]),                   # 9
        row(b_eff),                        # 10
    ], axis=0)                                                       # (11, 256)

    vmem = pl.BlockSpec(memory_space=pltpu.MemorySpace.VMEM)
    return pl.pallas_call(
        fisa_kernel,
        out_shape=jax.ShapeDtypeStruct((1, 1), f32),
        in_specs=[vmem] * 8,
        out_specs=vmem,
    )(x_flat, ts, px_pad, ua_t, wa2, wsq, wpl, bias2d)


# --------------------------------------------------------------------------
# Deterministic parameter init (shapes follow the PyTorch module __init__)
# --------------------------------------------------------------------------
def init_params(key):
    ks = jax.random.split(key, 40)
    u = lambda k, shape, s=0.1: jax.random.uniform(k, shape, jnp.float32, -s, s)
    return dict(
        # TimeLSTM(768, 64)
        W_all=u(ks[0], (4 * H, H)), b_all=u(ks[1], (4 * H,)),
        U_all=u(ks[2], (4 * H, EMB)), b_u=u(ks[3], (4 * H,)),
        W_d=u(ks[4], (H, H)), b_d=u(ks[5], (H,)),
        # text Attention(64)
        W1t=u(ks[6], (H, H)), b1t=u(ks[7], (H,)),
        W2t=u(ks[8], (H, H)), b2t=u(ks[9], (H,)),
        Vt=u(ks[10], (1, H)), bvt=u(ks[11], (1,)),
        # day nn.LSTM(64, 64)  (W_hh unused since h0 = 0, but both biases add)
        Wih_d=u(ks[12], (4 * H, H)), bih_d=u(ks[13], (4 * H,)), bhh_d=u(ks[14], (4 * H,)),
        # day Attention(64)
        W1d=u(ks[15], (H, H)), b1d=u(ks[16], (H,)),
        W2d=u(ks[17], (H, H)), b2d=u(ks[18], (H,)),
        Vd=u(ks[19], (1, H)), bvd=u(ks[20], (1,)),
        # price nn.LSTM(3, 64)
        Wih_p=u(ks[21], (4 * H, 3)), bih_p=u(ks[22], (4 * H,)), bhh_p=u(ks[23], (4 * H,)),
        # price Attention(64)
        W1p=u(ks[24], (H, H)), b1p=u(ks[25], (H,)),
        W2p=u(ks[26], (H, H)), b2p=u(ks[27], (H,)),
        Vp=u(ks[28], (1, H)), bvp=u(ks[29], (1,)),
        # Bilinear(64, 64, 64) and linear_stock Linear(64, 1)
        W_bil=u(ks[30], (H, H, H)), b_bil=u(ks[31], (H,)),
        w_ls=u(ks[32], (1, H)), b_ls=u(ks[33], (1,)),
    )


if __name__ == "__main__":
    key = jax.random.PRNGKey(0)
    kp, kprice, ktext, ktime = jax.random.split(key, 4)
    params = init_params(kp)

    num_day, num_text = 4, 8
    price_input = jax.random.normal(kprice, (1, num_day, 3), jnp.float32)
    text_input = jax.random.normal(ktext, (1, num_day, num_text, EMB), jnp.float32) * 0.1
    time_inputs = jax.random.uniform(ktime, (1, num_day, num_text), jnp.float32)

    fisa_forward_j = jax.jit(fisa_forward)
    out = fisa_forward_j(params, price_input, text_input, time_inputs)
    out = jax.block_until_ready(out)
    assert out.shape == (1, 1) and out.dtype == jnp.float32
    assert bool(jnp.all(jnp.isfinite(out)))
    print("KERNEL_OK")
</pallas_src>

<mosaic_0001>
module attributes {stable_mosaic.version = 11 : i64} {
  func.func @fisa_kernel(%arg0: memref<32x768xf32, #tpu.memory_space<vmem>>, %arg1: memref<4x8xf32, #tpu.memory_space<vmem>>, %arg2: memref<4x8xf32, #tpu.memory_space<vmem>>, %arg3: memref<768x256xf32, #tpu.memory_space<vmem>>, %arg4: memref<2x64x256xf32, #tpu.memory_space<vmem>>, %arg5: memref<8x64x64xf32, #tpu.memory_space<vmem>>, %arg6: memref<8x256xf32, #tpu.memory_space<vmem>>, %arg7: memref<11x256xf32, #tpu.memory_space<vmem>>, %arg8: memref<1x1xf32, #tpu.memory_space<vmem>>) attributes {dimension_semantics = [], scalar_prefetch = 0 : i64, scratch_operands = 0 : i64, tpu.core_type = #tpu.core_type<tc>} {
    %c0 = arith.constant 0 : index
    %c0_0 = arith.constant 0 : index
    %c0_1 = arith.constant 0 : index
    %0 = vector.load %arg4[%c0, %c0_0, %c0_1] : memref<2x64x256xf32, #tpu.memory_space<vmem>>, vector<1x64x256xf32>
    %1 = vector.shape_cast %0 : vector<1x64x256xf32> to vector<64x256xf32>
    %c1 = arith.constant 1 : index
    %c0_2 = arith.constant 0 : index
    %c0_3 = arith.constant 0 : index
    %2 = vector.load %arg4[%c1, %c0_2, %c0_3] : memref<2x64x256xf32, #tpu.memory_space<vmem>>, vector<1x64x256xf32>
    %3 = vector.shape_cast %2 : vector<1x64x256xf32> to vector<64x256xf32>
    %c0_4 = arith.constant 0 : index
    %c0_5 = arith.constant 0 : index
    %c0_6 = arith.constant 0 : index
    %4 = vector.load %arg5[%c0_4, %c0_5, %c0_6] : memref<8x64x64xf32, #tpu.memory_space<vmem>>, vector<1x64x64xf32>
    %5 = vector.shape_cast %4 : vector<1x64x64xf32> to vector<64x64xf32>
    %c1_7 = arith.constant 1 : index
    %c0_8 = arith.constant 0 : index
    %c0_9 = arith.constant 0 : index
    %6 = vector.load %arg5[%c1_7, %c0_8, %c0_9] : memref<8x64x64xf32, #tpu.memory_space<vmem>>, vector<1x64x64xf32>
    %7 = vector.shape_cast %6 : vector<1x64x64xf32> to vector<64x64xf32>
    %c2 = arith.constant 2 : index
    %c0_10 = arith.constant 0 : index
    %c0_11 = arith.constant 0 : index
    %8 = vector.load %arg5[%c2, %c0_10, %c0_11] : memref<8x64x64xf32, #tpu.memory_space<vmem>>, vector<1x64x64xf32>
    %9 = vector.shape_cast %8 : vector<1x64x64xf32> to vector<64x64xf32>
    %c3 = arith.constant 3 : index
    %c0_12 = arith.constant 0 : index
    %c0_13 = arith.constant 0 : index
    %10 = vector.load %arg5[%c3, %c0_12, %c0_13] : memref<8x64x64xf32, #tpu.memory_space<vmem>>, vector<1x64x64xf32>
    %11 = vector.shape_cast %10 : vector<1x64x64xf32> to vector<64x64xf32>
    %c4 = arith.constant 4 : index
    %c0_14 = arith.constant 0 : index
    %c0_15 = arith.constant 0 : index
    %12 = vector.load %arg5[%c4, %c0_14, %c0_15] : memref<8x64x64xf32, #tpu.memory_space<vmem>>, vector<1x64x64xf32>
    %13 = vector.shape_cast %12 : vector<1x64x64xf32> to vector<64x64xf32>
    %c5 = arith.constant 5 : index
    %c0_16 = arith.constant 0 : index
    %c0_17 = arith.constant 0 : index
    %14 = vector.load %arg5[%c5, %c0_16, %c0_17] : memref<8x64x64xf32, #tpu.memory_space<vmem>>, vector<1x64x64xf32>
    %15 = vector.shape_cast %14 : vector<1x64x64xf32> to vector<64x64xf32>
    %c6 = arith.constant 6 : index
    %c0_18 = arith.constant 0 : index
    %c0_19 = arith.constant 0 : index
    %16 = vector.load %arg5[%c6, %c0_18, %c0_19] : memref<8x64x64xf32, #tpu.memory_space<vmem>>, vector<1x64x64xf32>
    %17 = vector.shape_cast %16 : vector<1x64x64xf32> to vector<64x64xf32>
    %c7 = arith.constant 7 : index
    %c0_20 = arith.constant 0 : index
    %c0_21 = arith.constant 0 : index
    %18 = vector.load %arg5[%c7, %c0_20, %c0_21] : memref<8x64x64xf32, #tpu.memory_space<vmem>>, vector<1x64x64xf32>
    %19 = vector.shape_cast %18 : vector<1x64x64xf32> to vector<64x64xf32>
    %c0_22 = arith.constant 0 : index
    %c0_23 = arith.constant 0 : index
    %20 = vector.load %arg7[%c0_22, %c0_23] : memref<11x256xf32, #tpu.memory_space<vmem>>, vector<1x256xf32>
    %c1_24 = arith.constant 1 : index
    %c0_25 = arith.constant 0 : index
    %21 = vector.load %arg7[%c1_24, %c0_25] : memref<11x256xf32, #tpu.memory_space<vmem>>, vector<1x256xf32>
    %c2_26 = arith.constant 2 : index
    %c0_27 = arith.constant 0 : index
    %22 = vector.load %arg7[%c2_26, %c0_27] : memref<11x256xf32, #tpu.memory_space<vmem>>, vector<1x256xf32>
    %c3_28 = arith.constant 3 : index
    %c0_29 = arith.constant 0 : index
    %23 = vector.load %arg7[%c3_28, %c0_29] : memref<11x256xf32, #tpu.memory_space<vmem>>, vector<1x64xf32>
    %c4_30 = arith.constant 4 : index
    %c0_31 = arith.constant 0 : index
    %24 = vector.load %arg7[%c4_30, %c0_31] : memref<11x256xf32, #tpu.memory_space<vmem>>, vector<1x64xf32>
    %c5_32 = arith.constant 5 : index
    %c0_33 = arith.constant 0 : index
    %25 = vector.load %arg7[%c5_32, %c0_33] : memref<11x256xf32, #tpu.memory_space<vmem>>, vector<1x64xf32>
    %c6_34 = arith.constant 6 : index
    %c0_35 = arith.constant 0 : index
    %26 = vector.load %arg7[%c6_34, %c0_35] : memref<11x256xf32, #tpu.memory_space<vmem>>, vector<1x64xf32>
    %c7_36 = arith.constant 7 : index
    %c0_37 = arith.constant 0 : index
    %27 = vector.load %arg7[%c7_36, %c0_37] : memref<11x256xf32, #tpu.memory_space<vmem>>, vector<1x64xf32>
    %c8 = arith.constant 8 : index
    %c0_38 = arith.constant 0 : index
    %28 = vector.load %arg7[%c8, %c0_38] : memref<11x256xf32, #tpu.memory_space<vmem>>, vector<1x64xf32>
    %c9 = arith.constant 9 : index
    %c0_39 = arith.constant 0 : index
    %29 = vector.load %arg7[%c9, %c0_39] : memref<11x256xf32, #tpu.memory_space<vmem>>, vector<1x64xf32>
    %c10 = arith.constant 10 : index
    %c0_40 = arith.constant 0 : index
    %30 = vector.load %arg7[%c10, %c0_40] : memref<11x256xf32, #tpu.memory_space<vmem>>, vector<1x1xf32>
    %c0_41 = arith.constant 0 : index
    %c0_42 = arith.constant 0 : index
    %31 = vector.load %arg1[%c0_41, %c0_42] : memref<4x8xf32, #tpu.memory_space<vmem>>, vector<4x8xf32>
    %c0_43 = arith.constant 0 : index
    %c0_44 = arith.constant 0 : index
    %32 = vector.load %arg0[%c0_43, %c0_44] : memref<32x768xf32, #tpu.memory_space<vmem>>, vector<32x768xf32>
    %c0_45 = arith.constant 0 : index
    %c0_46 = arith.constant 0 : index
    %33 = vector.load %arg3[%c0_45, %c0_46] : memref<768x256xf32, #tpu.memory_space<vmem>>, vector<768x256xf32>
    %cst = arith.constant dense<0.000000e+00> : vector<32x256xf32>
    %34 = tpu.matmul %32, %33, %cst {dimension_numbers = #tpu.dot_dimension_numbers<[1], [0], [0], [1], [0, 0, 1, 1], [], []>} : vector<32x768xf32>, vector<768x256xf32>, vector<32x256xf32> -> vector<32x256xf32>
    %35 = vector.broadcast %20 : vector<1x256xf32> to vector<32x256xf32>
    %36 = arith.addf %34, %35 : vector<32x256xf32>
    %cst_47 = arith.constant 0.000000e+00 : f32
    %37 = vector.broadcast %cst_47 : f32 to vector<4x64xf32>
    %cst_48 = arith.constant 0.000000e+00 : f32
    %38 = vector.broadcast %cst_48 : f32 to vector<4x64xf32>
    %cst_49 = arith.constant dense<0.000000e+00> : vector<4x64xf32>
    %39 = tpu.matmul %38, %5, %cst_49 {dimension_numbers = #tpu.dot_dimension_numbers<[1], [0], [0], [1], [0, 0, 1, 1], [], []>} : vector<4x64xf32>, vector<64x64xf32>, vector<4x64xf32> -> vector<4x64xf32>
    %40 = vector.broadcast %23 : vector<1x64xf32> to vector<4x64xf32>
    %41 = arith.addf %39, %40 : vector<4x64xf32>
    %42 = math.tanh %41 : vector<4x64xf32>
    %43 = arith.subf %38, %42 : vector<4x64xf32>
    %44 = vector.extract_strided_slice %31 {offsets = [0, 0], sizes = [4, 1], strides = [1, 1]} : vector<4x8xf32> to vector<4x1xf32>
    %45 = vector.broadcast %44 : vector<4x1xf32> to vector<4x64xf32>
    %46 = arith.mulf %42, %45 : vector<4x64xf32>
    %47 = arith.addf %43, %46 : vector<4x64xf32>
    %cst_50 = arith.constant dense<0.000000e+00> : vector<4x256xf32>
    %48 = tpu.matmul %37, %1, %cst_50 {dimension_numbers = #tpu.dot_dimension_numbers<[1], [0], [0], [1], [0, 0, 1, 1], [], []>} : vector<4x64xf32>, vector<64x256xf32>, vector<4x256xf32> -> vector<4x256xf32>
    %49 = vector.extract_strided_slice %36 {offsets = [0, 0], sizes = [4, 256], strides = [1, 1]} : vector<32x256xf32> to vector<4x256xf32>
    %50 = arith.addf %48, %49 : vector<4x256xf32>
    %51 = vector.extract_strided_slice %50 {offsets = [0, 0], sizes = [4, 64], strides = [1, 1]} : vector<4x256xf32> to vector<4x64xf32>
    %52 = arith.negf %51 : vector<4x64xf32>
    %53 = math.exp %52 : vector<4x64xf32>
    %cst_51 = arith.constant 1.000000e+00 : f32
    %54 = vector.broadcast %cst_51 : f32 to vector<4x64xf32>
    %55 = arith.addf %54, %53 : vector<4x64xf32>
    %56 = arith.divf %54, %55 : vector<4x64xf32>
    %57 = vector.extract_strided_slice %50 {offsets = [0, 64], sizes = [4, 64], strides = [1, 1]} : vector<4x256xf32> to vector<4x64xf32>
    %58 = arith.negf %57 : vector<4x64xf32>
    %59 = math.exp %58 : vector<4x64xf32>
    %cst_52 = arith.constant 1.000000e+00 : f32
    %60 = vector.broadcast %cst_52 : f32 to vector<4x64xf32>
    %61 = arith.addf %60, %59 : vector<4x64xf32>
    %62 = arith.divf %60, %61 : vector<4x64xf32>
    %63 = vector.extract_strided_slice %50 {offsets = [0, 128], sizes = [4, 64], strides = [1, 1]} : vector<4x256xf32> to vector<4x64xf32>
    %64 = arith.negf %63 : vector<4x64xf32>
    %65 = math.exp %64 : vector<4x64xf32>
    %cst_53 = arith.constant 1.000000e+00 : f32
    %66 = vector.broadcast %cst_53 : f32 to vector<4x64xf32>
    %67 = arith.addf %66, %65 : vector<4x64xf32>
    %68 = arith.divf %66, %67 : vector<4x64xf32>
    %69 = vector.extract_strided_slice %50 {offsets = [0, 192], sizes = [4, 64], strides = [1, 1]} : vector<4x256xf32> to vector<4x64xf32>
    %70 = math.tanh %69 : vector<4x64xf32>
    %71 = arith.mulf %56, %47 : vector<4x64xf32>
    %72 = arith.mulf %62, %70 : vector<4x64xf32>
    %73 = arith.addf %71, %72 : vector<4x64xf32>
    %74 = math.tanh %73 : vector<4x64xf32>
    %75 = arith.mulf %68, %74 : vector<4x64xf32>
    %cst_54 = arith.constant dense<0.000000e+00> : vector<4x64xf32>
    %76 = tpu.matmul %73, %5, %cst_54 {dimension_numbers = #tpu.dot_dimension_numbers<[1], [0], [0], [1], [0, 0, 1, 1], [], []>} : vector<4x64xf32>, vector<64x64xf32>, vector<4x64xf32> -> vector<4x64xf32>
    %77 = vector.broadcast %23 : vector<1x64xf32> to vector<4x64xf32>
    %78 = arith.addf %76, %77 : vector<4x64xf32>
    %79 = math.tanh %78 : vector<4x64xf32>
    %80 = arith.subf %73, %79 : vector<4x64xf32>
    %81 = vector.extract_strided_slice %31 {offsets = [0, 1], sizes = [4, 1], strides = [1, 1]} : vector<4x8xf32> to vector<4x1xf32>
    %82 = vector.broadcast %81 : vector<4x1xf32> to vector<4x64xf32>
    %83 = arith.mulf %79, %82 : vector<4x64xf32>
    %84 = arith.addf %80, %83 : vector<4x64xf32>
    %cst_55 = arith.constant dense<0.000000e+00> : vector<4x256xf32>
    %85 = tpu.matmul %75, %1, %cst_55 {dimension_numbers = #tpu.dot_dimension_numbers<[1], [0], [0], [1], [0, 0, 1, 1], [], []>} : vector<4x64xf32>, vector<64x256xf32>, vector<4x256xf32> -> vector<4x256xf32>
    %86 = vector.extract_strided_slice %36 {offsets = [4, 0], sizes = [4, 256], strides = [1, 1]} : vector<32x256xf32> to vector<4x256xf32>
    %87 = arith.addf %85, %86 : vector<4x256xf32>
    %88 = vector.extract_strided_slice %87 {offsets = [0, 0], sizes = [4, 64], strides = [1, 1]} : vector<4x256xf32> to vector<4x64xf32>
    %89 = arith.negf %88 : vector<4x64xf32>
    %90 = math.exp %89 : vector<4x64xf32>
    %cst_56 = arith.constant 1.000000e+00 : f32
    %91 = vector.broadcast %cst_56 : f32 to vector<4x64xf32>
    %92 = arith.addf %91, %90 : vector<4x64xf32>
    %93 = arith.divf %91, %92 : vector<4x64xf32>
    %94 = vector.extract_strided_slice %87 {offsets = [0, 64], sizes = [4, 64], strides = [1, 1]} : vector<4x256xf32> to vector<4x64xf32>
    %95 = arith.negf %94 : vector<4x64xf32>
    %96 = math.exp %95 : vector<4x64xf32>
    %cst_57 = arith.constant 1.000000e+00 : f32
    %97 = vector.broadcast %cst_57 : f32 to vector<4x64xf32>
    %98 = arith.addf %97, %96 : vector<4x64xf32>
    %99 = arith.divf %97, %98 : vector<4x64xf32>
    %100 = vector.extract_strided_slice %87 {offsets = [0, 128], sizes = [4, 64], strides = [1, 1]} : vector<4x256xf32> to vector<4x64xf32>
    %101 = arith.negf %100 : vector<4x64xf32>
    %102 = math.exp %101 : vector<4x64xf32>
    %cst_58 = arith.constant 1.000000e+00 : f32
    %103 = vector.broadcast %cst_58 : f32 to vector<4x64xf32>
    %104 = arith.addf %103, %102 : vector<4x64xf32>
    %105 = arith.divf %103, %104 : vector<4x64xf32>
    %106 = vector.extract_strided_slice %87 {offsets = [0, 192], sizes = [4, 64], strides = [1, 1]} : vector<4x256xf32> to vector<4x64xf32>
    %107 = math.tanh %106 : vector<4x64xf32>
    %108 = arith.mulf %93, %84 : vector<4x64xf32>
    %109 = arith.mulf %99, %107 : vector<4x64xf32>
    %110 = arith.addf %108, %109 : vector<4x64xf32>
    %111 = math.tanh %110 : vector<4x64xf32>
    %112 = arith.mulf %105, %111 : vector<4x64xf32>
    %cst_59 = arith.constant dense<0.000000e+00> : vector<4x64xf32>
    %113 = tpu.matmul %110, %5, %cst_59 {dimension_numbers = #tpu.dot_dimension_numbers<[1], [0], [0], [1], [0, 0, 1, 1], [], []>} : vector<4x64xf32>, vector<64x64xf32>, vector<4x64xf32> -> vector<4x64xf32>
    %114 = vector.broadcast %23 : vector<1x64xf32> to vector<4x64xf32>
    %115 = arith.addf %113, %114 : vector<4x64xf32>
    %116 = math.tanh %115 : vector<4x64xf32>
    %117 = arith.subf %110, %116 : vector<4x64xf32>
    %118 = vector.extract_strided_slice %31 {offsets = [0, 2], sizes = [4, 1], strides = [1, 1]} : vector<4x8xf32> to vector<4x1xf32>
    %119 = vector.broadcast %118 : vector<4x1xf32> to vector<4x64xf32>
    %120 = arith.mulf %116, %119 : vector<4x64xf32>
    %121 = arith.addf %117, %120 : vector<4x64xf32>
    %cst_60 = arith.constant dense<0.000000e+00> : vector<4x256xf32>
    %122 = tpu.matmul %112, %1, %cst_60 {dimension_numbers = #tpu.dot_dimension_numbers<[1], [0], [0], [1], [0, 0, 1, 1], [], []>} : vector<4x64xf32>, vector<64x256xf32>, vector<4x256xf32> -> vector<4x256xf32>
    %123 = vector.extract_strided_slice %36 {offsets = [8, 0], sizes = [4, 256], strides = [1, 1]} : vector<32x256xf32> to vector<4x256xf32>
    %124 = arith.addf %122, %123 : vector<4x256xf32>
    %125 = vector.extract_strided_slice %124 {offsets = [0, 0], sizes = [4, 64], strides = [1, 1]} : vector<4x256xf32> to vector<4x64xf32>
    %126 = arith.negf %125 : vector<4x64xf32>
    %127 = math.exp %126 : vector<4x64xf32>
    %cst_61 = arith.constant 1.000000e+00 : f32
    %128 = vector.broadcast %cst_61 : f32 to vector<4x64xf32>
    %129 = arith.addf %128, %127 : vector<4x64xf32>
    %130 = arith.divf %128, %129 : vector<4x64xf32>
    %131 = vector.extract_strided_slice %124 {offsets = [0, 64], sizes = [4, 64], strides = [1, 1]} : vector<4x256xf32> to vector<4x64xf32>
    %132 = arith.negf %131 : vector<4x64xf32>
    %133 = math.exp %132 : vector<4x64xf32>
    %cst_62 = arith.constant 1.000000e+00 : f32
    %134 = vector.broadcast %cst_62 : f32 to vector<4x64xf32>
    %135 = arith.addf %134, %133 : vector<4x64xf32>
    %136 = arith.divf %134, %135 : vector<4x64xf32>
    %137 = vector.extract_strided_slice %124 {offsets = [0, 128], sizes = [4, 64], strides = [1, 1]} : vector<4x256xf32> to vector<4x64xf32>
    %138 = arith.negf %137 : vector<4x64xf32>
    %139 = math.exp %138 : vector<4x64xf32>
    %cst_63 = arith.constant 1.000000e+00 : f32
    %140 = vector.broadcast %cst_63 : f32 to vector<4x64xf32>
    %141 = arith.addf %140, %139 : vector<4x64xf32>
    %142 = arith.divf %140, %141 : vector<4x64xf32>
    %143 = vector.extract_strided_slice %124 {offsets = [0, 192], sizes = [4, 64], strides = [1, 1]} : vector<4x256xf32> to vector<4x64xf32>
    %144 = math.tanh %143 : vector<4x64xf32>
    %145 = arith.mulf %130, %121 : vector<4x64xf32>
    %146 = arith.mulf %136, %144 : vector<4x64xf32>
    %147 = arith.addf %145, %146 : vector<4x64xf32>
    %148 = math.tanh %147 : vector<4x64xf32>
    %149 = arith.mulf %142, %148 : vector<4x64xf32>
    %cst_64 = arith.constant dense<0.000000e+00> : vector<4x64xf32>
    %150 = tpu.matmul %147, %5, %cst_64 {dimension_numbers = #tpu.dot_dimension_numbers<[1], [0], [0], [1], [0, 0, 1, 1], [], []>} : vector<4x64xf32>, vector<64x64xf32>, vector<4x64xf32> -> vector<4x64xf32>
    %151 = vector.broadcast %23 : vector<1x64xf32> to vector<4x64xf32>
    %152 = arith.addf %150, %151 : vector<4x64xf32>
    %153 = math.tanh %152 : vector<4x64xf32>
    %154 = arith.subf %147, %153 : vector<4x64xf32>
    %155 = vector.extract_strided_slice %31 {offsets = [0, 3], sizes = [4, 1], strides = [1, 1]} : vector<4x8xf32> to vector<4x1xf32>
    %156 = vector.broadcast %155 : vector<4x1xf32> to vector<4x64xf32>
    %157 = arith.mulf %153, %156 : vector<4x64xf32>
    %158 = arith.addf %154, %157 : vector<4x64xf32>
    %cst_65 = arith.constant dense<0.000000e+00> : vector<4x256xf32>
    %159 = tpu.matmul %149, %1, %cst_65 {dimension_numbers = #tpu.dot_dimension_numbers<[1], [0], [0], [1], [0, 0, 1, 1], [], []>} : vector<4x64xf32>, vector<64x256xf32>, vector<4x256xf32> -> vector<4x256xf32>
    %160 = vector.extract_strided_slice %36 {offsets = [12, 0], sizes = [4, 256], strides = [1, 1]} : vector<32x256xf32> to vector<4x256xf32>
    %161 = arith.addf %159, %160 : vector<4x256xf32>
    %162 = vector.extract_strided_slice %161 {offsets = [0, 0], sizes = [4, 64], strides = [1, 1]} : vector<4x256xf32> to vector<4x64xf32>
    %163 = arith.negf %162 : vector<4x64xf32>
    %164 = math.exp %163 : vector<4x64xf32>
    %cst_66 = arith.constant 1.000000e+00 : f32
    %165 = vector.broadcast %cst_66 : f32 to vector<4x64xf32>
    %166 = arith.addf %165, %164 : vector<4x64xf32>
    %167 = arith.divf %165, %166 : vector<4x64xf32>
    %168 = vector.extract_strided_slice %161 {offsets = [0, 64], sizes = [4, 64], strides = [1, 1]} : vector<4x256xf32> to vector<4x64xf32>
    %169 = arith.negf %168 : vector<4x64xf32>
    %170 = math.exp %169 : vector<4x64xf32>
    %cst_67 = arith.constant 1.000000e+00 : f32
    %171 = vector.broadcast %cst_67 : f32 to vector<4x64xf32>
    %172 = arith.addf %171, %170 : vector<4x64xf32>
    %173 = arith.divf %171, %172 : vector<4x64xf32>
    %174 = vector.extract_strided_slice %161 {offsets = [0, 128], sizes = [4, 64], strides = [1, 1]} : vector<4x256xf32> to vector<4x64xf32>
    %175 = arith.negf %174 : vector<4x64xf32>
    %176 = math.exp %175 : vector<4x64xf32>
    %cst_68 = arith.constant 1.000000e+00 : f32
    %177 = vector.broadcast %cst_68 : f32 to vector<4x64xf32>
    %178 = arith.addf %177, %176 : vector<4x64xf32>
    %179 = arith.divf %177, %178 : vector<4x64xf32>
    %180 = vector.extract_strided_slice %161 {offsets = [0, 192], sizes = [4, 64], strides = [1, 1]} : vector<4x256xf32> to vector<4x64xf32>
    %181 = math.tanh %180 : vector<4x64xf32>
    %182 = arith.mulf %167, %158 : vector<4x64xf32>
    %183 = arith.mulf %173, %181 : vector<4x64xf32>
    %184 = arith.addf %182, %183 : vector<4x64xf32>
    %185 = math.tanh %184 : vector<4x64xf32>
    %186 = arith.mulf %179, %185 : vector<4x64xf32>
    %cst_69 = arith.constant dense<0.000000e+00> : vector<4x64xf32>
    %187 = tpu.matmul %184, %5, %cst_69 {dimension_numbers = #tpu.dot_dimension_numbers<[1], [0], [0], [1], [0, 0, 1, 1], [], []>} : vector<4x64xf32>, vector<64x64xf32>, vector<4x64xf32> -> vector<4x64xf32>
    %188 = vector.broadcast %23 : vector<1x64xf32> to vector<4x64xf32>
    %189 = arith.addf %187, %188 : vector<4x64xf32>
    %190 = math.tanh %189 : vector<4x64xf32>
    %191 = arith.subf %184, %190 : vector<4x64xf32>
    %192 = vector.extract_strided_slice %31 {offsets = [0, 4], sizes = [4, 1], strides = [1, 1]} : vector<4x8xf32> to vector<4x1xf32>
    %193 = vector.broadcast %192 : vector<4x1xf32> to vector<4x64xf32>
    %194 = arith.mulf %190, %193 : vector<4x64xf32>
    %195 = arith.addf %191, %194 : vector<4x64xf32>
    %cst_70 = arith.constant dense<0.000000e+00> : vector<4x256xf32>
    %196 = tpu.matmul %186, %1, %cst_70 {dimension_numbers = #tpu.dot_dimension_numbers<[1], [0], [0], [1], [0, 0, 1, 1], [], []>} : vector<4x64xf32>, vector<64x256xf32>, vector<4x256xf32> -> vector<4x256xf32>
    %197 = vector.extract_strided_slice %36 {offsets = [16, 0], sizes = [4, 256], strides = [1, 1]} : vector<32x256xf32> to vector<4x256xf32>
    %198 = arith.addf %196, %197 : vector<4x256xf32>
    %199 = vector.extract_strided_slice %198 {offsets = [0, 0], sizes = [4, 64], strides = [1, 1]} : vector<4x256xf32> to vector<4x64xf32>
    %200 = arith.negf %199 : vector<4x64xf32>
    %201 = math.exp %200 : vector<4x64xf32>
    %cst_71 = arith.constant 1.000000e+00 : f32
    %202 = vector.broadcast %cst_71 : f32 to vector<4x64xf32>
    %203 = arith.addf %202, %201 : vector<4x64xf32>
    %204 = arith.divf %202, %203 : vector<4x64xf32>
    %205 = vector.extract_strided_slice %198 {offsets = [0, 64], sizes = [4, 64], strides = [1, 1]} : vector<4x256xf32> to vector<4x64xf32>
    %206 = arith.negf %205 : vector<4x64xf32>
    %207 = math.exp %206 : vector<4x64xf32>
    %cst_72 = arith.constant 1.000000e+00 : f32
    %208 = vector.broadcast %cst_72 : f32 to vector<4x64xf32>
    %209 = arith.addf %208, %207 : vector<4x64xf32>
    %210 = arith.divf %208, %209 : vector<4x64xf32>
    %211 = vector.extract_strided_slice %198 {offsets = [0, 128], sizes = [4, 64], strides = [1, 1]} : vector<4x256xf32> to vector<4x64xf32>
    %212 = arith.negf %211 : vector<4x64xf32>
    %213 = math.exp %212 : vector<4x64xf32>
    %cst_73 = arith.constant 1.000000e+00 : f32
    %214 = vector.broadcast %cst_73 : f32 to vector<4x64xf32>
    %215 = arith.addf %214, %213 : vector<4x64xf32>
    %216 = arith.divf %214, %215 : vector<4x64xf32>
    %217 = vector.extract_strided_slice %198 {offsets = [0, 192], sizes = [4, 64], strides = [1, 1]} : vector<4x256xf32> to vector<4x64xf32>
    %218 = math.tanh %217 : vector<4x64xf32>
    %219 = arith.mulf %204, %195 : vector<4x64xf32>
    %220 = arith.mulf %210, %218 : vector<4x64xf32>
    %221 = arith.addf %219, %220 : vector<4x64xf32>
    %222 = math.tanh %221 : vector<4x64xf32>
    %223 = arith.mulf %216, %222 : vector<4x64xf32>
    %cst_74 = arith.constant dense<0.000000e+00> : vector<4x64xf32>
    %224 = tpu.matmul %221, %5, %cst_74 {dimension_numbers = #tpu.dot_dimension_numbers<[1], [0], [0], [1], [0, 0, 1, 1], [], []>} : vector<4x64xf32>, vector<64x64xf32>, vector<4x64xf32> -> vector<4x64xf32>
    %225 = vector.broadcast %23 : vector<1x64xf32> to vector<4x64xf32>
    %226 = arith.addf %224, %225 : vector<4x64xf32>
    %227 = math.tanh %226 : vector<4x64xf32>
    %228 = arith.subf %221, %227 : vector<4x64xf32>
    %229 = vector.extract_strided_slice %31 {offsets = [0, 5], sizes = [4, 1], strides = [1, 1]} : vector<4x8xf32> to vector<4x1xf32>
    %230 = vector.broadcast %229 : vector<4x1xf32> to vector<4x64xf32>
    %231 = arith.mulf %227, %230 : vector<4x64xf32>
    %232 = arith.addf %228, %231 : vector<4x64xf32>
    %cst_75 = arith.constant dense<0.000000e+00> : vector<4x256xf32>
    %233 = tpu.matmul %223, %1, %cst_75 {dimension_numbers = #tpu.dot_dimension_numbers<[1], [0], [0], [1], [0, 0, 1, 1], [], []>} : vector<4x64xf32>, vector<64x256xf32>, vector<4x256xf32> -> vector<4x256xf32>
    %234 = vector.extract_strided_slice %36 {offsets = [20, 0], sizes = [4, 256], strides = [1, 1]} : vector<32x256xf32> to vector<4x256xf32>
    %235 = arith.addf %233, %234 : vector<4x256xf32>
    %236 = vector.extract_strided_slice %235 {offsets = [0, 0], sizes = [4, 64], strides = [1, 1]} : vector<4x256xf32> to vector<4x64xf32>
    %237 = arith.negf %236 : vector<4x64xf32>
    %238 = math.exp %237 : vector<4x64xf32>
    %cst_76 = arith.constant 1.000000e+00 : f32
    %239 = vector.broadcast %cst_76 : f32 to vector<4x64xf32>
    %240 = arith.addf %239, %238 : vector<4x64xf32>
    %241 = arith.divf %239, %240 : vector<4x64xf32>
    %242 = vector.extract_strided_slice %235 {offsets = [0, 64], sizes = [4, 64], strides = [1, 1]} : vector<4x256xf32> to vector<4x64xf32>
    %243 = arith.negf %242 : vector<4x64xf32>
    %244 = math.exp %243 : vector<4x64xf32>
    %cst_77 = arith.constant 1.000000e+00 : f32
    %245 = vector.broadcast %cst_77 : f32 to vector<4x64xf32>
    %246 = arith.addf %245, %244 : vector<4x64xf32>
    %247 = arith.divf %245, %246 : vector<4x64xf32>
    %248 = vector.extract_strided_slice %235 {offsets = [0, 128], sizes = [4, 64], strides = [1, 1]} : vector<4x256xf32> to vector<4x64xf32>
    %249 = arith.negf %248 : vector<4x64xf32>
    %250 = math.exp %249 : vector<4x64xf32>
    %cst_78 = arith.constant 1.000000e+00 : f32
    %251 = vector.broadcast %cst_78 : f32 to vector<4x64xf32>
    %252 = arith.addf %251, %250 : vector<4x64xf32>
    %253 = arith.divf %251, %252 : vector<4x64xf32>
    %254 = vector.extract_strided_slice %235 {offsets = [0, 192], sizes = [4, 64], strides = [1, 1]} : vector<4x256xf32> to vector<4x64xf32>
    %255 = math.tanh %254 : vector<4x64xf32>
    %256 = arith.mulf %241, %232 : vector<4x64xf32>
    %257 = arith.mulf %247, %255 : vector<4x64xf32>
    %258 = arith.addf %256, %257 : vector<4x64xf32>
    %259 = math.tanh %258 : vector<4x64xf32>
    %260 = arith.mulf %253, %259 : vector<4x64xf32>
    %cst_79 = arith.constant dense<0.000000e+00> : vector<4x64xf32>
    %261 = tpu.matmul %258, %5, %cst_79 {dimension_numbers = #tpu.dot_dimension_numbers<[1], [0], [0], [1], [0, 0, 1, 1], [], []>} : vector<4x64xf32>, vector<64x64xf32>, vector<4x64xf32> -> vector<4x64xf32>
    %262 = vector.broadcast %23 : vector<1x64xf32> to vector<4x64xf32>
    %263 = arith.addf %261, %262 : vector<4x64xf32>
    %264 = math.tanh %263 : vector<4x64xf32>
    %265 = arith.subf %258, %264 : vector<4x64xf32>
    %266 = vector.extract_strided_slice %31 {offsets = [0, 6], sizes = [4, 1], strides = [1, 1]} : vector<4x8xf32> to vector<4x1xf32>
    %267 = vector.broadcast %266 : vector<4x1xf32> to vector<4x64xf32>
    %268 = arith.mulf %264, %267 : vector<4x64xf32>
    %269 = arith.addf %265, %268 : vector<4x64xf32>
    %cst_80 = arith.constant dense<0.000000e+00> : vector<4x256xf32>
    %270 = tpu.matmul %260, %1, %cst_80 {dimension_numbers = #tpu.dot_dimension_numbers<[1], [0], [0], [1], [0, 0, 1, 1], [], []>} : vector<4x64xf32>, vector<64x256xf32>, vector<4x256xf32> -> vector<4x256xf32>
    %271 = vector.extract_strided_slice %36 {offsets = [24, 0], sizes = [4, 256], strides = [1, 1]} : vector<32x256xf32> to vector<4x256xf32>
    %272 = arith.addf %270, %271 : vector<4x256xf32>
    %273 = vector.extract_strided_slice %272 {offsets = [0, 0], sizes = [4, 64], strides = [1, 1]} : vector<4x256xf32> to vector<4x64xf32>
    %274 = arith.negf %273 : vector<4x64xf32>
    %275 = math.exp %274 : vector<4x64xf32>
    %cst_81 = arith.constant 1.000000e+00 : f32
    %276 = vector.broadcast %cst_81 : f32 to vector<4x64xf32>
    %277 = arith.addf %276, %275 : vector<4x64xf32>
    %278 = arith.divf %276, %277 : vector<4x64xf32>
    %279 = vector.extract_strided_slice %272 {offsets = [0, 64], sizes = [4, 64], strides = [1, 1]} : vector<4x256xf32> to vector<4x64xf32>
    %280 = arith.negf %279 : vector<4x64xf32>
    %281 = math.exp %280 : vector<4x64xf32>
    %cst_82 = arith.constant 1.000000e+00 : f32
    %282 = vector.broadcast %cst_82 : f32 to vector<4x64xf32>
    %283 = arith.addf %282, %281 : vector<4x64xf32>
    %284 = arith.divf %282, %283 : vector<4x64xf32>
    %285 = vector.extract_strided_slice %272 {offsets = [0, 128], sizes = [4, 64], strides = [1, 1]} : vector<4x256xf32> to vector<4x64xf32>
    %286 = arith.negf %285 : vector<4x64xf32>
    %287 = math.exp %286 : vector<4x64xf32>
    %cst_83 = arith.constant 1.000000e+00 : f32
    %288 = vector.broadcast %cst_83 : f32 to vector<4x64xf32>
    %289 = arith.addf %288, %287 : vector<4x64xf32>
    %290 = arith.divf %288, %289 : vector<4x64xf32>
    %291 = vector.extract_strided_slice %272 {offsets = [0, 192], sizes = [4, 64], strides = [1, 1]} : vector<4x256xf32> to vector<4x64xf32>
    %292 = math.tanh %291 : vector<4x64xf32>
    %293 = arith.mulf %278, %269 : vector<4x64xf32>
    %294 = arith.mulf %284, %292 : vector<4x64xf32>
    %295 = arith.addf %293, %294 : vector<4x64xf32>
    %296 = math.tanh %295 : vector<4x64xf32>
    %297 = arith.mulf %290, %296 : vector<4x64xf32>
    %cst_84 = arith.constant dense<0.000000e+00> : vector<4x64xf32>
    %298 = tpu.matmul %295, %5, %cst_84 {dimension_numbers = #tpu.dot_dimension_numbers<[1], [0], [0], [1], [0, 0, 1, 1], [], []>} : vector<4x64xf32>, vector<64x64xf32>, vector<4x64xf32> -> vector<4x64xf32>
    %299 = vector.broadcast %23 : vector<1x64xf32> to vector<4x64xf32>
    %300 = arith.addf %298, %299 : vector<4x64xf32>
    %301 = math.tanh %300 : vector<4x64xf32>
    %302 = arith.subf %295, %301 : vector<4x64xf32>
    %303 = vector.extract_strided_slice %31 {offsets = [0, 7], sizes = [4, 1], strides = [1, 1]} : vector<4x8xf32> to vector<4x1xf32>
    %304 = vector.broadcast %303 : vector<4x1xf32> to vector<4x64xf32>
    %305 = arith.mulf %301, %304 : vector<4x64xf32>
    %306 = arith.addf %302, %305 : vector<4x64xf32>
    %cst_85 = arith.constant dense<0.000000e+00> : vector<4x256xf32>
    %307 = tpu.matmul %297, %1, %cst_85 {dimension_numbers = #tpu.dot_dimension_numbers<[1], [0], [0], [1], [0, 0, 1, 1], [], []>} : vector<4x64xf32>, vector<64x256xf32>, vector<4x256xf32> -> vector<4x256xf32>
    %308 = vector.extract_strided_slice %36 {offsets = [28, 0], sizes = [4, 256], strides = [1, 1]} : vector<32x256xf32> to vector<4x256xf32>
    %309 = arith.addf %307, %308 : vector<4x256xf32>
    %310 = vector.extract_strided_slice %309 {offsets = [0, 0], sizes = [4, 64], strides = [1, 1]} : vector<4x256xf32> to vector<4x64xf32>
    %311 = arith.negf %310 : vector<4x64xf32>
    %312 = math.exp %311 : vector<4x64xf32>
    %cst_86 = arith.constant 1.000000e+00 : f32
    %313 = vector.broadcast %cst_86 : f32 to vector<4x64xf32>
    %314 = arith.addf %313, %312 : vector<4x64xf32>
    %315 = arith.divf %313, %314 : vector<4x64xf32>
    %316 = vector.extract_strided_slice %309 {offsets = [0, 64], sizes = [4, 64], strides = [1, 1]} : vector<4x256xf32> to vector<4x64xf32>
    %317 = arith.negf %316 : vector<4x64xf32>
    %318 = math.exp %317 : vector<4x64xf32>
    %cst_87 = arith.constant 1.000000e+00 : f32
    %319 = vector.broadcast %cst_87 : f32 to vector<4x64xf32>
    %320 = arith.addf %319, %318 : vector<4x64xf32>
    %321 = arith.divf %319, %320 : vector<4x64xf32>
    %322 = vector.extract_strided_slice %309 {offsets = [0, 128], sizes = [4, 64], strides = [1, 1]} : vector<4x256xf32> to vector<4x64xf32>
    %323 = arith.negf %322 : vector<4x64xf32>
    %324 = math.exp %323 : vector<4x64xf32>
    %cst_88 = arith.constant 1.000000e+00 : f32
    %325 = vector.broadcast %cst_88 : f32 to vector<4x64xf32>
    %326 = arith.addf %325, %324 : vector<4x64xf32>
    %327 = arith.divf %325, %326 : vector<4x64xf32>
    %328 = vector.extract_strided_slice %309 {offsets = [0, 192], sizes = [4, 64], strides = [1, 1]} : vector<4x256xf32> to vector<4x64xf32>
    %329 = math.tanh %328 : vector<4x64xf32>
    %330 = arith.mulf %315, %306 : vector<4x64xf32>
    %331 = arith.mulf %321, %329 : vector<4x64xf32>
    %332 = arith.addf %330, %331 : vector<4x64xf32>
    %333 = math.tanh %332 : vector<4x64xf32>
    %334 = arith.mulf %327, %333 : vector<4x64xf32>
    %cst_89 = arith.constant dense<0.000000e+00> : vector<4x64xf32>
    %335 = tpu.matmul %334, %7, %cst_89 {dimension_numbers = #tpu.dot_dimension_numbers<[1], [0], [0], [1], [0, 0, 1, 1], [], []>} : vector<4x64xf32>, vector<64x64xf32>, vector<4x64xf32> -> vector<4x64xf32>
    %336 = vector.broadcast %24 : vector<1x64xf32> to vector<4x64xf32>
    %337 = arith.addf %335, %336 : vector<4x64xf32>
    %338 = math.tanh %68 : vector<4x64xf32>
    %cst_90 = arith.constant dense<0.000000e+00> : vector<4x64xf32>
    %339 = tpu.matmul %338, %9, %cst_90 {dimension_numbers = #tpu.dot_dimension_numbers<[1], [0], [0], [1], [0, 0, 1, 1], [], []>} : vector<4x64xf32>, vector<64x64xf32>, vector<4x64xf32> -> vector<4x64xf32>
    %340 = arith.addf %337, %339 : vector<4x64xf32>
    %341 = math.tanh %340 : vector<4x64xf32>
    %342 = vector.broadcast %27 : vector<1x64xf32> to vector<4x64xf32>
    %343 = arith.mulf %341, %342 : vector<4x64xf32>
    %cst_91 = arith.constant dense<0.000000e+00> : vector<4xf32>
    %344 = vector.multi_reduction <add>, %343, %cst_91 [1] : vector<4x64xf32> to vector<4xf32>
    %345 = vector.shape_cast %344 : vector<4xf32> to vector<4x1xf32>
    %346 = math.tanh %105 : vector<4x64xf32>
    %cst_92 = arith.constant dense<0.000000e+00> : vector<4x64xf32>
    %347 = tpu.matmul %346, %9, %cst_92 {dimension_numbers = #tpu.dot_dimension_numbers<[1], [0], [0], [1], [0, 0, 1, 1], [], []>} : vector<4x64xf32>, vector<64x64xf32>, vector<4x64xf32> -> vector<4x64xf32>
    %348 = arith.addf %337, %347 : vector<4x64xf32>
    %349 = math.tanh %348 : vector<4x64xf32>
    %350 = vector.broadcast %27 : vector<1x64xf32> to vector<4x64xf32>
    %351 = arith.mulf %349, %350 : vector<4x64xf32>
    %cst_93 = arith.constant dense<0.000000e+00> : vector<4xf32>
    %352 = vector.multi_reduction <add>, %351, %cst_93 [1] : vector<4x64xf32> to vector<4xf32>
    %353 = vector.shape_cast %352 : vector<4xf32> to vector<4x1xf32>
    %354 = math.tanh %142 : vector<4x64xf32>
    %cst_94 = arith.constant dense<0.000000e+00> : vector<4x64xf32>
    %355 = tpu.matmul %354, %9, %cst_94 {dimension_numbers = #tpu.dot_dimension_numbers<[1], [0], [0], [1], [0, 0, 1, 1], [], []>} : vector<4x64xf32>, vector<64x64xf32>, vector<4x64xf32> -> vector<4x64xf32>
    %356 = arith.addf %337, %355 : vector<4x64xf32>
    %357 = math.tanh %356 : vector<4x64xf32>
    %358 = vector.broadcast %27 : vector<1x64xf32> to vector<4x64xf32>
    %359 = arith.mulf %357, %358 : vector<4x64xf32>
    %cst_95 = arith.constant dense<0.000000e+00> : vector<4xf32>
    %360 = vector.multi_reduction <add>, %359, %cst_95 [1] : vector<4x64xf32> to vector<4xf32>
    %361 = vector.shape_cast %360 : vector<4xf32> to vector<4x1xf32>
    %362 = math.tanh %179 : vector<4x64xf32>
    %cst_96 = arith.constant dense<0.000000e+00> : vector<4x64xf32>
    %363 = tpu.matmul %362, %9, %cst_96 {dimension_numbers = #tpu.dot_dimension_numbers<[1], [0], [0], [1], [0, 0, 1, 1], [], []>} : vector<4x64xf32>, vector<64x64xf32>, vector<4x64xf32> -> vector<4x64xf32>
    %364 = arith.addf %337, %363 : vector<4x64xf32>
    %365 = math.tanh %364 : vector<4x64xf32>
    %366 = vector.broadcast %27 : vector<1x64xf32> to vector<4x64xf32>
    %367 = arith.mulf %365, %366 : vector<4x64xf32>
    %cst_97 = arith.constant dense<0.000000e+00> : vector<4xf32>
    %368 = vector.multi_reduction <add>, %367, %cst_97 [1] : vector<4x64xf32> to vector<4xf32>
    %369 = vector.shape_cast %368 : vector<4xf32> to vector<4x1xf32>
    %370 = math.tanh %216 : vector<4x64xf32>
    %cst_98 = arith.constant dense<0.000000e+00> : vector<4x64xf32>
    %371 = tpu.matmul %370, %9, %cst_98 {dimension_numbers = #tpu.dot_dimension_numbers<[1], [0], [0], [1], [0, 0, 1, 1], [], []>} : vector<4x64xf32>, vector<64x64xf32>, vector<4x64xf32> -> vector<4x64xf32>
    %372 = arith.addf %337, %371 : vector<4x64xf32>
    %373 = math.tanh %372 : vector<4x64xf32>
    %374 = vector.broadcast %27 : vector<1x64xf32> to vector<4x64xf32>
    %375 = arith.mulf %373, %374 : vector<4x64xf32>
    %cst_99 = arith.constant dense<0.000000e+00> : vector<4xf32>
    %376 = vector.multi_reduction <add>, %375, %cst_99 [1] : vector<4x64xf32> to vector<4xf32>
    %377 = vector.shape_cast %376 : vector<4xf32> to vector<4x1xf32>
    %378 = math.tanh %253 : vector<4x64xf32>
    %cst_100 = arith.constant dense<0.000000e+00> : vector<4x64xf32>
    %379 = tpu.matmul %378, %9, %cst_100 {dimension_numbers = #tpu.dot_dimension_numbers<[1], [0], [0], [1], [0, 0, 1, 1], [], []>} : vector<4x64xf32>, vector<64x64xf32>, vector<4x64xf32> -> vector<4x64xf32>
    %380 = arith.addf %337, %379 : vector<4x64xf32>
    %381 = math.tanh %380 : vector<4x64xf32>
    %382 = vector.broadcast %27 : vector<1x64xf32> to vector<4x64xf32>
    %383 = arith.mulf %381, %382 : vector<4x64xf32>
    %cst_101 = arith.constant dense<0.000000e+00> : vector<4xf32>
    %384 = vector.multi_reduction <add>, %383, %cst_101 [1] : vector<4x64xf32> to vector<4xf32>
    %385 = vector.shape_cast %384 : vector<4xf32> to vector<4x1xf32>
    %386 = math.tanh %290 : vector<4x64xf32>
    %cst_102 = arith.constant dense<0.000000e+00> : vector<4x64xf32>
    %387 = tpu.matmul %386, %9, %cst_102 {dimension_numbers = #tpu.dot_dimension_numbers<[1], [0], [0], [1], [0, 0, 1, 1], [], []>} : vector<4x64xf32>, vector<64x64xf32>, vector<4x64xf32> -> vector<4x64xf32>
    %388 = arith.addf %337, %387 : vector<4x64xf32>
    %389 = math.tanh %388 : vector<4x64xf32>
    %390 = vector.broadcast %27 : vector<1x64xf32> to vector<4x64xf32>
    %391 = arith.mulf %389, %390 : vector<4x64xf32>
    %cst_103 = arith.constant dense<0.000000e+00> : vector<4xf32>
    %392 = vector.multi_reduction <add>, %391, %cst_103 [1] : vector<4x64xf32> to vector<4xf32>
    %393 = vector.shape_cast %392 : vector<4xf32> to vector<4x1xf32>
    %394 = math.tanh %327 : vector<4x64xf32>
    %cst_104 = arith.constant dense<0.000000e+00> : vector<4x64xf32>
    %395 = tpu.matmul %394, %9, %cst_104 {dimension_numbers = #tpu.dot_dimension_numbers<[1], [0], [0], [1], [0, 0, 1, 1], [], []>} : vector<4x64xf32>, vector<64x64xf32>, vector<4x64xf32> -> vector<4x64xf32>
    %396 = arith.addf %337, %395 : vector<4x64xf32>
    %397 = math.tanh %396 : vector<4x64xf32>
    %398 = vector.broadcast %27 : vector<1x64xf32> to vector<4x64xf32>
    %399 = arith.mulf %397, %398 : vector<4x64xf32>
    %cst_105 = arith.constant dense<0.000000e+00> : vector<4xf32>
    %400 = vector.multi_reduction <add>, %399, %cst_105 [1] : vector<4x64xf32> to vector<4xf32>
    %401 = vector.shape_cast %400 : vector<4xf32> to vector<4x1xf32>
    %402 = arith.maximumf %345, %353 : vector<4x1xf32>
    %403 = arith.maximumf %402, %361 : vector<4x1xf32>
    %404 = arith.maximumf %403, %369 : vector<4x1xf32>
    %405 = arith.maximumf %404, %377 : vector<4x1xf32>
    %406 = arith.maximumf %405, %385 : vector<4x1xf32>
    %407 = arith.maximumf %406, %393 : vector<4x1xf32>
    %408 = arith.maximumf %407, %401 : vector<4x1xf32>
    %409 = arith.subf %345, %408 : vector<4x1xf32>
    %410 = math.exp %409 : vector<4x1xf32>
    %411 = arith.subf %353, %408 : vector<4x1xf32>
    %412 = math.exp %411 : vector<4x1xf32>
    %413 = arith.subf %361, %408 : vector<4x1xf32>
    %414 = math.exp %413 : vector<4x1xf32>
    %415 = arith.subf %369, %408 : vector<4x1xf32>
    %416 = math.exp %415 : vector<4x1xf32>
    %417 = arith.subf %377, %408 : vector<4x1xf32>
    %418 = math.exp %417 : vector<4x1xf32>
    %419 = arith.subf %385, %408 : vector<4x1xf32>
    %420 = math.exp %419 : vector<4x1xf32>
    %421 = arith.subf %393, %408 : vector<4x1xf32>
    %422 = math.exp %421 : vector<4x1xf32>
    %423 = arith.subf %401, %408 : vector<4x1xf32>
    %424 = math.exp %423 : vector<4x1xf32>
    %425 = arith.addf %410, %412 : vector<4x1xf32>
    %426 = arith.addf %425, %414 : vector<4x1xf32>
    %427 = arith.addf %426, %416 : vector<4x1xf32>
    %428 = arith.addf %427, %418 : vector<4x1xf32>
    %429 = arith.addf %428, %420 : vector<4x1xf32>
    %430 = arith.addf %429, %422 : vector<4x1xf32>
    %431 = arith.addf %430, %424 : vector<4x1xf32>
    %cst_106 = arith.constant 1.000000e+00 : f32
    %432 = vector.broadcast %cst_106 : f32 to vector<4x1xf32>
    %433 = arith.divf %432, %431 : vector<4x1xf32>
    %434 = arith.mulf %410, %433 : vector<4x1xf32>
    %435 = vector.broadcast %434 : vector<4x1xf32> to vector<4x64xf32>
    %436 = arith.mulf %435, %338 : vector<4x64xf32>
    %437 = arith.mulf %412, %433 : vector<4x1xf32>
    %438 = vector.broadcast %437 : vector<4x1xf32> to vector<4x64xf32>
    %439 = arith.mulf %438, %346 : vector<4x64xf32>
    %440 = arith.addf %436, %439 : vector<4x64xf32>
    %441 = arith.mulf %414, %433 : vector<4x1xf32>
    %442 = vector.broadcast %441 : vector<4x1xf32> to vector<4x64xf32>
    %443 = arith.mulf %442, %354 : vector<4x64xf32>
    %444 = arith.addf %440, %443 : vector<4x64xf32>
    %445 = arith.mulf %416, %433 : vector<4x1xf32>
    %446 = vector.broadcast %445 : vector<4x1xf32> to vector<4x64xf32>
    %447 = arith.mulf %446, %362 : vector<4x64xf32>
    %448 = arith.addf %444, %447 : vector<4x64xf32>
    %449 = arith.mulf %418, %433 : vector<4x1xf32>
    %450 = vector.broadcast %449 : vector<4x1xf32> to vector<4x64xf32>
    %451 = arith.mulf %450, %370 : vector<4x64xf32>
    %452 = arith.addf %448, %451 : vector<4x64xf32>
    %453 = arith.mulf %420, %433 : vector<4x1xf32>
    %454 = vector.broadcast %453 : vector<4x1xf32> to vector<4x64xf32>
    %455 = arith.mulf %454, %378 : vector<4x64xf32>
    %456 = arith.addf %452, %455 : vector<4x64xf32>
    %457 = arith.mulf %422, %433 : vector<4x1xf32>
    %458 = vector.broadcast %457 : vector<4x1xf32> to vector<4x64xf32>
    %459 = arith.mulf %458, %386 : vector<4x64xf32>
    %460 = arith.addf %456, %459 : vector<4x64xf32>
    %461 = arith.mulf %424, %433 : vector<4x1xf32>
    %462 = vector.broadcast %461 : vector<4x1xf32> to vector<4x64xf32>
    %463 = arith.mulf %462, %394 : vector<4x64xf32>
    %464 = arith.addf %460, %463 : vector<4x64xf32>
    %cst_107 = arith.constant dense<0.000000e+00> : vector<4x256xf32>
    %465 = tpu.matmul %464, %3, %cst_107 {dimension_numbers = #tpu.dot_dimension_numbers<[1], [0], [0], [1], [0, 0, 1, 1], [], []>} : vector<4x64xf32>, vector<64x256xf32>, vector<4x256xf32> -> vector<4x256xf32>
    %466 = vector.broadcast %21 : vector<1x256xf32> to vector<4x256xf32>
    %467 = arith.addf %465, %466 : vector<4x256xf32>
    %468 = vector.extract_strided_slice %467 {offsets = [0, 0], sizes = [4, 64], strides = [1, 1]} : vector<4x256xf32> to vector<4x64xf32>
    %469 = arith.negf %468 : vector<4x64xf32>
    %470 = math.exp %469 : vector<4x64xf32>
    %cst_108 = arith.constant 1.000000e+00 : f32
    %471 = vector.broadcast %cst_108 : f32 to vector<4x64xf32>
    %472 = arith.addf %471, %470 : vector<4x64xf32>
    %473 = arith.divf %471, %472 : vector<4x64xf32>
    %474 = vector.extract_strided_slice %467 {offsets = [0, 128], sizes = [4, 64], strides = [1, 1]} : vector<4x256xf32> to vector<4x64xf32>
    %475 = math.tanh %474 : vector<4x64xf32>
    %476 = arith.mulf %473, %475 : vector<4x64xf32>
    %477 = vector.extract_strided_slice %467 {offsets = [0, 192], sizes = [4, 64], strides = [1, 1]} : vector<4x256xf32> to vector<4x64xf32>
    %478 = arith.negf %477 : vector<4x64xf32>
    %479 = math.exp %478 : vector<4x64xf32>
    %cst_109 = arith.constant 1.000000e+00 : f32
    %480 = vector.broadcast %cst_109 : f32 to vector<4x64xf32>
    %481 = arith.addf %480, %479 : vector<4x64xf32>
    %482 = arith.divf %480, %481 : vector<4x64xf32>
    %483 = math.tanh %476 : vector<4x64xf32>
    %484 = arith.mulf %482, %483 : vector<4x64xf32>
    %485 = math.tanh %484 : vector<4x64xf32>
    %cst_110 = arith.constant dense<0.000000e+00> : vector<4x64xf32>
    %486 = tpu.matmul %484, %11, %cst_110 {dimension_numbers = #tpu.dot_dimension_numbers<[1], [0], [0], [1], [0, 0, 1, 1], [], []>} : vector<4x64xf32>, vector<64x64xf32>, vector<4x64xf32> -> vector<4x64xf32>
    %cst_111 = arith.constant dense<0.000000e+00> : vector<4x64xf32>
    %487 = tpu.matmul %485, %13, %cst_111 {dimension_numbers = #tpu.dot_dimension_numbers<[1], [0], [0], [1], [0, 0, 1, 1], [], []>} : vector<4x64xf32>, vector<64x64xf32>, vector<4x64xf32> -> vector<4x64xf32>
    %488 = arith.addf %486, %487 : vector<4x64xf32>
    %489 = vector.broadcast %25 : vector<1x64xf32> to vector<4x64xf32>
    %490 = arith.addf %488, %489 : vector<4x64xf32>
    %491 = math.tanh %490 : vector<4x64xf32>
    %492 = vector.broadcast %28 : vector<1x64xf32> to vector<4x64xf32>
    %493 = arith.mulf %491, %492 : vector<4x64xf32>
    %cst_112 = arith.constant dense<0.000000e+00> : vector<4xf32>
    %494 = vector.multi_reduction <add>, %493, %cst_112 [1] : vector<4x64xf32> to vector<4xf32>
    %495 = vector.shape_cast %494 : vector<4xf32> to vector<4x1xf32>
    %cst_113 = arith.constant dense<0xFF800000> : vector<1xf32>
    %496 = vector.multi_reduction <maximumf>, %495, %cst_113 [0] : vector<4x1xf32> to vector<1xf32>
    %cst_114 = arith.constant 0xFF800000 : f32
    %497 = vector.broadcast %cst_114 : f32 to vector<1xf32>
    %498 = arith.maximumf %497, %496 : vector<1xf32>
    %499 = vector.shape_cast %498 : vector<1xf32> to vector<1x1xf32>
    %500 = vector.broadcast %499 : vector<1x1xf32> to vector<4x1xf32>
    %501 = arith.subf %495, %500 : vector<4x1xf32>
    %502 = math.exp %501 : vector<4x1xf32>
    %cst_115 = arith.constant dense<0.000000e+00> : vector<1xf32>
    %503 = vector.multi_reduction <add>, %502, %cst_115 [0] : vector<4x1xf32> to vector<1xf32>
    %504 = vector.shape_cast %503 : vector<1xf32> to vector<1x1xf32>
    %505 = vector.broadcast %504 : vector<1x1xf32> to vector<4x1xf32>
    %506 = arith.divf %502, %505 : vector<4x1xf32>
    %507 = vector.broadcast %506 : vector<4x1xf32> to vector<4x64xf32>
    %508 = arith.mulf %507, %485 : vector<4x64xf32>
    %cst_116 = arith.constant dense<0.000000e+00> : vector<64xf32>
    %509 = vector.multi_reduction <add>, %508, %cst_116 [0] : vector<4x64xf32> to vector<64xf32>
    %510 = vector.shape_cast %509 : vector<64xf32> to vector<1x64xf32>
    %c0_117 = arith.constant 0 : index
    %c0_118 = arith.constant 0 : index
    %511 = vector.load %arg2[%c0_117, %c0_118] : memref<4x8xf32, #tpu.memory_space<vmem>>, vector<4x8xf32>
    %c0_119 = arith.constant 0 : index
    %c0_120 = arith.constant 0 : index
    %512 = vector.load %arg6[%c0_119, %c0_120] : memref<8x256xf32, #tpu.memory_space<vmem>>, vector<8x256xf32>
    %cst_121 = arith.constant dense<0.000000e+00> : vector<4x256xf32>
    %513 = tpu.matmul %511, %512, %cst_121 {dimension_numbers = #tpu.dot_dimension_numbers<[1], [0], [0], [1], [0, 0, 1, 1], [], []>} : vector<4x8xf32>, vector<8x256xf32>, vector<4x256xf32> -> vector<4x256xf32>
    %514 = vector.broadcast %22 : vector<1x256xf32> to vector<4x256xf32>
    %515 = arith.addf %513, %514 : vector<4x256xf32>
    %516 = vector.extract_strided_slice %515 {offsets = [0, 0], sizes = [4, 64], strides = [1, 1]} : vector<4x256xf32> to vector<4x64xf32>
    %517 = arith.negf %516 : vector<4x64xf32>
    %518 = math.exp %517 : vector<4x64xf32>
    %cst_122 = arith.constant 1.000000e+00 : f32
    %519 = vector.broadcast %cst_122 : f32 to vector<4x64xf32>
    %520 = arith.addf %519, %518 : vector<4x64xf32>
    %521 = arith.divf %519, %520 : vector<4x64xf32>
    %522 = vector.extract_strided_slice %515 {offsets = [0, 128], sizes = [4, 64], strides = [1, 1]} : vector<4x256xf32> to vector<4x64xf32>
    %523 = math.tanh %522 : vector<4x64xf32>
    %524 = arith.mulf %521, %523 : vector<4x64xf32>
    %525 = vector.extract_strided_slice %515 {offsets = [0, 192], sizes = [4, 64], strides = [1, 1]} : vector<4x256xf32> to vector<4x64xf32>
    %526 = arith.negf %525 : vector<4x64xf32>
    %527 = math.exp %526 : vector<4x64xf32>
    %cst_123 = arith.constant 1.000000e+00 : f32
    %528 = vector.broadcast %cst_123 : f32 to vector<4x64xf32>
    %529 = arith.addf %528, %527 : vector<4x64xf32>
    %530 = arith.divf %528, %529 : vector<4x64xf32>
    %531 = math.tanh %524 : vector<4x64xf32>
    %532 = arith.mulf %530, %531 : vector<4x64xf32>
    %cst_124 = arith.constant dense<0.000000e+00> : vector<4x64xf32>
    %533 = tpu.matmul %532, %15, %cst_124 {dimension_numbers = #tpu.dot_dimension_numbers<[1], [0], [0], [1], [0, 0, 1, 1], [], []>} : vector<4x64xf32>, vector<64x64xf32>, vector<4x64xf32> -> vector<4x64xf32>
    %cst_125 = arith.constant dense<0.000000e+00> : vector<4x64xf32>
    %534 = tpu.matmul %532, %17, %cst_125 {dimension_numbers = #tpu.dot_dimension_numbers<[1], [0], [0], [1], [0, 0, 1, 1], [], []>} : vector<4x64xf32>, vector<64x64xf32>, vector<4x64xf32> -> vector<4x64xf32>
    %535 = arith.addf %533, %534 : vector<4x64xf32>
    %536 = vector.broadcast %26 : vector<1x64xf32> to vector<4x64xf32>
    %537 = arith.addf %535, %536 : vector<4x64xf32>
    %538 = math.tanh %537 : vector<4x64xf32>
    %539 = vector.broadcast %29 : vector<1x64xf32> to vector<4x64xf32>
    %540 = arith.mulf %538, %539 : vector<4x64xf32>
    %cst_126 = arith.constant dense<0.000000e+00> : vector<4xf32>
    %541 = vector.multi_reduction <add>, %540, %cst_126 [1] : vector<4x64xf32> to vector<4xf32>
    %542 = vector.shape_cast %541 : vector<4xf32> to vector<4x1xf32>
    %cst_127 = arith.constant dense<0xFF800000> : vector<1xf32>
    %543 = vector.multi_reduction <maximumf>, %542, %cst_127 [0] : vector<4x1xf32> to vector<1xf32>
    %cst_128 = arith.constant 0xFF800000 : f32
    %544 = vector.broadcast %cst_128 : f32 to vector<1xf32>
    %545 = arith.maximumf %544, %543 : vector<1xf32>
    %546 = vector.shape_cast %545 : vector<1xf32> to vector<1x1xf32>
    %547 = vector.broadcast %546 : vector<1x1xf32> to vector<4x1xf32>
    %548 = arith.subf %542, %547 : vector<4x1xf32>
    %549 = math.exp %548 : vector<4x1xf32>
    %cst_129 = arith.constant dense<0.000000e+00> : vector<1xf32>
    %550 = vector.multi_reduction <add>, %549, %cst_129 [0] : vector<4x1xf32> to vector<1xf32>
    %551 = vector.shape_cast %550 : vector<1xf32> to vector<1x1xf32>
    %552 = vector.broadcast %551 : vector<1x1xf32> to vector<4x1xf32>
    %553 = arith.divf %549, %552 : vector<4x1xf32>
    %554 = vector.broadcast %553 : vector<4x1xf32> to vector<4x64xf32>
    %555 = arith.mulf %554, %532 : vector<4x64xf32>
    %cst_130 = arith.constant dense<0.000000e+00> : vector<64xf32>
    %556 = vector.multi_reduction <add>, %555, %cst_130 [0] : vector<4x64xf32> to vector<64xf32>
    %557 = vector.shape_cast %556 : vector<64xf32> to vector<1x64xf32>
    %cst_131 = arith.constant dense<0.000000e+00> : vector<1x64xf32>
    %558 = tpu.matmul %510, %19, %cst_131 {dimension_numbers = #tpu.dot_dimension_numbers<[1], [0], [0], [1], [0, 0, 1, 1], [], []>} : vector<1x64xf32>, vector<64x64xf32>, vector<1x64xf32> -> vector<1x64xf32>
    %559 = arith.mulf %558, %557 : vector<1x64xf32>
    %cst_132 = arith.constant dense<0.000000e+00> : vector<1xf32>
    %560 = vector.multi_reduction <add>, %559, %cst_132 [1] : vector<1x64xf32> to vector<1xf32>
    %561 = vector.shape_cast %560 : vector<1xf32> to vector<1x1xf32>
    %562 = arith.addf %561, %30 : vector<1x1xf32>
    %563 = math.tanh %562 : vector<1x1xf32>
    %cst_133 = arith.constant 3.000000e+00 : f32
    %564 = vector.broadcast %cst_133 : f32 to vector<1x1xf32>
    %565 = arith.mulf %564, %563 : vector<1x1xf32>
    %c0_134 = arith.constant 0 : index
    %c0_135 = arith.constant 0 : index
    %566 = vector.load %arg8[%c0_134, %c0_135] : memref<1x1xf32, #tpu.memory_space<vmem>>, vector<1x1xf32>
    tpu.vector_store %arg8[%c0_134, %c0_135], %565 {strides = array<i32>} : memref<1x1xf32, #tpu.memory_space<vmem>>, vector<1x1xf32>,
    return
  }
}

</mosaic_0001>

<bundles_post_ra>
// kernel: fisa_forward.1
= control target key start
LH: loop header
LB: loop body
LE: loop exit
PB: predicated region body
PF: predicated region fallthrough
CT: control target
= control target key end

     0   :  { %s4700_s0 = inlined_call_operand.vmem [shape: f32[32,768], index: 0, kind: input, shape index: {}]   ;;  %s4701_s1 = inlined_call_operand.vmem [shape: f32[4,8], index: 1, kind: input, shape index: {}]   ;;  %s4702_s2 = inlined_call_operand.vmem [shape: f32[4,8], index: 2, kind: input, shape index: {}]   ;;  %s4703_s3 = inlined_call_operand.vmem [shape: f32[768,256], index: 3, kind: input, shape index: {}]   ;;  %s4704_s4 = inlined_call_operand.vmem [shape: f32[2,64,256], index: 4, kind: input, shape index: {}]   ;;  %s4705_s5 = inlined_call_operand.vmem [shape: f32[8,64,64], index: 5, kind: input, shape index: {}]   ;;  %s4706_s6 = inlined_call_operand.vmem [shape: f32[8,256], index: 6, kind: input, shape index: {}]   ;;  %s4707_s7 = inlined_call_operand.vmem [shape: f32[11,256], index: 7, kind: input, shape index: {}]   ;;  %s4708_s8 = inlined_call_operand.hbm [shape: f32[1,1], index: 8, kind: output, shape index: {}]  }
   0x1   :  { %v202_v0 = vld [vmem:[%s4703_s3 + $0xf0] sm:$0xff]  ;;  %v200_v3 = vld [vmem:[%s4703_s3 + $0xe0] sm:$0xff] }
   0x2   :  { %v234_v1 = vld [vmem:[%s4703_s3 + $0x1f0] sm:$0xff]  ;;  %369 = vmatpush.msra.mxu0 %v202_v0  ;;  %v232_v4 = vld [vmem:[%s4703_s3 + $0x1e0] sm:$0xff]  ;;  %v3152_v0 = vld [vmem:[%s4700_s0 + $0x8] sm:$0xff] }
   0x3   :  { %v266_v2 = vld [vmem:[%s4703_s3 + $0x2f0] sm:$0xff]  ;;  %398 = vmatpush.msra.mxu1 %v234_v1  ;;  %v264_v5 = vld [vmem:[%s4703_s3 + $0x2e0] sm:$0xff] }
   0x4   :  { %427 = vmatpush.msra.mxu2 %v266_v2  ;;  %v298_v6 = vld [vmem:[%s4703_s3 + $0x3f0] sm:$0xff]  ;;  %370 = vmatpush.msra.mxu0 %v200_v3  ;;  %v296_v10 = vld [vmem:[%s4703_s3 + $0x3e0] sm:$0xff] }
   0x5   :  { %v198_v7 = vld [vmem:[%s4703_s3 + $0xd0] sm:$0xff]  ;;  %399 = vmatpush.msra.mxu1 %v232_v4  ;;  %456 = vmatpush.msra.mxu3 %v298_v6  ;;  %v196_v11 = vld [vmem:[%s4703_s3 + $0xc0] sm:$0xff]  ;;  %v3176_v6 = vld [vmem:[%s4700_s0 + $0x18] sm:$0xff] }
   0x6   :  { %v230_v8 = vld [vmem:[%s4703_s3 + $0x1d0] sm:$0xff]  ;;  %428 = vmatpush.msra.mxu2 %v264_v5  ;;  %v228_v12 = vld [vmem:[%s4703_s3 + $0x1c0] sm:$0xff]  ;;  %371 = vmatpush.msra.mxu0 %v198_v7  ;;  %v203_v5 = vld [vmem:[%s4703_s3 + $0xf8] sm:$0xff] }
   0x7   :  { %v262_v9 = vld [vmem:[%s4703_s3 + $0x2d0] sm:$0xff]  ;;  %400 = vmatpush.msra.mxu1 %v230_v8  ;;  %v260_v13 = vld [vmem:[%s4703_s3 + $0x2c0] sm:$0xff]  ;;  %457 = vmatpush.msra.mxu3 %v296_v10  ;;  %v235_v10 = vld [vmem:[%s4703_s3 + $0x1f8] sm:$0xff] }
   0x8   :  { %v294_v14 = vld [vmem:[%s4703_s3 + $0x3d0] sm:$0xff]  ;;  %429 = vmatpush.msra.mxu2 %v262_v9  ;;  %372 = vmatpush.msra.mxu0 %v196_v11  ;;  %v292_v18 = vld [vmem:[%s4703_s3 + $0x3c0] sm:$0xff]  ;;  %v201_v9 = vld [vmem:[%s4703_s3 + $0xe8] sm:$0xff] }
   0x9   :  { %v194_v15 = vld [vmem:[%s4703_s3 + $0xb0] sm:$0xff]  ;;  %401 = vmatpush.msra.mxu1 %v228_v12  ;;  %458 = vmatpush.msra.mxu3 %v294_v14  ;;  %v192_v19 = vld [vmem:[%s4703_s3 + $0xa0] sm:$0xff]  ;;  %v233_v14 = vld [vmem:[%s4703_s3 + $0x1e8] sm:$0xff] }
   0xa   :  { %v226_v16 = vld [vmem:[%s4703_s3 + $0x1b0] sm:$0xff]  ;;  %430 = vmatpush.msra.mxu2 %v260_v13  ;;  %v224_v20 = vld [vmem:[%s4703_s3 + $0x1a0] sm:$0xff]  ;;  %373 = vmatpush.msra.mxu0 %v194_v15  ;;  %v199_v13 = vld [vmem:[%s4703_s3 + $0xd8] sm:$0xff] }
   0xb   :  { %v258_v17 = vld [vmem:[%s4703_s3 + $0x2b0] sm:$0xff]  ;;  %402 = vmatpush.msra.mxu1 %v226_v16  ;;  %v256_v21 = vld [vmem:[%s4703_s3 + $0x2a0] sm:$0xff]  ;;  %459 = vmatpush.msra.mxu3 %v292_v18  ;;  %v231_v18 = vld [vmem:[%s4703_s3 + $0x1d8] sm:$0xff] }
   0xc   :  { %v290_v22 = vld [vmem:[%s4703_s3 + $0x3b0] sm:$0xff]  ;;  %431 = vmatpush.msra.mxu2 %v258_v17  ;;  %374 = vmatpush.msra.mxu0 %v192_v19  ;;  %v288_v26 = vld [vmem:[%s4703_s3 + $0x3a0] sm:$0xff]  ;;  %v197_v17 = vld [vmem:[%s4703_s3 + $0xc8] sm:$0xff] }
   0xd   :  { %v190_v23 = vld [vmem:[%s4703_s3 + $0x90] sm:$0xff]  ;;  %403 = vmatpush.msra.mxu1 %v224_v20  ;;  %460 = vmatpush.msra.mxu3 %v290_v22  ;;  %v188_v27 = vld [vmem:[%s4703_s3 + $0x80] sm:$0xff]  ;;  %v3224_v20 = vld [vmem:[%s4700_s0 + $0x38] sm:$0xff] }
   0xe   :  { %v222_v24 = vld [vmem:[%s4703_s3 + $0x190] sm:$0xff]  ;;  %432 = vmatpush.msra.mxu2 %v256_v21  ;;  %v220_v28 = vld [vmem:[%s4703_s3 + $0x180] sm:$0xff]  ;;  %375 = vmatpush.msra.mxu0 %v190_v23 }
   0xf   :  { %v254_v25 = vld [vmem:[%s4703_s3 + $0x290] sm:$0xff]  ;;  %404 = vmatpush.msra.mxu1 %v222_v24  ;;  %v252_v29 = vld [vmem:[%s4703_s3 + $0x280] sm:$0xff]  ;;  %461 = vmatpush.msra.mxu3 %v288_v26  ;;  %v195_v24 = vld [vmem:[%s4703_s3 + $0xb8] sm:$0xff] }
  0x10   :  { %v286_v30 = vld [vmem:[%s4703_s3 + $0x390] sm:$0xff]  ;;  %433 = vmatpush.msra.mxu2 %v254_v25  ;;  %376 = vmatpush.msra.mxu0 %v188_v27  ;;  %v284_v34 = vld [vmem:[%s4703_s3 + $0x380] sm:$0xff]  ;;  %v229_v25 = vld [vmem:[%s4703_s3 + $0x1c8] sm:$0xff] }
  0x11   :  { %v186_v31 = vld [vmem:[%s4703_s3 + $0x70] sm:$0xff]  ;;  %405 = vmatpush.msra.mxu1 %v220_v28  ;;  %462 = vmatpush.msra.mxu3 %v286_v30  ;;  %v184_v35 = vld [vmem:[%s4703_s3 + $0x60] sm:$0xff]  ;;  %v3252_v27 = vld [vmem:[%s4700_s0 + $0x48] sm:$0xff] }
  0x12   :  { %v218_v32 = vld [vmem:[%s4703_s3 + $0x170] sm:$0xff]  ;;  %434 = vmatpush.msra.mxu2 %v252_v29  ;;  %v216_v36 = vld [vmem:[%s4703_s3 + $0x160] sm:$0xff]  ;;  %377 = vmatpush.msra.mxu0 %v186_v31  ;;  %v193_v29 = vld [vmem:[%s4703_s3 + $0xa8] sm:$0xff] }
  0x13   :  { %v250_v33 = vld [vmem:[%s4703_s3 + $0x270] sm:$0xff]  ;;  %406 = vmatpush.msra.mxu1 %v218_v32  ;;  %v248_v37 = vld [vmem:[%s4703_s3 + $0x260] sm:$0xff]  ;;  %463 = vmatpush.msra.mxu3 %v284_v34  ;;  %v227_v30 = vld [vmem:[%s4703_s3 + $0x1b8] sm:$0xff] }
  0x14   :  { %v282_v38 = vld [vmem:[%s4703_s3 + $0x370] sm:$0xff]  ;;  %435 = vmatpush.msra.mxu2 %v250_v33  ;;  %378 = vmatpush.msra.mxu0 %v184_v35  ;;  %v280_v42 = vld [vmem:[%s4703_s3 + $0x360] sm:$0xff]  ;;  %v191_v33 = vld [vmem:[%s4703_s3 + $0x98] sm:$0xff] }
  0x15   :  { %v182_v39 = vld [vmem:[%s4703_s3 + $0x50] sm:$0xff]  ;;  %407 = vmatpush.msra.mxu1 %v216_v36  ;;  %464 = vmatpush.msra.mxu3 %v282_v38  ;;  %v180_v43 = vld [vmem:[%s4703_s3 + $0x40] sm:$0xff]  ;;  %v225_v34 = vld [vmem:[%s4703_s3 + $0x1a8] sm:$0xff] }
  0x16   :  { %v214_v40 = vld [vmem:[%s4703_s3 + $0x150] sm:$0xff]  ;;  %436 = vmatpush.msra.mxu2 %v248_v37  ;;  %v212_v44 = vld [vmem:[%s4703_s3 + $0x140] sm:$0xff]  ;;  %379 = vmatpush.msra.mxu0 %v182_v39  ;;  %v189_v37 = vld [vmem:[%s4703_s3 + $0x88] sm:$0xff] }
  0x17   :  { %v246_v41 = vld [vmem:[%s4703_s3 + $0x250] sm:$0xff]  ;;  %408 = vmatpush.msra.mxu1 %v214_v40  ;;  %v244_v45 = vld [vmem:[%s4703_s3 + $0x240] sm:$0xff]  ;;  %465 = vmatpush.msra.mxu3 %v280_v42  ;;  %v223_v38 = vld [vmem:[%s4703_s3 + $0x198] sm:$0xff] }
  0x18   :  { %v278_v46 = vld [vmem:[%s4703_s3 + $0x350] sm:$0xff]  ;;  %437 = vmatpush.msra.mxu2 %v246_v41  ;;  %380 = vmatpush.msra.mxu0 %v180_v43  ;;  %v276_v50 = vld [vmem:[%s4703_s3 + $0x340] sm:$0xff]  ;;  %v3296_v40 = vld [vmem:[%s4700_s0 + $0x68] sm:$0xff] }
  0x19   :  { %v178_v47 = vld [vmem:[%s4703_s3 + $0x30] sm:$0xff]  ;;  %409 = vmatpush.msra.mxu1 %v212_v44  ;;  %466 = vmatpush.msra.mxu3 %v278_v46  ;;  %v176_v51 = vld [vmem:[%s4703_s3 + $0x20] sm:$0xff]  ;;  %v187_v44 = vld [vmem:[%s4703_s3 + $0x78] sm:$0xff] }
  0x1a   :  { %v210_v48 = vld [vmem:[%s4703_s3 + $0x130] sm:$0xff]  ;;  %438 = vmatpush.msra.mxu2 %v244_v45  ;;  %v208_v52 = vld [vmem:[%s4703_s3 + $0x120] sm:$0xff]  ;;  %381 = vmatpush.msra.mxu0 %v178_v47  ;;  %v221_v45 = vld [vmem:[%s4703_s3 + $0x188] sm:$0xff] }
  0x1b   :  { %v242_v49 = vld [vmem:[%s4703_s3 + $0x230] sm:$0xff]  ;;  %410 = vmatpush.msra.mxu1 %v210_v48  ;;  %v240_v53 = vld [vmem:[%s4703_s3 + $0x220] sm:$0xff]  ;;  %467 = vmatpush.msra.mxu3 %v276_v50  ;;  %v3324_v47 = vld [vmem:[%s4700_s0 + $0x78] sm:$0xff] }
  0x1c   :  { %v274_v54 = vld [vmem:[%s4703_s3 + $0x330] sm:$0xff]  ;;  %439 = vmatpush.msra.mxu2 %v242_v49  ;;  %382 = vmatpush.msra.mxu0 %v176_v51  ;;  %v272_v58 = vld [vmem:[%s4703_s3 + $0x320] sm:$0xff]  ;;  %v185_v49 = vld [vmem:[%s4703_s3 + $0x68] sm:$0xff] }
  0x1d   :  { %v174_v55 = vld [vmem:[%s4703_s3 + $0x10] sm:$0xff]  ;;  %411 = vmatpush.msra.mxu1 %v208_v52  ;;  %468 = vmatpush.msra.mxu3 %v274_v54  ;;  %v172_v59 = vld [vmem:[%s4703_s3] sm:$0xff]  ;;  %v219_v50 = vld [vmem:[%s4703_s3 + $0x178] sm:$0xff] }
  0x1e   :  { %v206_v56 = vld [vmem:[%s4703_s3 + $0x110] sm:$0xff]  ;;  %440 = vmatpush.msra.mxu2 %v240_v53  ;;  %v204_v60 = vld [vmem:[%s4703_s3 + $0x100] sm:$0xff]  ;;  %383 = vmatpush.msra.mxu0 %v174_v55  ;;  %v183_v53 = vld [vmem:[%s4703_s3 + $0x58] sm:$0xff] }
  0x1f   :  { %v238_v57 = vld [vmem:[%s4703_s3 + $0x210] sm:$0xff]  ;;  %412 = vmatpush.msra.mxu1 %v206_v56  ;;  %v236_v61 = vld [vmem:[%s4703_s3 + $0x200] sm:$0xff]  ;;  %469 = vmatpush.msra.mxu3 %v272_v58  ;;  %v217_v54 = vld [vmem:[%s4703_s3 + $0x168] sm:$0xff] }
  0x20   :  { %v270_v62 = vld [vmem:[%s4703_s3 + $0x310] sm:$0xff]  ;;  %441 = vmatpush.msra.mxu2 %v238_v57  ;;  %v3147_v63 = vld [vmem:[%s4700_s0] sm:$0xff]  ;;  %384 = vmatpush.msra.mxu0 %v172_v59 }
  0x21   :  { %413 = vmatpush.msra.mxu1 %v204_v60  ;;  %v3157_v1 = vld [vmem:[%s4700_s0 + $0x10] sm:$0xff]  ;;  %470 = vmatpush.msra.mxu3 %v270_v62  ;;  %v268_v3 = vld [vmem:[%s4703_s3 + $0x300] sm:$0xff] }
  0x22   :  { %v362_v2 = vld [vmem:[%s4703_s3 + $0x5f0] sm:$0xff]  ;;  %442 = vmatpush.msra.mxu2 %v236_v61  ;;  %385 = vmatmul.f32.vlgmr.msra.gmra.mxu0 %v3147_v63  ;;  %v360_v7 = vld [vmem:[%s4703_s3 + $0x5e0] sm:$0xff] }
  0x23   :  { %v330_v4 = vld [vmem:[%s4703_s3 + $0x4f0] sm:$0xff]  ;;  %414 = vmatmul.f32.vlgmr.msra.gmra.mxu1 %v3152_v0  ;;  %443 = vmatmul.f32.vlgmr.msra.gmra.mxu2 %v3157_v1  ;;  %v328_v8 = vld [vmem:[%s4703_s3 + $0x4e0] sm:$0xff] }
  0x24   :  { %514 = vmatpush.msrb.mxu1 %v362_v2  ;;  %471 = vmatpush.msra.mxu3 %v268_v3  ;;  %v358_v11 = vld [vmem:[%s4703_s3 + $0x5d0] sm:$0xff]  ;;  %v356_v15 = vld [vmem:[%s4703_s3 + $0x5c0] sm:$0xff] }
  0x25   :  { %485 = vmatpush.msrb.mxu0 %v330_v4  ;;  %543 = vmatpush.msrb.mxu2 %v203_v5  ;;  %v326_v12 = vld [vmem:[%s4703_s3 + $0x4d0] sm:$0xff]  ;;  %v324_v16 = vld [vmem:[%s4703_s3 + $0x4c0] sm:$0xff] }
  0x26   :  { %472 = vmatmul.f32.vlgmr.msra.gmra.mxu3 %v3176_v6  ;;  %515 = vmatpush.msrb.mxu1 %v360_v7  ;;  %v3219_v19 = vld [vmem:[%s4700_s0 + $0x30] sm:$0xff]  ;;  %v3229_v21 = vld [vmem:[%s4700_s0 + $0x40] sm:$0xff] }
  0x27   :  { %486 = vmatpush.msrb.mxu0 %v328_v8  ;;  %544 = vmatpush.msrb.mxu2 %v201_v9  ;;  %v354_v22 = vld [vmem:[%s4703_s3 + $0x5b0] sm:$0xff]  ;;  %v352_v26 = vld [vmem:[%s4703_s3 + $0x5a0] sm:$0xff] }
  0x28   :  { %572 = vmatpush.msrb.mxu3 %v235_v10  ;;  %516 = vmatpush.msrb.mxu1 %v358_v11  ;;  %v322_v23 = vld [vmem:[%s4703_s3 + $0x4b0] sm:$0xff]  ;;  %v320_v28 = vld [vmem:[%s4703_s3 + $0x4a0] sm:$0xff] }
  0x29   :  { %487 = vmatpush.msrb.mxu0 %v326_v12  ;;  %545 = vmatpush.msrb.mxu2 %v199_v13  ;;  %v350_v31 = vld [vmem:[%s4703_s3 + $0x590] sm:$0xff]  ;;  %v348_v35 = vld [vmem:[%s4703_s3 + $0x580] sm:$0xff] }
  0x2a   :  { %573 = vmatpush.msrb.mxu3 %v233_v14  ;;  %517 = vmatpush.msrb.mxu1 %v356_v15  ;;  %v318_v32 = vld [vmem:[%s4703_s3 + $0x490] sm:$0xff]  ;;  %v316_v36 = vld [vmem:[%s4703_s3 + $0x480] sm:$0xff] }
  0x2b   :  { %488 = vmatpush.msrb.mxu0 %v324_v16  ;;  %546 = vmatpush.msrb.mxu2 %v197_v17  ;;  %v3291_v39 = vld [vmem:[%s4700_s0 + $0x60] sm:$0xff]  ;;  %v3301_v41 = vld [vmem:[%s4700_s0 + $0x70] sm:$0xff] }
  0x2c   :  { %574 = vmatpush.msrb.mxu3 %v231_v18  ;;  %388 = vmatmul.f32.gmra.mxu0 %v3219_v19  ;;  %v346_v42 = vld [vmem:[%s4703_s3 + $0x570] sm:$0xff]  ;;  %v344_v46 = vld [vmem:[%s4703_s3 + $0x560] sm:$0xff] }
  0x2d   :  { %417 = vmatmul.f32.gmra.mxu1 %v3224_v20  ;;  %446 = vmatmul.f32.gmra.mxu2 %v3229_v21  ;;  %v314_v43 = vld [vmem:[%s4703_s3 + $0x470] sm:$0xff]  ;;  %v312_v48 = vld [vmem:[%s4703_s3 + $0x460] sm:$0xff] }
  0x2e   :  { %518 = vmatpush.msrb.mxu1 %v354_v22  ;;  %489 = vmatpush.msrb.mxu0 %v322_v23  ;;  %v342_v51 = vld [vmem:[%s4703_s3 + $0x550] sm:$0xff]  ;;  %v340_v55 = vld [vmem:[%s4703_s3 + $0x540] sm:$0xff] }
  0x2f   :  { %547 = vmatpush.msrb.mxu2 %v195_v24  ;;  %575 = vmatpush.msrb.mxu3 %v229_v25  ;;  %v310_v52 = vld [vmem:[%s4703_s3 + $0x450] sm:$0xff]  ;;  %v308_v56 = vld [vmem:[%s4703_s3 + $0x440] sm:$0xff] }
  0x30   :  { %519 = vmatpush.msrb.mxu1 %v352_v26  ;;  %475 = vmatmul.f32.gmra.mxu3 %v3252_v27 }
  0x31   :  { %490 = vmatpush.msrb.mxu0 %v320_v28  ;;  %548 = vmatpush.msrb.mxu2 %v193_v29 }
  0x32   :  { %576 = vmatpush.msrb.mxu3 %v227_v30  ;;  %520 = vmatpush.msrb.mxu1 %v350_v31 }
  0x33   :  { %491 = vmatpush.msrb.mxu0 %v318_v32  ;;  %549 = vmatpush.msrb.mxu2 %v191_v33 }
  0x34   :  { %577 = vmatpush.msrb.mxu3 %v225_v34  ;;  %521 = vmatpush.msrb.mxu1 %v348_v35 }
  0x35   :  { %492 = vmatpush.msrb.mxu0 %v316_v36  ;;  %550 = vmatpush.msrb.mxu2 %v189_v37 }
  0x36   :  { %578 = vmatpush.msrb.mxu3 %v223_v38  ;;  %391 = vmatmul.f32.gmra.mxu0 %v3291_v39 }
  0x37   :  { %420 = vmatmul.f32.gmra.mxu1 %v3296_v40  ;;  %449 = vmatmul.f32.gmra.mxu2 %v3301_v41 }
  0x38   :  { %522 = vmatpush.msrb.mxu1 %v346_v42  ;;  %493 = vmatpush.msrb.mxu0 %v314_v43 }
  0x39   :  { %551 = vmatpush.msrb.mxu2 %v187_v44  ;;  %579 = vmatpush.msrb.mxu3 %v221_v45 }
  0x3a   :  { %523 = vmatpush.msrb.mxu1 %v344_v46  ;;  %478 = vmatmul.f32.gmra.mxu3 %v3324_v47 }
  0x3b   :  { %494 = vmatpush.msrb.mxu0 %v312_v48  ;;  %552 = vmatpush.msrb.mxu2 %v185_v49 }
  0x3c   :  { %580 = vmatpush.msrb.mxu3 %v219_v50 }
  0x3d   :  { %13 = vsyncpa [#allocation3], 0  ;;  %524 = vmatpush.msrb.mxu1 %v342_v51  ;;  %495 = vmatpush.msrb.mxu0 %v310_v52  ;;  %v181_v57 = vld [vmem:[%s4703_s3 + $0x48] sm:$0xff]  ;;  %v215_v58 = vld [vmem:[%s4703_s3 + $0x158] sm:$0xff]  ;;  %s2901_s21 = smov 64   ;;  %vm717_vm4 = vcmask 523264  }
  0x3e   :  { %553 = vmatpush.msrb.mxu2 %v183_v53  ;;  %581 = vmatpush.msrb.mxu3 %v217_v54  ;;  %v3363_v59 = vld [vmem:[%s4700_s0 + $0x90] sm:$0xff]  ;;  %v3368_v60 = vld [vmem:[%s4700_s0 + $0x98] sm:$0xff]  ;;  %v3373_v61 = vld [vmem:[%s4700_s0 + $0xa0] sm:$0xff]  ;;  %s2909_s16 = smov [#allocation2]   ;;  %s2484_s19 = sshll.u32 %s4708_s8, 4  ;;  %s2485_s19 = int_to_ptr.hbm [resolvable:$true] %s2484_s19 }
  0x3f   :  { %525 = vmatpush.msrb.mxu1 %v340_v55  ;;  %496 = vmatpush.msrb.mxu0 %v308_v56  ;;  %v338_v62 = vld [vmem:[%s4703_s3 + $0x530] sm:$0xff]  ;;  %v179_v3 = vld [vmem:[%s4703_s3 + $0x38] sm:$0xff]  ;;  %v213_v4 = vld [vmem:[%s4703_s3 + $0x148] sm:$0xff]  ;;  %s2482_s17 = sshll.u32 %s2909_s16, 4  ;;  %s2483_s17 = int_to_ptr.vmem [resolvable:$true] %s2482_s17 }
  0x40   :  { %554 = vmatpush.msrb.mxu2 %v181_v57  ;;  %582 = vmatpush.msrb.mxu3 %v215_v58  ;;  %v306_v2 = vld [vmem:[%s4703_s3 + $0x430] sm:$0xff]  ;;  %v336_v5 = vld [vmem:[%s4703_s3 + $0x520] sm:$0xff]  ;;  %v3396_v7 = vld [vmem:[%s4700_s0 + $0xa8] sm:$0xff] }
  0x41   :  { %394 = vmatmul.f32.gmra.mxu0 %v3363_v59  ;;  %423 = vmatmul.f32.gmra.mxu1 %v3368_v60  ;;  %v304_v8 = vld [vmem:[%s4703_s3 + $0x420] sm:$0xff]  ;;  %v177_v9 = vld [vmem:[%s4703_s3 + $0x28] sm:$0xff]  ;;  %v211_v10 = vld [vmem:[%s4703_s3 + $0x138] sm:$0xff] }
  0x42   :  { %452 = vmatmul.f32.gmra.mxu2 %v3373_v61  ;;  %526 = vmatpush.msrb.mxu1 %v338_v62  ;;  %v334_v11 = vld [vmem:[%s4703_s3 + $0x510] sm:$0xff]  ;;  %v175_v13 = vld [vmem:[%s4703_s3 + $0x18] sm:$0xff]  ;;  %v209_v14 = vld [vmem:[%s4703_s3 + $0x128] sm:$0xff] }
  0x43   :  { %497 = vmatpush.msrb.mxu0 %v306_v2  ;;  %555 = vmatpush.msrb.mxu2 %v179_v3  ;;  %v302_v12 = vld [vmem:[%s4703_s3 + $0x410] sm:$0xff]  ;;  %v332_v15 = vld [vmem:[%s4703_s3 + $0x500] sm:$0xff]  ;;  %v173_v17 = vld [vmem:[%s4703_s3 + $0x8] sm:$0xff] }
  0x44   :  { %583 = vmatpush.msrb.mxu3 %v213_v4  ;;  %527 = vmatpush.msrb.mxu1 %v336_v5  ;;  %v300_v16 = vld [vmem:[%s4703_s3 + $0x400] sm:$0xff]  ;;  %v207_v18 = vld [vmem:[%s4703_s3 + $0x118] sm:$0xff]  ;;  %v3440_v23 = vld [vmem:[%s4700_s0 + $0x28] sm:$0xff] }
  0x45   :  { %481 = vmatmul.f32.gmra.mxu3 %v3396_v7  ;;  %498 = vmatpush.msrb.mxu0 %v304_v8  ;;  %v3435_v22 = vld [vmem:[%s4700_s0 + $0x20] sm:$0xff]  ;;  %v299_v24 = vld [vmem:[%s4703_s3 + $0x3f8] sm:$0xff]  ;;  %v205_v25 = vld [vmem:[%s4703_s3 + $0x108] sm:$0xff] }
  0x46   :  { %556 = vmatpush.msrb.mxu2 %v177_v9  ;;  %584 = vmatpush.msrb.mxu3 %v211_v10  ;;  %v267_v26 = vld [vmem:[%s4703_s3 + $0x2f8] sm:$0xff]  ;;  %v297_v29 = vld [vmem:[%s4703_s3 + $0x3e8] sm:$0xff]  ;;  %v3497_v42 = vld [vmem:[%s4700_s0 + $0x50] sm:$0xff] }
  0x47   :  { %528 = vmatpush.msrb.mxu1 %v334_v11  ;;  %499 = vmatpush.msrb.mxu0 %v302_v12  ;;  %v331_v28 = vld [vmem:[%s4703_s3 + $0x4f8] sm:$0xff]  ;;  %v265_v30 = vld [vmem:[%s4703_s3 + $0x2e8] sm:$0xff]  ;;  %v3559_v62 = vld [vmem:[%s4700_s0 + $0x80] sm:$0xff] }
  0x48   :  { %557 = vmatpush.msrb.mxu2 %v175_v13  ;;  %585 = vmatpush.msrb.mxu3 %v209_v14  ;;  %v329_v31 = vld [vmem:[%s4703_s3 + $0x4e8] sm:$0xff]  ;;  %v363_v32 = vld [vmem:[%s4703_s3 + $0x5f8] sm:$0xff] }
  0x49   :  { %529 = vmatpush.msrb.mxu1 %v332_v15  ;;  %500 = vmatpush.msrb.mxu0 %v300_v16  ;;  %v263_v33 = vld [vmem:[%s4703_s3 + $0x2d8] sm:$0xff]  ;;  %v361_v35 = vld [vmem:[%s4703_s3 + $0x5e8] sm:$0xff] }
  0x4a   :  { %558 = vmatpush.msrb.mxu2 %v173_v17  ;;  %586 = vmatpush.msrb.mxu3 %v207_v18  ;;  %v327_v34 = vld [vmem:[%s4703_s3 + $0x4d8] sm:$0xff]  ;;  %v261_v36 = vld [vmem:[%s4703_s3 + $0x2c8] sm:$0xff] }
  0x4b   :  { %501 = vmatmul.f32.vlgmr.msrb.gmra.mxu0 %v3435_v22  ;;  %530 = vmatmul.f32.vlgmr.msrb.gmra.mxu1 %v3440_v23  ;;  %v325_v37 = vld [vmem:[%s4703_s3 + $0x4c8] sm:$0xff]  ;;  %v359_v38 = vld [vmem:[%s4703_s3 + $0x5d8] sm:$0xff] }
  0x4c   :  { %559 = vmatmul.f32.vlgmr.msrb.gmra.mxu2 %v3147_v63  ;;  %630 = vmatpush.msra.mxu1 %v299_v24  ;;  %v295_v63 = vld [vmem:[%s4703_s3 + $0x3d8] sm:$0xff]  ;;  %v357_v48 = vld [vmem:[%s4703_s3 + $0x5c8] sm:$0xff]  ;;  %v3621_v24 = vld [vmem:[%s4700_s0 + $0xb0] sm:$0xff] }
  0x4d   :  { %587 = vmatpush.msrb.mxu3 %v205_v25  ;;  %601 = vmatpush.msra.mxu0 %v267_v26  ;;  %v3502_v43 = vld [vmem:[%s4700_s0 + $0x58] sm:$0xff]  ;;  %v289_v49 = vld [vmem:[%s4703_s3 + $0x3a8] sm:$0xff] }
  0x4e   :  { %659 = vmatpush.msra.mxu2 %v331_v28  ;;  %588 = vmatmul.f32.vlgmr.msrb.gmra.mxu3 %v3152_v0  ;;  %v293_v0 = vld [vmem:[%s4703_s3 + $0x3c8] sm:$0xff]  ;;  %v291_v44 = vld [vmem:[%s4703_s3 + $0x3b8] sm:$0xff] }
  0x4f   :  { %631 = vmatpush.msra.mxu1 %v297_v29  ;;  %602 = vmatpush.msra.mxu0 %v265_v30  ;;  %v259_v45 = vld [vmem:[%s4703_s3 + $0x2b8] sm:$0xff]  ;;  %v257_v50 = vld [vmem:[%s4703_s3 + $0x2a8] sm:$0xff] }
  0x50   :  { %660 = vmatpush.msra.mxu2 %v329_v31  ;;  %688 = vmatpush.msra.mxu3 %v363_v32  ;;  %v323_v46 = vld [vmem:[%s4703_s3 + $0x4b8] sm:$0xff]  ;;  %v321_v51 = vld [vmem:[%s4703_s3 + $0x4a8] sm:$0xff] }
  0x51   :  { %632 = vmatpush.msra.mxu1 %v295_v63  ;;  %603 = vmatpush.msra.mxu0 %v263_v33  ;;  %v355_v52 = vld [vmem:[%s4703_s3 + $0x5b8] sm:$0xff]  ;;  %v353_v55 = vld [vmem:[%s4703_s3 + $0x5a8] sm:$0xff] }
  0x52   :  { %661 = vmatpush.msra.mxu2 %v327_v34  ;;  %689 = vmatpush.msra.mxu3 %v361_v35  ;;  %v255_v53 = vld [vmem:[%s4703_s3 + $0x298] sm:$0xff]  ;;  %v285_v56 = vld [vmem:[%s4703_s3 + $0x388] sm:$0xff] }
  0x53   :  { %633 = vmatpush.msra.mxu1 %v293_v0  ;;  %604 = vmatpush.msra.mxu0 %v261_v36  ;;  %v319_v54 = vld [vmem:[%s4703_s3 + $0x498] sm:$0xff]  ;;  %v253_v57 = vld [vmem:[%s4703_s3 + $0x288] sm:$0xff] }
  0x54   :  { %662 = vmatpush.msra.mxu2 %v325_v37  ;;  %690 = vmatpush.msra.mxu3 %v359_v38  ;;  %v351_v58 = vld [vmem:[%s4703_s3 + $0x598] sm:$0xff]  ;;  %v3564_v2 = vld [vmem:[%s4700_s0 + $0x88] sm:$0xff] }
  0x55   :  { %504 = vmatmul.f32.gmra.mxu0 %v3497_v42  ;;  %533 = vmatmul.f32.gmra.mxu1 %v3502_v43  ;;  %v283_v3 = vld [vmem:[%s4703_s3 + $0x378] sm:$0xff]  ;;  %v349_v8 = vld [vmem:[%s4703_s3 + $0x588] sm:$0xff] }
  0x56   :  { %562 = vmatmul.f32.gmra.mxu2 %v3219_v19  ;;  %634 = vmatpush.msra.mxu1 %v291_v44  ;;  %v287_v19 = vld [vmem:[%s4703_s3 + $0x398] sm:$0xff]  ;;  %v281_v9 = vld [vmem:[%s4703_s3 + $0x368] sm:$0xff]  ;;  %v3683_v44 = vld [vmem:[%s4704_s4 + $0x70] sm:$0xff] }
  0x57   :  { %605 = vmatpush.msra.mxu0 %v259_v45  ;;  %663 = vmatpush.msra.mxu2 %v323_v46  ;;  %v251_v4 = vld [vmem:[%s4703_s3 + $0x278] sm:$0xff]  ;;  %v249_v10 = vld [vmem:[%s4703_s3 + $0x268] sm:$0xff] }
  0x58   :  { %691 = vmatpush.msra.mxu3 %v357_v48  ;;  %635 = vmatpush.msra.mxu1 %v289_v49  ;;  %v315_v5 = vld [vmem:[%s4703_s3 + $0x478] sm:$0xff]  ;;  %v313_v11 = vld [vmem:[%s4703_s3 + $0x468] sm:$0xff]  ;;  %v3698_v48 = vld [vmem:[%s4704_s4 + $0x60] sm:$0xff] }
  0x59   :  { %591 = vmatmul.f32.gmra.mxu3 %v3224_v20  ;;  %606 = vmatpush.msra.mxu0 %v257_v50  ;;  %v317_v20 = vld [vmem:[%s4703_s3 + $0x488] sm:$0xff]  ;;  %v347_v12 = vld [vmem:[%s4703_s3 + $0x578] sm:$0xff]  ;;  %v3728_v50 = vld [vmem:[%s4705_s5 + $0x30] sm:$0xff] }
  0x5a   :  { %664 = vmatpush.msra.mxu2 %v321_v51  ;;  %692 = vmatpush.msra.mxu3 %v355_v52  ;;  %v247_v13 = vld [vmem:[%s4703_s3 + $0x258] sm:$0xff]  ;;  %v345_v15 = vld [vmem:[%s4703_s3 + $0x568] sm:$0xff]  ;;  %v3733_v51 = vld [vmem:[%s4704_s4 + $0x40] sm:$0xff] }
  0x5b   :  { %636 = vmatpush.msra.mxu1 %v287_v19  ;;  %607 = vmatpush.msra.mxu0 %v255_v53  ;;  %v311_v14 = vld [vmem:[%s4703_s3 + $0x458] sm:$0xff]  ;;  %v277_v16 = vld [vmem:[%s4703_s3 + $0x348] sm:$0xff]  ;;  %v3763_v53 = vld [vmem:[%s4704_s4 + $0x20] sm:$0xff] }
  0x5c   :  { %665 = vmatpush.msra.mxu2 %v319_v54  ;;  %693 = vmatpush.msra.mxu3 %v353_v55  ;;  %v245_v17 = vld [vmem:[%s4703_s3 + $0x248] sm:$0xff]  ;;  %v343_v18 = vld [vmem:[%s4703_s3 + $0x558] sm:$0xff] }
  0x5d   :  { %637 = vmatpush.msra.mxu1 %v285_v56  ;;  %608 = vmatpush.msra.mxu0 %v253_v57  ;;  %v3626_v25 = vld [vmem:[%s4700_s0 + $0xb8] sm:$0xff]  ;;  %v341_v30 = vld [vmem:[%s4703_s3 + $0x548] sm:$0xff]  ;;  %v3800_v56 = vld [vmem:[%s4704_s4] sm:$0xff] }
  0x5e   :  { %666 = vmatpush.msra.mxu2 %v317_v20  ;;  %694 = vmatpush.msra.mxu3 %v351_v58  ;;  %v275_v26 = vld [vmem:[%s4703_s3 + $0x338] sm:$0xff]  ;;  %v273_v31 = vld [vmem:[%s4703_s3 + $0x328] sm:$0xff] }
  0x5f   :  { %507 = vmatmul.f32.gmra.mxu0 %v3559_v62  ;;  %536 = vmatmul.f32.gmra.mxu1 %v3564_v2  ;;  %v243_v28 = vld [vmem:[%s4703_s3 + $0x238] sm:$0xff]  ;;  %v241_v32 = vld [vmem:[%s4703_s3 + $0x228] sm:$0xff] }
  0x60   :  { %565 = vmatmul.f32.gmra.mxu2 %v3291_v39  ;;  %638 = vmatpush.msra.mxu1 %v283_v3  ;;  %v279_v39 = vld [vmem:[%s4703_s3 + $0x358] sm:$0xff]  ;;  %v305_v63 = vld [vmem:[%s4703_s3 + $0x428] sm:$0xff] }
  0x61   :  { %609 = vmatpush.msra.mxu0 %v251_v4  ;;  %667 = vmatpush.msra.mxu2 %v315_v5  ;;  %v307_v29 = vld [vmem:[%s4703_s3 + $0x438] sm:$0xff]  ;;  %v337_v0 = vld [vmem:[%s4703_s3 + $0x528] sm:$0xff] }
  0x62   :  { %695 = vmatpush.msra.mxu3 %v349_v8  ;;  %639 = vmatpush.msra.mxu1 %v281_v9  ;;  %v339_v33 = vld [vmem:[%s4703_s3 + $0x538] sm:$0xff]  ;;  %v269_v36 = vld [vmem:[%s4703_s3 + $0x308] sm:$0xff] }
  0x63   :  { %594 = vmatmul.f32.gmra.mxu3 %v3296_v40  ;;  %610 = vmatpush.msra.mxu0 %v249_v10  ;;  %v309_v40 = vld [vmem:[%s4703_s3 + $0x448] sm:$0xff]  ;;  %v239_v34 = vld [vmem:[%s4703_s3 + $0x218] sm:$0xff] }
  0x64   :  { %668 = vmatpush.msra.mxu2 %v313_v11  ;;  %696 = vmatpush.msra.mxu3 %v347_v12  ;;  %v303_v35 = vld [vmem:[%s4703_s3 + $0x418] sm:$0xff]  ;;  %v237_v37 = vld [vmem:[%s4703_s3 + $0x208] sm:$0xff] }
  0x65   :  { %640 = vmatpush.msra.mxu1 %v279_v39  ;;  %611 = vmatpush.msra.mxu0 %v247_v13  ;;  %v335_v38 = vld [vmem:[%s4703_s3 + $0x518] sm:$0xff]  ;;  %v333_v45 = vld [vmem:[%s4703_s3 + $0x508] sm:$0xff] }
  0x66   :  { %669 = vmatpush.msra.mxu2 %v311_v14  ;;  %697 = vmatpush.msra.mxu3 %v345_v15  ;;  %v3691_v46 = vld [vmem:[%s4704_s4 + $0x78] sm:$0xff]  ;;  %v3705_v49 = vld [vmem:[%s4704_s4 + $0x68] sm:$0xff] }
  0x67   :  { %641 = vmatpush.msra.mxu1 %v277_v16  ;;  %612 = vmatpush.msra.mxu0 %v245_v17  ;;  %v3750_v52 = vld [vmem:[%s4704_s4 + $0x48] sm:$0xff]  ;;  %v3770_v54 = vld [vmem:[%s4704_s4 + $0x38] sm:$0xff] }
  0x68   :  { %670 = vmatpush.msra.mxu2 %v309_v40  ;;  %698 = vmatpush.msra.mxu3 %v343_v18  ;;  %v3755_v19 = vld [vmem:[%s4705_s5 + $0x28] sm:$0xff]  ;;  %v3794_v55 = vld [vmem:[%s4705_s5 + $0x18] sm:$0xff] }
  0x69   :  { %510 = vmatmul.f32.gmra.mxu0 %v3621_v24  ;;  %539 = vmatmul.f32.gmra.mxu1 %v3626_v25  ;;  %v3816_v57 = vld [vmem:[%s4704_s4 + $0x18] sm:$0xff]  ;;  %v3824_v20 = vld [vmem:[%s4705_s5 + $0x8] sm:$0xff] }
  0x6a   :  { %568 = vmatmul.f32.gmra.mxu2 %v3363_v59  ;;  %642 = vmatpush.msra.mxu1 %v275_v26  ;;  %v271_v59 = vld [vmem:[%s4703_s3 + $0x318] sm:$0xff]  ;;  %v3830_v58 = vld [vmem:[%s4704_s4 + $0x8] sm:$0xff] }
  0x6b   :  { %613 = vmatpush.msra.mxu0 %v243_v28  ;;  %671 = vmatpush.msra.mxu2 %v307_v29 }
  0x6c   :  { %699 = vmatpush.msra.mxu3 %v341_v30  ;;  %643 = vmatpush.msra.mxu1 %v273_v31 }
  0x6d   :  { %597 = vmatmul.f32.gmra.mxu3 %v3368_v60  ;;  %614 = vmatpush.msra.mxu0 %v241_v32  ;;  %v301_v60 = vld [vmem:[%s4703_s3 + $0x408] sm:$0xff] }
  0x6e   :  { %672 = vmatpush.msra.mxu2 %v305_v63  ;;  %700 = vmatpush.msra.mxu3 %v339_v33 }
  0x6f   :  { %644 = vmatpush.msra.mxu1 %v271_v59  ;;  %615 = vmatpush.msra.mxu0 %v239_v34 }
  0x70   :  { %673 = vmatpush.msra.mxu2 %v303_v35  ;;  %701 = vmatpush.msra.mxu3 %v337_v0 }
  0x71   :  { %645 = vmatpush.msra.mxu1 %v269_v36  ;;  %616 = vmatpush.msra.mxu0 %v237_v37 }
  0x72   :  { %674 = vmatpush.msra.mxu2 %v301_v60  ;;  %702 = vmatpush.msra.mxu3 %v335_v38 }
  0x73   :  { %617 = vmatmul.f32.vlgmr.msra.gmra.mxu0 %v3157_v1  ;;  %646 = vmatmul.f32.vlgmr.msra.gmra.mxu1 %v3176_v6  ;;  %v3710_v1 = vld [vmem:[%s4705_s5 + $0x38] sm:$0xff]  ;;  %v3715_v6 = vld [vmem:[%s4704_s4 + $0x50] sm:$0xff] }
  0x74   :  { %675 = vmatmul.f32.vlgmr.msra.gmra.mxu2 %v3435_v22  ;;  %758 = vmatpush.msrb.mxu1 %v3683_v44  ;;  %v3723_v22 = vld [vmem:[%s4704_s4 + $0x58] sm:$0xff] }
  0x75   :  { %703 = vmatpush.msra.mxu3 %v333_v45  ;;  %778 = vmatpush.msrb.mxu2 %v3691_v46 }
  0x76   :  { %704 = vmatmul.f32.vlgmr.msra.gmra.mxu3 %v3440_v23  ;;  %759 = vmatpush.msrb.mxu1 %v3698_v48  ;;  %v3742_v23 = vld [vmem:[%s4704_s4 + $0x30] sm:$0xff] }
  0x77   :  { %779 = vmatpush.msrb.mxu2 %v3705_v49  ;;  %729 = vmatpush.msrb.mxu0 %v3710_v1 }
  0x78   :  { %760 = vmatpush.msrb.mxu1 %v3715_v6  ;;  %849 = vmatpush.msrb.mxu3 %v3710_v1 }
  0x79   :  { %780 = vmatpush.msrb.mxu2 %v3723_v22  ;;  %730 = vmatpush.msrb.mxu0 %v3728_v50 }
  0x7a   :  { %761 = vmatpush.msrb.mxu1 %v3733_v51  ;;  %850 = vmatpush.msrb.mxu3 %v3728_v50 }
  0x7b   :  { %620 = vmatmul.f32.gmra.mxu0 %v3229_v21  ;;  %649 = vmatmul.f32.gmra.mxu1 %v3252_v27  ;;  %v3775_v21 = vld [vmem:[%s4705_s5 + $0x20] sm:$0xff]  ;;  %v3781_v27 = vld [vmem:[%s4704_s4 + $0x10] sm:$0xff] }
  0x7c   :  { %678 = vmatmul.f32.gmra.mxu2 %v3497_v42  ;;  %762 = vmatpush.msrb.mxu1 %v3742_v23  ;;  %v3789_v42 = vld [vmem:[%s4704_s4 + $0x28] sm:$0xff] }
  0x7d   :  { %781 = vmatpush.msrb.mxu2 %v3750_v52  ;;  %731 = vmatpush.msrb.mxu0 %v3755_v19 }
  0x7e   :  { %707 = vmatmul.f32.gmra.mxu3 %v3502_v43  ;;  %763 = vmatpush.msrb.mxu1 %v3763_v53  ;;  %v3810_v43 = vld [vmem:[%s4705_s5 + $0x10] sm:$0xff] }
  0x7f   :  { %782 = vmatpush.msrb.mxu2 %v3770_v54  ;;  %732 = vmatpush.msrb.mxu0 %v3775_v21 }
  0x80   :  { %764 = vmatpush.msrb.mxu1 %v3781_v27  ;;  %851 = vmatpush.msrb.mxu3 %v3755_v19 }
  0x81   :  { %783 = vmatpush.msrb.mxu2 %v3789_v42  ;;  %733 = vmatpush.msrb.mxu0 %v3794_v55 }
  0x82   :  { %765 = vmatpush.msrb.mxu1 %v3800_v56  ;;  %852 = vmatpush.msrb.mxu3 %v3775_v21 }
  0x83   :  { %623 = vmatmul.f32.gmra.mxu0 %v3301_v41  ;;  %652 = vmatmul.f32.gmra.mxu1 %v3324_v47  ;;  %v3837_v41 = vld [vmem:[%s4705_s5] sm:$0xff]  ;;  %v2899_v47 = vmov 0  }
  0x84   :  { %681 = vmatmul.f32.gmra.mxu2 %v3559_v62  ;;  %734 = vmatpush.msrb.mxu0 %v3810_v43  ;;  %v3856_v62 = vld [vmem:[%s4701_s1] sm:$0xf] }
  0x85   :  { %784 = vmatpush.msrb.mxu2 %v3816_v57  ;;  %853 = vmatpush.msrb.mxu3 %v3794_v55 }
  0x86   :  { %710 = vmatmul.f32.gmra.mxu3 %v3564_v2  ;;  %735 = vmatpush.msrb.mxu0 %v3824_v20 }
  0x87   :  { %785 = vmatpush.msrb.mxu2 %v3830_v58  ;;  %906 = vmatpush.msra.mxu1 %v3691_v46 }
  0x88   :  { %736 = vmatpush.msrb.mxu0 %v3837_v41  ;;  %854 = vmatpush.msrb.mxu3 %v3810_v43 }
  0x89   :  { %2637 = vset.pattern.permute.xlu0 %v2899_v47  ;;  %907 = vmatpush.msra.mxu1 %v3705_v49 }
  0x8a   :  { %886 = vmatpush.msra.mxu0 %v3683_v44  ;;  %855 = vmatpush.msrb.mxu3 %v3824_v20 }
  0x8b   :  { %626 = vmatmul.f32.gmra.mxu0 %v3373_v61  ;;  %655 = vmatmul.f32.gmra.mxu1 %v3396_v7  ;;  %v2900_v61 = vmov 0.0   ;;  %v3886_v7 = vld [vmem:[%s4707_s7] ss:$8 sm:$0x3] }
  0x8c   :  { %684 = vmatmul.f32.gmra.mxu2 %v3621_v24  ;;  %887 = vmatpush.msra.mxu0 %v3698_v48  ;;  %v365_v2 = vperm.slane %v3886_v7, 0 }
  0x8d   :  { %908 = vmatpush.msra.mxu1 %v3723_v22  ;;  %856 = vmatpush.msrb.mxu3 %v3837_v41 }
  0x8e   :  { %713 = vmatmul.f32.gmra.mxu3 %v3626_v25  ;;  %745 = vperm.xlu0 %2637, %v3856_v62  }
  0x8f   :  { %888 = vmatpush.msra.mxu0 %v3715_v6  ;;  %909 = vmatpush.msra.mxu1 %v3750_v52 }
  0x90   :  { %977 = vmatpush.msra.mxu2 %v3710_v1  ;;  %1008 = vmatpush.msra.mxu3 %v3683_v44 }
  0x91   :  { %889 = vmatpush.msra.mxu0 %v3733_v51  ;;  %910 = vmatpush.msra.mxu1 %v3770_v54 }
  0x92   :  { %978 = vmatpush.msra.mxu2 %v3728_v50  ;;  %1009 = vmatpush.msra.mxu3 %v3698_v48 }
  0x93   :  { %766 = vmatmul.f32.vlgmr.msrb.gmra.mxu1 %v2900_v61  ;;  %737 = vmatmul.f32.vlgmr.msrb.gmra.mxu0 %v2900_v61 }
  0x94   :  { %786 = vmatmul.f32.vlgmr.msrb.gmra.mxu2 %v2900_v61  ;;  %890 = vmatpush.msra.mxu0 %v3742_v23 }
  0x95   :  { %911 = vmatpush.msra.mxu1 %v3789_v42  ;;  %979 = vmatpush.msra.mxu2 %v3755_v19 }
  0x96   :  { %891 = vmatpush.msra.mxu0 %v3763_v53  ;;  %1010 = vmatpush.msra.mxu3 %v3715_v6 }
  0x97   :  { %912 = vmatpush.msra.mxu1 %v3816_v57  ;;  %980 = vmatpush.msra.mxu2 %v3775_v21 }
  0x98   :  { %892 = vmatpush.msra.mxu0 %v3781_v27  ;;  %1011 = vmatpush.msra.mxu3 %v3733_v51 }
  0x99   :  { %913 = vmatpush.msra.mxu1 %v3830_v58  ;;  %981 = vmatpush.msra.mxu2 %v3794_v55 }
  0x9a   :  { %893 = vmatpush.msra.mxu0 %v3800_v56  ;;  %1012 = vmatpush.msra.mxu3 %v3742_v23 }
  0x9b   :  { %982 = vmatpush.msra.mxu2 %v3810_v43  ;;  %1099 = vmatpush.msrb.mxu1 %v3710_v1 }
  0x9c   :  { %1028 = vmatpush.msrb.mxu0 %v3691_v46  ;;  %1013 = vmatpush.msra.mxu3 %v3763_v53 }
  0x9d   :  { %983 = vmatpush.msra.mxu2 %v3824_v20  ;;  %1100 = vmatpush.msrb.mxu1 %v3728_v50 }
  0x9e   :  { %1029 = vmatpush.msrb.mxu0 %v3705_v49  ;;  %1014 = vmatpush.msra.mxu3 %v3781_v27 }
  0x9f   :  { %984 = vmatpush.msra.mxu2 %v3837_v41  ;;  %v386_v3 = vpop.f32.mrf.mxu0  ;;  %1101 = vmatpush.msrb.mxu1 %v3755_v19 }
  0xa0   :  { %1030 = vmatpush.msrb.mxu0 %v3723_v22  ;;  %1015 = vmatpush.msra.mxu3 %v3800_v56  ;;  %v415_v4 = vpop.f32.mrf.mxu1  ;;  %v387_v5 = vadd.f32 %v386_v3, %v365_v2 }
  0xa1   :  { %1136 = vmatpush.msrb.mxu2 %v3683_v44  ;;  %1102 = vmatpush.msrb.mxu1 %v3775_v21 }
  0xa2   :  { %1031 = vmatpush.msrb.mxu0 %v3750_v52  ;;  %v416_v8 = vadd.f32 %v415_v4, %v387_v5  ;;  %v366_v5 = vperm.slane %v3886_v7, 1 }
  0xa3   :  { %1137 = vmatpush.msrb.mxu2 %v3698_v48  ;;  %1103 = vmatpush.msrb.mxu1 %v3794_v55 }
  0xa4   :  { %1032 = vmatpush.msrb.mxu0 %v3770_v54 }
  0xa5   :  { %1138 = vmatpush.msrb.mxu2 %v3715_v6  ;;  %1104 = vmatpush.msrb.mxu1 %v3810_v43 }
  0xa6   :  { %1033 = vmatpush.msrb.mxu0 %v3789_v42  ;;  %v444_v9 = vpop.f32.mrf.mxu2 }
  0xa7   :  { %1139 = vmatpush.msrb.mxu2 %v3733_v51  ;;  %v3912_v10 = vadd.f32 %v444_v9, %v416_v8  ;;  %1105 = vmatpush.msrb.mxu1 %v3824_v20 }
  0xa8   :  { %1034 = vmatpush.msrb.mxu0 %v3816_v57 }
  0xa9   :  { %1140 = vmatpush.msrb.mxu2 %v3742_v23  ;;  %v389_v11 = vpop.f32.mrf.mxu0  ;;  %1106 = vmatpush.msrb.mxu1 %v3837_v41  ;;  %v3918_v13 = vpop.f32.mrf.mxu3 }
  0xaa   :  { %1035 = vmatpush.msrb.mxu0 %v3830_v58  ;;  %v390_v12 = vadd.f32 %v389_v11, %v365_v2  ;;  %v418_v39 = vpop.f32.mrf.mxu1 }
  0xab   :  { %1141 = vmatpush.msrb.mxu2 %v3763_v53 }
  0xac   :  { %v419_v14 = vadd.f32 %v418_v39, %v390_v12 }
  0xad   :  { %1142 = vmatpush.msrb.mxu2 %v3781_v27 }
  0xaf   :  { %1143 = vmatpush.msrb.mxu2 %v3800_v56 }
  0xb0   :  { %v447_v15 = vpop.f32.mrf.mxu2 }
  0xb1   :  { %v448_v16 = vadd.f32 %v447_v15, %v419_v14 }
  0xb3   :  { %v392_v17 = vpop.f32.mrf.mxu0  ;;  %v476_v24 = vpop.f32.mrf.mxu3 }
  0xb4   :  { %v393_v40 = vadd.f32 %v392_v17, %v365_v2  ;;  %v421_v18 = vpop.f32.mrf.mxu1  ;;  %v477_v25 = vadd.f32 %v476_v24, %v448_v16 }
  0xb6   :  { %v422_v26 = vadd.f32 %v421_v18, %v393_v40 }
  0xba   :  { %v450_v28 = vpop.f32.mrf.mxu2 }
  0xbb   :  { %v451_v29 = vadd.f32 %v450_v28, %v422_v26 }
  0xbd   :  { %v479_v63 = vpop.f32.mrf.mxu3 }
  0xbe   :  { %v395_v30 = vpop.f32.mrf.mxu0  ;;  %v424_v32 = vpop.f32.mrf.mxu1  ;;  %v480_v33 = vadd.f32 %v479_v63, %v451_v29 }
  0xbf   :  { %v396_v31 = vadd.f32 %v395_v30, %v365_v2 }
  0xc1   :  { %v425_v59 = vadd.f32 %v424_v32, %v396_v31 }
  0xc5   :  { %v453_v34 = vpop.f32.mrf.mxu2 }
  0xc6   :  { %v454_v35 = vadd.f32 %v453_v34, %v425_v59 }
  0xc8   :  { %v482_v0 = vpop.f32.mrf.mxu3  ;;  %v502_v36 = vpop.f32.mrf.mxu0 }
  0xc9   :  { %v483_v37 = vadd.f32 %v482_v0, %v454_v35  ;;  %v531_v60 = vpop.f32.mrf.mxu1 }
  0xcf   :  { %v560_v38 = vpop.f32.mrf.mxu2 }
  0xd1   :  { %v589_v3 = vpop.f32.mrf.mxu3 }
  0xd2   :  { %v505_v45 = vpop.f32.mrf.mxu0  ;;  %v534_v61 = vpop.f32.mrf.mxu1 }
  0xd3   :  { %v506_v47 = vadd.f32 %v505_v45, %v477_v25 }
  0xd5   :  { %v3923_v4 = vadd.f32 %v534_v61, %v506_v47 }
  0xd9   :  { %v563_v2 = vpop.f32.mrf.mxu2 }
  0xda   :  { %v564_v8 = vadd.f32 %v563_v2, %v366_v5 }
  0xdc   :  { %v508_v9 = vpop.f32.mrf.mxu0  ;;  %v537_v12 = vpop.f32.mrf.mxu1 }
  0xdd   :  { %v509_v11 = vadd.f32 %v508_v9, %v480_v33  ;;  %v592_v39 = vpop.f32.mrf.mxu3 }
  0xde   :  { %v593_v14 = vadd.f32 %v592_v39, %v564_v8 }
  0xdf   :  { %v3926_v15 = vadd.f32 %v537_v12, %v509_v11 }
  0xe3   :  { %v566_v16 = vpop.f32.mrf.mxu2 }
  0xe4   :  { %v567_v17 = vadd.f32 %v566_v16, %v366_v5 }
  0xe6   :  { %v511_v40 = vpop.f32.mrf.mxu0  ;;  %v540_v24 = vpop.f32.mrf.mxu1 }
  0xe7   :  { %v512_v18 = vadd.f32 %v511_v40, %v483_v37  ;;  %v595_v25 = vpop.f32.mrf.mxu3 }
  0xe8   :  { %v596_v26 = vadd.f32 %v595_v25, %v567_v17 }
  0xe9   :  { %v3928_v28 = vadd.f32 %v540_v24, %v512_v18 }
  0xed   :  { %v569_v29 = vpop.f32.mrf.mxu2 }
  0xee   :  { %v570_v7 = vadd.f32 %v569_v29, %v366_v5 }
  0xf0   :  { %v598_v30 = vpop.f32.mrf.mxu3  ;;  %v618_v31 = vpop.f32.mrf.mxu0 }
  0xf1   :  { %v599_v32 = vadd.f32 %v598_v30, %v570_v7  ;;  %v647_v63 = vpop.f32.mrf.mxu1 }
  0xf7   :  { %v676_v33 = vpop.f32.mrf.mxu2 }
  0xf8   :  { %v621_v59 = vpop.f32.mrf.mxu0 }
  0xf9   :  { %v622_v34 = vadd.f32 %v621_v59, %v593_v14  ;;  %v650_v35 = vpop.f32.mrf.mxu1  ;;  %v705_v0 = vpop.f32.mrf.mxu3  ;;  %v474_v14 = vadd.f32 %v3918_v13, %v3912_v10 }
  0xfb   :  { %v651_v45 = vadd.f32 %v650_v35, %v622_v34  ;;  %v503_v7 = vadd.f32 %v502_v36, %v474_v14 }
  0xff   :  { %v679_v47 = vpop.f32.mrf.mxu2 }
 0x100   :  { %v680_v61 = vadd.f32 %v679_v47, %v651_v45  ;;  %v624_v37 = vpop.f32.mrf.mxu0  ;;  %v561_v45 = vadd.f32 %v560_v38, %v366_v5 }
 0x101   :  { %v625_v2 = vadd.f32 %v624_v37, %v596_v26  ;;  %v653_v8 = vpop.f32.mrf.mxu1  ;;  %v708_v9 = vpop.f32.mrf.mxu3  ;;  %v3936_v26 = vadd.f32 %v531_v60, %v503_v7 }
 0x102   :  { %v3930_v11 = vadd.f32 %v708_v9, %v680_v61 }
 0x103   :  { %v654_v12 = vadd.f32 %v653_v8, %v625_v2 }
 0x107   :  { %v682_v39 = vpop.f32.mrf.mxu2 }
 0x108   :  { %v683_v16 = vadd.f32 %v682_v39, %v654_v12  ;;  %v627_v17 = vpop.f32.mrf.mxu0 }
 0x109   :  { %v628_v40 = vadd.f32 %v627_v17, %v599_v32  ;;  %v656_v18 = vpop.f32.mrf.mxu1  ;;  %v711_v24 = vpop.f32.mrf.mxu3  ;;  %v590_v32 = vadd.f32 %v589_v3, %v561_v45 }
 0x10a   :  { %v3934_v25 = vadd.f32 %v711_v24, %v683_v16  ;;  %v3948_v24 = vld [vmem:[%s4707_s7 + $0x3] ss:$0 sm:$0xff]  ;;  %v746_v45 = vpop.permute.xlu0 %745 }
 0x10b   :  { %v657_v29 = vadd.f32 %v656_v18, %v628_v40  ;;  %v619_v61 = vadd.f32 %v618_v31, %v590_v32 }
 0x10d   :  { %v648_v2 = vadd.f32 %v647_v63, %v619_v61 }
 0x10f   :  { %v685_v30 = vpop.f32.mrf.mxu2  ;;  %v677_v13 = vadd.f32 %v676_v33, %v648_v2 }
 0x110   :  { %v3938_v59 = vadd.f32 %v685_v30, %v657_v29  ;;  %v738_v14 = vpop.f32.mrf.mxu0  ;;  %v2902_v30 = vmov 1  }
 0x111   :  { %v767_v34 = vpop.f32.mrf.mxu1  ;;  %v3941_v36 = vadd.f32 %v705_v0, %v677_v13  ;;  %v739_v7 = vadd.f32 %v738_v14, %v3948_v24  ;;  %2638 = vset.pattern.permute.xlu1 %v2902_v30 }
 0x112   :  { %v768_v35 = vadd.f32 %v767_v34, %v3936_v26  ;;  %864 = vperm.xlu1 %2638, %v3856_v62  }
 0x114   :  { %v2567_v47 = vmul.f32 -1.442695, %v768_v35 }
 0x116   :  { %2645 = vpow2.f32 %v2567_v47 }
 0x117   :  { %v787_v8 = vpop.f32.mrf.mxu2 }
 0x118   :  { %v788_v9 = vadd.f32 %v787_v8, %v3941_v36 }
 0x11a   :  { %v2568_v40 = vmul.f32 -1.442695, %v788_v9 }
 0x11c   :  { %v2646_v37 = vpop.eup %2645 }
 0x11d   :  { %v793_v10 = vadd.f32 1.0, %v2646_v37 }
 0x11f   :  { %2647 = vrcp.f32 %v793_v10  ;;  %v805_v16 = vand.u32 2147483648, %v793_v10  ;;  %v803_v5 = vand.u32 2147483647, %v793_v10  ;;  %vm799_vm1 = vweird.f32 %v793_v10 }
 0x120   :  { %2649 = vtanh.f32 %v788_v9 }
 0x121   :  { %v806_v31 = vor.u32 1.1754944e-38, %v805_v16  ;;  %vm804_vm3 = vcmp.eq.f32.partialorder %v803_v5, 8.507059e+37  ;;  %2651 = vpow2.f32 %v2568_v40 }
 0x125   :  { %v2648_v60 = vpop.eup %2647 }
 0x126   :  { %v795_v12 = vmul.f32 %v2648_v60, %v793_v10  ;;  %vm800_vm0 = vweird.f32 %v2648_v60  ;;  %v2650_v33 = vpop.eup %2649 }
 0x127   :  { %vm801_vm2 = vmor %vm799_vm1, %vm800_vm0  ;;  %v2652_v18 = vpop.eup %2651 }
 0x128   :  { %v796_v39 = vsub.f32 1.0, %v795_v12  ;;  %v812_v29 = vadd.f32 1.0, %v2652_v18 }
 0x12a   :  { %v797_v38 = vmul.f32 %v2648_v60, %v796_v39  ;;  %2653 = vrcp.f32 %v812_v29  ;;  %v824_v12 = vand.u32 2147483648, %v812_v29  ;;  %vm818_vm6 = vweird.f32 %v812_v29 }
 0x12b   :  { %2655 = vtanh.f32 %v739_v7  ;;  %v822_v39 = vand.u32 2147483647, %v812_v29 }
 0x12c   :  { %v798_v3 = vadd.f32 %v2648_v60, %v797_v38  ;;  %v825_v38 = vor.u32 1.1754944e-38, %v824_v12 }
 0x12d   :  { %vm823_vm8 = vcmp.eq.f32.partialorder %v822_v39, 8.507059e+37 }
 0x12e   :  { %v802_v63 = vsel %vm801_vm2, %v2648_v60, %v798_v3 }
 0x12f   :  { %v807_v17 = vsel %vm804_vm3, %v806_v31, %v802_v63  ;;  %v871_v63 = vrot.slane %v3936_v26, 4 }
 0x130   :  { %v830_v0 = vmul.f32 %v2650_v33, %v807_v17  ;;  %v2654_v34 = vpop.eup %2653 }
 0x131   :  { %v2656_v35 = vpop.eup %2655  ;;  %v814_v47 = vmul.f32 %v2654_v34, %v812_v29  ;;  %vm819_vm5 = vweird.f32 %v2654_v34  ;;  %v872_v29 = vrot.slane %v3941_v36, 4 }
 0x132   :  { %832 = vrot.lane.b32.xlu0 %v830_v0, %s2901_s21  ;;  %v742_v32 = vsub.f32 0.0, %v2656_v35  ;;  %v748_v61 = vmul.f32 %v2656_v35, %v746_v45  ;;  %vm820_vm7 = vmor %vm818_vm6, %vm819_vm5 }
 0x133   :  { %v815_v37 = vsub.f32 1.0, %v814_v47 }
 0x134   :  { %v749_v2 = vadd.f32 %v748_v61, %v742_v32 }
 0x135   :  { %v816_v10 = vmul.f32 %v2654_v34, %v815_v37 }
 0x136   :  { %v829_v13 = vmul.f32 %v807_v17, %v749_v2 }
 0x137   :  { %v817_v9 = vadd.f32 %v2654_v34, %v816_v10 }
 0x139   :  { %v821_v16 = vsel %vm820_vm7, %v2654_v34, %v817_v9 }
 0x13a   :  { %v3960_v3 = vsel %vm823_vm8, %v825_v38, %v821_v16  ;;  %v2903_v38 = vmov 2  }
 0x13b   :  { %2639 = vset.pattern.permute.xlu2 %v2903_v38 }
 0x13c   :  { %992 = vperm.xlu2 %2639, %v3856_v62  }
 0x1a4   :  { %v833_v8 = vpop.permute.xlu0 %832 }
 0x1a5   :  { %v3952_v60 = vadd.f32 %v833_v8, %v829_v13  ;;  %v3989_v8 = vpop.f32.mrf.mxu3 }
 0x1a7   :  { %2657 = vtanh.f32 %v3952_v60  ;;  %2569 = vmatmul.msk.f32.vlgmr.msrb.gmra.mxu3 %vm717_vm4, %v3952_v60 }
 0x1a8   :  { %1156 = vmatpush.msrb.mxu3 %v3691_v46 }
 0x1aa   :  { %1157 = vmatpush.msrb.mxu3 %v3705_v49 }
 0x1ac   :  { %1158 = vmatpush.msrb.mxu3 %v3723_v22 }
 0x1ad   :  { %v2658_v5 = vpop.eup %2657 }
 0x1ae   :  { %v837_v31 = vmul.f32 %v2658_v5, %v3960_v3  ;;  %1159 = vmatpush.msrb.mxu3 %v3750_v52 }
 0x1b0   :  { %2570 = vmatmul.msk.f32.vlgmr.msra.gmra.mxu0 %vm717_vm4, %v837_v31  ;;  %2571 = vmatmul.msk.f32.vlgmr.msra.gmra.mxu1 %vm717_vm4, %v837_v31 }
 0x1b1   :  { %1160 = vmatpush.msrb.mxu3 %v3770_v54  ;;  %1227 = vmatpush.msra.mxu0 %v3710_v1 }
 0x1b2   :  { %1258 = vmatpush.msra.mxu1 %v3683_v44 }
 0x1b3   :  { %1161 = vmatpush.msrb.mxu3 %v3789_v42  ;;  %1228 = vmatpush.msra.mxu0 %v3728_v50 }
 0x1b4   :  { %1259 = vmatpush.msra.mxu1 %v3698_v48 }
 0x1b5   :  { %1162 = vmatpush.msrb.mxu3 %v3816_v57  ;;  %1229 = vmatpush.msra.mxu0 %v3755_v19 }
 0x1b6   :  { %1260 = vmatpush.msra.mxu1 %v3715_v6 }
 0x1b7   :  { %1163 = vmatpush.msrb.mxu3 %v3830_v58  ;;  %1230 = vmatpush.msra.mxu0 %v3775_v21 }
 0x1b8   :  { %1261 = vmatpush.msra.mxu1 %v3733_v51 }
 0x1b9   :  { %1231 = vmatpush.msra.mxu0 %v3794_v55 }
 0x1ba   :  { %1262 = vmatpush.msra.mxu1 %v3742_v23 }
 0x1bb   :  { %1232 = vmatpush.msra.mxu0 %v3810_v43 }
 0x1bc   :  { %1263 = vmatpush.msra.mxu1 %v3763_v53 }
 0x1bd   :  { %1233 = vmatpush.msra.mxu0 %v3824_v20 }
 0x1be   :  { %1264 = vmatpush.msra.mxu1 %v3781_v27 }
 0x1bf   :  { %1234 = vmatpush.msra.mxu0 %v3837_v41 }
 0x1c0   :  { %1265 = vmatpush.msra.mxu1 %v3800_v56 }
 0x22a   :  { %v858_v12 = vpop.f32.mrf.mxu3 }
 0x22b   :  { %v859_v16 = vadd.f32 %v858_v12, %v3948_v24 }
 0x22d   :  { %v895_v33 = vpop.f32.mrf.mxu0  ;;  %v915_v14 = vpop.f32.mrf.mxu1 }
 0x22e   :  { %v896_v17 = vadd.f32 %v895_v33, %v871_v63  ;;  %v916_v30 = vadd.f32 %v915_v14, %v872_v29  ;;  %v865_v33 = vpop.permute.xlu1 %864 }
 0x230   :  { %v2572_v0 = vmul.f32 -1.442695, %v896_v17  ;;  %v2573_v36 = vmul.f32 -1.442695, %v916_v30 }
 0x232   :  { %2659 = vpow2.f32 %v2572_v0 }
 0x238   :  { %v2660_v40 = vpop.eup %2659 }
 0x239   :  { %v921_v18 = vadd.f32 1.0, %v2660_v40 }
 0x23b   :  { %2661 = vrcp.f32 %v921_v18  ;;  %v933_v45 = vand.u32 2147483648, %v921_v18  ;;  %v931_v32 = vand.u32 2147483647, %v921_v18  ;;  %vm927_vm10 = vweird.f32 %v921_v18 }
 0x23c   :  { %2663 = vtanh.f32 %v916_v30 }
 0x23d   :  { %v934_v61 = vor.u32 1.1754944e-38, %v933_v45  ;;  %vm932_vm12 = vcmp.eq.f32.partialorder %v931_v32, 8.507059e+37  ;;  %2665 = vpow2.f32 %v2573_v36 }
 0x241   :  { %v2662_v7 = vpop.eup %2661 }
 0x242   :  { %v923_v34 = vmul.f32 %v2662_v7, %v921_v18  ;;  %vm928_vm9 = vweird.f32 %v2662_v7  ;;  %v2664_v2 = vpop.eup %2663 }
 0x243   :  { %vm929_vm11 = vmor %vm927_vm10, %vm928_vm9  ;;  %v2666_v9 = vpop.eup %2665 }
 0x244   :  { %v924_v35 = vsub.f32 1.0, %v923_v34  ;;  %v940_v39 = vadd.f32 1.0, %v2666_v9 }
 0x246   :  { %v925_v47 = vmul.f32 %v2662_v7, %v924_v35  ;;  %2667 = vrcp.f32 %v940_v39  ;;  %v952_v35 = vand.u32 2147483648, %v940_v39  ;;  %vm946_vm14 = vweird.f32 %v940_v39 }
 0x247   :  { %2669 = vtanh.f32 %v859_v16  ;;  %v950_v45 = vand.u32 2147483647, %v940_v39 }
 0x248   :  { %v926_v26 = vadd.f32 %v2662_v7, %v925_v47  ;;  %v953_v47 = vor.u32 1.1754944e-38, %v952_v35 }
 0x249   :  { %vm951_vm0 = vcmp.eq.f32.partialorder %v950_v45, 8.507059e+37 }
 0x24a   :  { %v930_v37 = vsel %vm929_vm11, %v2662_v7, %v926_v26 }
 0x24b   :  { %v935_v10 = vsel %vm932_vm12, %v934_v61, %v930_v37 }
 0x24c   :  { %v958_v13 = vmul.f32 %v2664_v2, %v935_v10  ;;  %v2668_v5 = vpop.eup %2667 }
 0x24d   :  { %v2670_v31 = vpop.eup %2669  ;;  %v942_v63 = vmul.f32 %v2668_v5, %v940_v39  ;;  %vm947_vm13 = vweird.f32 %v2668_v5 }
 0x24e   :  { %960 = vrot.lane.b32.xlu1 %v958_v13, %s2901_s21  ;;  %v862_v17 = vsub.f32 %v3952_v60, %v2670_v31  ;;  %v867_v0 = vmul.f32 %v2670_v31, %v865_v33  ;;  %vm948_vm15 = vmor %vm946_vm14, %vm947_vm13 }
 0x24f   :  { %v943_v40 = vsub.f32 1.0, %v942_v63 }
 0x250   :  { %v868_v18 = vadd.f32 %v867_v0, %v862_v17 }
 0x251   :  { %v944_v14 = vmul.f32 %v2668_v5, %v943_v40 }
 0x252   :  { %v957_v29 = vmul.f32 %v935_v10, %v868_v18 }
 0x253   :  { %v945_v34 = vadd.f32 %v2668_v5, %v944_v14 }
 0x255   :  { %v949_v60 = vsel %vm948_vm15, %v2668_v5, %v945_v34 }
 0x256   :  { %v4002_v26 = vsel %vm951_vm0, %v953_v47, %v949_v60  ;;  %v2904_v60 = vmov 3  }
 0x257   :  { %2640 = vset.pattern.permute.xlu0 %v2904_v60 }
 0x258   :  { %1114 = vperm.xlu0 %2640, %v3856_v62  }
 0x2c0   :  { %v961_v7 = vpop.permute.xlu1 %960 }
 0x2c1   :  { %v3994_v30 = vadd.f32 %v961_v7, %v957_v29 }
 0x2c3   :  { %2671 = vtanh.f32 %v3994_v30  ;;  %2574 = vmatmul.msk.f32.vlgmr.msra.gmra.mxu2 %vm717_vm4, %v3994_v30 }
 0x2c4   :  { %1278 = vmatpush.msra.mxu2 %v3691_v46 }
 0x2c6   :  { %1279 = vmatpush.msra.mxu2 %v3705_v49 }
 0x2c8   :  { %1280 = vmatpush.msra.mxu2 %v3723_v22 }
 0x2c9   :  { %v2672_v32 = vpop.eup %2671 }
 0x2ca   :  { %v965_v61 = vmul.f32 %v2672_v32, %v4002_v26  ;;  %1281 = vmatpush.msra.mxu2 %v3750_v52 }
 0x2cc   :  { %2575 = vmatmul.msk.f32.vlgmr.msra.gmra.mxu3 %vm717_vm4, %v965_v61  ;;  %2576 = vmatmul.msk.f32.vlgmr.msrb.gmra.mxu0 %vm717_vm4, %v965_v61 }
 0x2cd   :  { %1282 = vmatpush.msra.mxu2 %v3770_v54  ;;  %1349 = vmatpush.msra.mxu3 %v3710_v1 }
 0x2ce   :  { %1386 = vmatpush.msrb.mxu0 %v3683_v44 }
 0x2cf   :  { %1283 = vmatpush.msra.mxu2 %v3789_v42  ;;  %1350 = vmatpush.msra.mxu3 %v3728_v50 }
 0x2d0   :  { %1387 = vmatpush.msrb.mxu0 %v3698_v48 }
 0x2d1   :  { %1284 = vmatpush.msra.mxu2 %v3816_v57  ;;  %1351 = vmatpush.msra.mxu3 %v3755_v19 }
 0x2d2   :  { %1388 = vmatpush.msrb.mxu0 %v3715_v6 }
 0x2d3   :  { %1285 = vmatpush.msra.mxu2 %v3830_v58  ;;  %1352 = vmatpush.msra.mxu3 %v3775_v21 }
 0x2d4   :  { %1389 = vmatpush.msrb.mxu0 %v3733_v51 }
 0x2d5   :  { %1353 = vmatpush.msra.mxu3 %v3794_v55 }
 0x2d6   :  { %1390 = vmatpush.msrb.mxu0 %v3742_v23 }
 0x2d7   :  { %1354 = vmatpush.msra.mxu3 %v3810_v43 }
 0x2d8   :  { %1391 = vmatpush.msrb.mxu0 %v3763_v53 }
 0x2d9   :  { %1355 = vmatpush.msra.mxu3 %v3824_v20 }
 0x2da   :  { %1392 = vmatpush.msrb.mxu0 %v3781_v27 }
 0x2db   :  { %1356 = vmatpush.msra.mxu3 %v3837_v41 }
 0x2dc   :  { %1393 = vmatpush.msrb.mxu0 %v3800_v56 }
 0x346   :  { %v986_v34 = vpop.f32.mrf.mxu2 }
 0x347   :  { %v987_v45 = vadd.f32 %v986_v34, %v3948_v24 }
 0x349   :  { %v1037_v9 = vpop.f32.mrf.mxu0 }
 0x34a   :  { %v1038_v39 = vadd.f32 %v1037_v9, %v3930_v11 }
 0x34c   :  { %v2578_v29 = vmul.f32 -1.442695, %v1038_v39 }
 0x34f   :  { %v1017_v37 = vpop.f32.mrf.mxu3 }
 0x350   :  { %v1018_v2 = vadd.f32 %v1017_v37, %v3923_v4  ;;  %v993_v37 = vpop.permute.xlu2 %992 }
 0x352   :  { %v2577_v10 = vmul.f32 -1.442695, %v1018_v2 }
 0x354   :  { %2673 = vpow2.f32 %v2577_v10 }
 0x35a   :  { %v2674_v13 = vpop.eup %2673 }
 0x35b   :  { %v1043_v36 = vadd.f32 1.0, %v2674_v13 }
 0x35d   :  { %2675 = vrcp.f32 %v1043_v36  ;;  %v1055_v5 = vand.u32 2147483648, %v1043_v36  ;;  %v1053_v63 = vand.u32 2147483647, %v1043_v36  ;;  %vm1049_vm2 = vweird.f32 %v1043_v36 }
 0x35e   :  { %2677 = vtanh.f32 %v1038_v39 }
 0x35f   :  { %v1056_v17 = vor.u32 1.1754944e-38, %v1055_v5  ;;  %vm1054_vm5 = vcmp.eq.f32.partialorder %v1053_v63, 8.507059e+37  ;;  %2679 = vpow2.f32 %v2578_v29  ;;  %v1115_v29 = vpop.permute.xlu0 %1114 }
 0x363   :  { %v2676_v12 = vpop.eup %2675 }
 0x364   :  { %v1045_v16 = vmul.f32 %v2676_v12, %v1043_v36  ;;  %vm1050_vm1 = vweird.f32 %v2676_v12  ;;  %v2678_v40 = vpop.eup %2677 }
 0x365   :  { %vm1051_vm3 = vmor %vm1049_vm2, %vm1050_vm1  ;;  %v2680_v7 = vpop.eup %2679 }
 0x366   :  { %v1046_v38 = vsub.f32 1.0, %v1045_v16  ;;  %v1062_v35 = vadd.f32 1.0, %v2680_v7 }
 0x368   :  { %v1047_v31 = vmul.f32 %v2676_v12, %v1046_v38  ;;  %2681 = vrcp.f32 %v1062_v35  ;;  %v1074_v5 = vand.u32 2147483648, %v1062_v35  ;;  %vm1068_vm7 = vweird.f32 %v1062_v35 }
 0x369   :  { %2683 = vtanh.f32 %v987_v45 }
 0x36a   :  { %v1048_v33 = vadd.f32 %v2676_v12, %v1047_v31  ;;  %v1072_v31 = vand.u32 2147483647, %v1062_v35  ;;  %v1075_v63 = vor.u32 1.1754944e-38, %v1074_v5 }
 0x36c   :  { %v1052_v0 = vsel %vm1051_vm3, %v2676_v12, %v1048_v33  ;;  %vm1073_vm9 = vcmp.eq.f32.partialorder %v1072_v31, 8.507059e+37  ;;  %v4103_v31 = vld [vmem:[%s4704_s4 + $0x48] sm:$0xff] }
 0x36d   :  { %v1057_v18 = vsel %vm1054_vm5, %v1056_v17, %v1052_v0 }
 0x36e   :  { %v1080_v14 = vmul.f32 %v2678_v40, %v1057_v18  ;;  %v2682_v47 = vpop.eup %2681  ;;  %v2905_v40 = vmov 4  }
 0x36f   :  { %v2684_v32 = vpop.eup %2683  ;;  %v1064_v61 = vmul.f32 %v2682_v47, %v1062_v35  ;;  %vm1069_vm6 = vweird.f32 %v2682_v47  ;;  %2641 = vset.pattern.permute.xlu2 %v2905_v40 }
 0x370   :  { %1082 = vrot.lane.b32.xlu2 %v1080_v14, %s2901_s21  ;;  %v990_v2 = vsub.f32 %v3994_v30, %v2684_v32  ;;  %v995_v10 = vmul.f32 %v2684_v32, %v993_v37  ;;  %vm1070_vm8 = vmor %vm1068_vm7, %vm1069_vm6 }
 0x371   :  { %v1065_v13 = vsub.f32 1.0, %v1064_v61 }
 0x372   :  { %v996_v36 = vadd.f32 %v995_v10, %v990_v2 }
 0x373   :  { %v1066_v9 = vmul.f32 %v2682_v47, %v1065_v13  ;;  %v4082_v13 = vld [vmem:[%s4704_s4 + $0x78] sm:$0xff] }
 0x374   :  { %v1079_v12 = vmul.f32 %v1057_v18, %v996_v36 }
 0x375   :  { %v1067_v38 = vadd.f32 %v2682_v47, %v1066_v9  ;;  %v4088_v9 = vld [vmem:[%s4704_s4 + $0x68] sm:$0xff] }
 0x377   :  { %v1071_v30 = vsel %vm1070_vm8, %v2682_v47, %v1067_v38 }
 0x378   :  { %v4042_v17 = vsel %vm1073_vm9, %v1075_v63, %v1071_v30  ;;  %1242 = vperm.xlu2 %2641, %v3856_v62   ;;  %v4111_v30 = vld [vmem:[%s4704_s4 + $0x38] sm:$0xff] }
 0x379   :  { %v2852_v63 = vld [vmem:[%s4705_s5 + $0x38] sm:$0xff] }
 0x3ca   :  { %v1083_v39 = vpop.permute.xlu2 %1082 }
 0x3cb   :  { %v4034_v16 = vadd.f32 %v1083_v39, %v1079_v12  ;;  %v4094_v39 = vld [vmem:[%s4704_s4 + $0x58] sm:$0xff] }
 0x3cd   :  { %2685 = vtanh.f32 %v4034_v16  ;;  %2579 = vmatmul.msk.f32.vlgmr.msrb.gmra.mxu1 %vm717_vm4, %v4034_v16 }
 0x3ce   :  { %1406 = vmatpush.msrb.mxu1 %v3691_v46 }
 0x3d0   :  { %1407 = vmatpush.msrb.mxu1 %v3705_v49 }
 0x3d2   :  { %1408 = vmatpush.msrb.mxu1 %v3723_v22 }
 0x3d3   :  { %v2686_v33 = vpop.eup %2685 }
 0x3d4   :  { %v1087_v0 = vmul.f32 %v2686_v33, %v4042_v17  ;;  %1409 = vmatpush.msrb.mxu1 %v3750_v52  ;;  %v2853_v33 = vld [vmem:[%s4704_s4 + $0x70] sm:$0xff] }
 0x3d6   :  { %2580 = vmatmul.msk.f32.vlgmr.msrb.gmra.mxu2 %vm717_vm4, %v1087_v0  ;;  %2581 = vmatmul.msk.f32.vlgmr.msrb.gmra.mxu3 %vm717_vm4, %v1087_v0  ;;  %v4123_v0 = vld [vmem:[%s4704_s4 + $0x28] sm:$0xff] }
 0x3d7   :  { %1410 = vmatpush.msrb.mxu1 %v3770_v54  ;;  %1477 = vmatpush.msrb.mxu2 %v3710_v1 }
 0x3d8   :  { %1508 = vmatpush.msrb.mxu3 %v3683_v44  ;;  %v1121_v44 = vrot.slane %v3923_v4, 4 }
 0x3d9   :  { %1411 = vmatpush.msrb.mxu1 %v3789_v42  ;;  %1478 = vmatpush.msrb.mxu2 %v3728_v50  ;;  %v1122_v50 = vrot.slane %v3930_v11, 4 }
 0x3da   :  { %1509 = vmatpush.msrb.mxu3 %v3698_v48 }
 0x3db   :  { %1412 = vmatpush.msrb.mxu1 %v3816_v57  ;;  %1479 = vmatpush.msrb.mxu2 %v3755_v19 }
 0x3dc   :  { %1510 = vmatpush.msrb.mxu3 %v3715_v6 }
 0x3dd   :  { %1413 = vmatpush.msrb.mxu1 %v3830_v58  ;;  %1480 = vmatpush.msrb.mxu2 %v3775_v21 }
 0x3de   :  { %1511 = vmatpush.msrb.mxu3 %v3733_v51 }
 0x3df   :  { %1481 = vmatpush.msrb.mxu2 %v3794_v55 }
 0x3e0   :  { %1512 = vmatpush.msrb.mxu3 %v3742_v23 }
 0x3e1   :  { %1482 = vmatpush.msrb.mxu2 %v3810_v43 }
 0x3e2   :  { %1513 = vmatpush.msrb.mxu3 %v3763_v53 }
 0x3e3   :  { %1483 = vmatpush.msrb.mxu2 %v3824_v20 }
 0x3e4   :  { %1514 = vmatpush.msrb.mxu3 %v3781_v27 }
 0x3e5   :  { %1484 = vmatpush.msrb.mxu2 %v3837_v41 }
 0x3e6   :  { %1515 = vmatpush.msrb.mxu3 %v3800_v56 }
 0x44a   :  { %v1108_v41 = vpop.f32.mrf.mxu1 }
 0x44b   :  { %v1109_v11 = vadd.f32 %v1108_v41, %v3948_v24 }
 0x459   :  { %v1145_v46 = vpop.f32.mrf.mxu2  ;;  %v1165_v22 = vpop.f32.mrf.mxu3 }
 0x45a   :  { %v1146_v48 = vadd.f32 %v1145_v46, %v1121_v44  ;;  %v1166_v23 = vadd.f32 %v1165_v22, %v1122_v50  ;;  %v2855_v44 = vld [vmem:[%s4705_s5 + $0x30] sm:$0xff]  ;;  %v2856_v46 = vld [vmem:[%s4704_s4 + $0x60] sm:$0xff] }
 0x45b   :  { %v2861_v22 = vld [vmem:[%s4705_s5 + $0x20] sm:$0xff] }
 0x45c   :  { %v2582_v49 = vmul.f32 -1.442695, %v1146_v48  ;;  %v2583_v20 = vmul.f32 -1.442695, %v1166_v23  ;;  %v4135_v48 = vld [vmem:[%s4704_s4 + $0x18] sm:$0xff]  ;;  %v2862_v50 = vld [vmem:[%s4704_s4 + $0x40] sm:$0xff] }
 0x45e   :  { %2687 = vpow2.f32 %v2582_v49  ;;  %v2858_v49 = vld [vmem:[%s4705_s5 + $0x28] sm:$0xff] }
 0x464   :  { %v2688_v1 = vpop.eup %2687 }
 0x465   :  { %v1171_v6 = vadd.f32 1.0, %v2688_v1  ;;  %v2859_v1 = vld [vmem:[%s4704_s4 + $0x50] sm:$0xff] }
 0x467   :  { %2689 = vrcp.f32 %v1171_v6  ;;  %v1183_v53 = vand.u32 2147483648, %v1171_v6  ;;  %v1181_v21 = vand.u32 2147483647, %v1171_v6  ;;  %vm1177_vm11 = vweird.f32 %v1171_v6 }
 0x468   :  { %2691 = vtanh.f32 %v1166_v23  ;;  %v2864_v23 = vld [vmem:[%s4704_s4 + $0x30] sm:$0xff] }
 0x469   :  { %v1184_v42 = vor.u32 1.1754944e-38, %v1183_v53  ;;  %vm1182_vm13 = vcmp.eq.f32.partialorder %v1181_v21, 8.507059e+37  ;;  %2693 = vpow2.f32 %v2583_v20  ;;  %v2867_v53 = vld [vmem:[%s4705_s5 + $0x8] sm:$0xff]  ;;  %v2869_v21 = vld [vmem:[%s4705_s5] sm:$0xff] }
 0x46d   :  { %v2690_v51 = vpop.eup %2689 }
 0x46e   :  { %v1173_v52 = vmul.f32 %v2690_v51, %v1171_v6  ;;  %vm1178_vm10 = vweird.f32 %v2690_v51  ;;  %v2692_v56 = vpop.eup %2691  ;;  %v4147_v6 = vld [vmem:[%s4704_s4 + $0x8] sm:$0xff] }
 0x46f   :  { %vm1179_vm12 = vmor %vm1177_vm11, %vm1178_vm10  ;;  %v2694_v58 = vpop.eup %2693 }
 0x470   :  { %v1174_v19 = vsub.f32 1.0, %v1173_v52  ;;  %v1190_v4 = vadd.f32 1.0, %v2694_v58  ;;  %v2865_v52 = vld [vmem:[%s4705_s5 + $0x10] sm:$0xff] }
 0x472   :  { %v1175_v54 = vmul.f32 %v2690_v51, %v1174_v19  ;;  %2695 = vrcp.f32 %v1190_v4  ;;  %v1202_v10 = vand.u32 2147483648, %v1190_v4  ;;  %vm1196_vm15 = vweird.f32 %v1190_v4  ;;  %v2866_v19 = vld [vmem:[%s4704_s4 + $0x20] sm:$0xff] }
 0x473   :  { %2697 = vtanh.f32 %v1109_v11  ;;  %v1200_v62 = vand.u32 2147483647, %v1190_v4 }
 0x474   :  { %v1176_v27 = vadd.f32 %v2690_v51, %v1175_v54  ;;  %v1203_v12 = vor.u32 1.1754944e-38, %v1202_v10  ;;  %v2868_v54 = vld [vmem:[%s4704_s4 + $0x10] sm:$0xff] }
 0x475   :  { %vm1201_vm1 = vcmp.eq.f32.partialorder %v1200_v62, 8.507059e+37  ;;  %v2906_v62 = vmov 5  }
 0x476   :  { %v1180_v55 = vsel %vm1179_vm12, %v2690_v51, %v1176_v27  ;;  %v2863_v51 = vld [vmem:[%s4705_s5 + $0x18] sm:$0xff]  ;;  %v2870_v27 = vld [vmem:[%s4704_s4] sm:$0xff]  ;;  %2642 = vset.pattern.permute.xlu2 %v2906_v62 }
 0x477   :  { %v1185_v43 = vsel %vm1182_vm13, %v1184_v42, %v1180_v55 }
 0x478   :  { %v1208_v57 = vmul.f32 %v2692_v56, %v1185_v43  ;;  %v2696_v18 = vpop.eup %2695 }
 0x479   :  { %v2698_v14 = vpop.eup %2697  ;;  %v1192_v7 = vmul.f32 %v2696_v18, %v1190_v4  ;;  %vm1197_vm14 = vweird.f32 %v2696_v18 }
 0x47a   :  { %1210 = vrot.lane.b32.xlu1 %v1208_v57, %s2901_s21  ;;  %v1112_v34 = vsub.f32 %v4034_v16, %v2698_v14  ;;  %v1117_v35 = vmul.f32 %v2698_v14, %v1115_v29  ;;  %vm1198_vm0 = vmor %vm1196_vm15, %vm1197_vm14 }
 0x47b   :  { %v1193_v45 = vsub.f32 1.0, %v1192_v7 }
 0x47c   :  { %v1118_v60 = vadd.f32 %v1117_v35, %v1112_v34 }
 0x47d   :  { %v1194_v47 = vmul.f32 %v2696_v18, %v1193_v45 }
 0x47e   :  { %v1207_v32 = vmul.f32 %v1185_v43, %v1118_v60 }
 0x47f   :  { %v1195_v2 = vadd.f32 %v2696_v18, %v1194_v47 }
 0x481   :  { %v1199_v36 = vsel %vm1198_vm0, %v2696_v18, %v1195_v2 }
 0x482   :  { %v4097_v38 = vsel %vm1201_vm1, %v1203_v12, %v1199_v36  ;;  %v4187_v36 = vld [vmem:[%s4701_s1] sm:$0xf] }
 0x483   :  { %1364 = vperm.xlu2 %2642, %v4187_v36  }
 0x4ec   :  { %v1211_v61 = vpop.permute.xlu1 %1210 }
 0x4ed   :  { %v4074_v37 = vadd.f32 %v1211_v61, %v1207_v32 }
 0x4ef   :  { %2699 = vtanh.f32 %v4074_v37  ;;  %2584 = vmatmul.msk.f32.vlgmr.msra.gmra.mxu0 %vm717_vm4, %v4074_v37 }
 0x4f0   :  { %1528 = vmatpush.msra.mxu0 %v4082_v13 }
 0x4f2   :  { %1529 = vmatpush.msra.mxu0 %v4088_v9 }
 0x4f4   :  { %1530 = vmatpush.msra.mxu0 %v4094_v39 }
 0x4f5   :  { %v2700_v16 = vpop.eup %2699 }
 0x4f6   :  { %v1215_v5 = vmul.f32 %v2700_v16, %v4097_v38  ;;  %1531 = vmatpush.msra.mxu0 %v4103_v31 }
 0x4f8   :  { %2585 = vmatmul.msk.f32.vlgmr.msra.gmra.mxu1 %vm717_vm4, %v1215_v5  ;;  %2586 = vmatmul.msk.f32.vlgmr.msra.gmra.mxu2 %vm717_vm4, %v1215_v5  ;;  %v1243_v5 = vpop.permute.xlu2 %1242 }
 0x4f9   :  { %1532 = vmatpush.msra.mxu0 %v4111_v30  ;;  %1599 = vmatpush.msra.mxu1 %v2852_v63 }
 0x4fa   :  { %1636 = vmatpush.msra.mxu2 %v2853_v33 }
 0x4fb   :  { %1533 = vmatpush.msra.mxu0 %v4123_v0  ;;  %1600 = vmatpush.msra.mxu1 %v2855_v44 }
 0x4fc   :  { %1637 = vmatpush.msra.mxu2 %v2856_v46 }
 0x4fd   :  { %1534 = vmatpush.msra.mxu0 %v4135_v48  ;;  %1601 = vmatpush.msra.mxu1 %v2858_v49 }
 0x4fe   :  { %1638 = vmatpush.msra.mxu2 %v2859_v1 }
 0x4ff   :  { %1535 = vmatpush.msra.mxu0 %v4147_v6  ;;  %1602 = vmatpush.msra.mxu1 %v2861_v22 }
 0x500   :  { %1639 = vmatpush.msra.mxu2 %v2862_v50 }
 0x501   :  { %1603 = vmatpush.msra.mxu1 %v2863_v51 }
 0x502   :  { %1640 = vmatpush.msra.mxu2 %v2864_v23 }
 0x503   :  { %1604 = vmatpush.msra.mxu1 %v2865_v52 }
 0x504   :  { %1641 = vmatpush.msra.mxu2 %v2866_v19 }
 0x505   :  { %1605 = vmatpush.msra.mxu1 %v2867_v53 }
 0x506   :  { %1642 = vmatpush.msra.mxu2 %v2868_v54 }
 0x507   :  { %1606 = vmatpush.msra.mxu1 %v2869_v21 }
 0x508   :  { %1643 = vmatpush.msra.mxu2 %v2870_v27 }
 0x56c   :  { %v1236_v61 = vpop.f32.mrf.mxu0 }
 0x56d   :  { %v1237_v10 = vadd.f32 %v1236_v61, %v3948_v24 }
 0x575   :  { %v1267_v42 = vpop.f32.mrf.mxu1 }
 0x576   :  { %v1268_v55 = vadd.f32 %v1267_v42, %v3926_v15 }
 0x578   :  { %v2587_v56 = vmul.f32 -1.442695, %v1268_v55 }
 0x57a   :  { %2701 = vpow2.f32 %v2587_v56 }
 0x57b   :  { %v1287_v20 = vpop.f32.mrf.mxu2 }
 0x57c   :  { %v1288_v41 = vadd.f32 %v1287_v20, %v3934_v25 }
 0x57e   :  { %v2588_v47 = vmul.f32 -1.442695, %v1288_v41 }
 0x580   :  { %v2702_v43 = vpop.eup %2701 }
 0x581   :  { %v1293_v57 = vadd.f32 1.0, %v2702_v43  ;;  %v1372_v43 = vrot.slane %v3934_v25, 4 }
 0x583   :  { %2703 = vrcp.f32 %v1293_v57  ;;  %v1305_v40 = vand.u32 2147483648, %v1293_v57  ;;  %v1303_v14 = vand.u32 2147483647, %v1293_v57  ;;  %vm1299_vm3 = vweird.f32 %v1293_v57 }
 0x584   :  { %2705 = vtanh.f32 %v1288_v41 }
 0x585   :  { %v1306_v7 = vor.u32 1.1754944e-38, %v1305_v40  ;;  %vm1304_vm6 = vcmp.eq.f32.partialorder %v1303_v14, 8.507059e+37  ;;  %2707 = vpow2.f32 %v2588_v47 }
 0x589   :  { %v2704_v58 = vpop.eup %2703 }
 0x58a   :  { %v1295_v4 = vmul.f32 %v2704_v58, %v1293_v57  ;;  %vm1300_vm2 = vweird.f32 %v2704_v58  ;;  %v2706_v35 = vpop.eup %2705 }
 0x58b   :  { %vm1301_vm5 = vmor %vm1299_vm3, %vm1300_vm2  ;;  %v2708_v32 = vpop.eup %2707 }
 0x58c   :  { %v1296_v11 = vsub.f32 1.0, %v1295_v4  ;;  %v1312_v2 = vadd.f32 1.0, %v2708_v32  ;;  %v1365_v32 = vpop.permute.xlu2 %1364 }
 0x58e   :  { %v1297_v18 = vmul.f32 %v2704_v58, %v1296_v11  ;;  %2709 = vrcp.f32 %v1312_v2  ;;  %v1324_v52 = vand.u32 2147483648, %v1312_v2  ;;  %vm1318_vm8 = vweird.f32 %v1312_v2 }
 0x58f   :  { %2711 = vtanh.f32 %v1237_v10  ;;  %v1322_v19 = vand.u32 2147483647, %v1312_v2 }
 0x590   :  { %v1298_v29 = vadd.f32 %v2704_v58, %v1297_v18  ;;  %v1325_v53 = vor.u32 1.1754944e-38, %v1324_v52  ;;  %v4229_v52 = vld [vmem:[%s4705_s5 + $0xb8] sm:$0xff] }
 0x591   :  { %vm1323_vm10 = vcmp.eq.f32.partialorder %v1322_v19, 8.507059e+37  ;;  %v4234_v19 = vld [vmem:[%s4705_s5 + $0xb0] sm:$0xff] }
 0x592   :  { %v1302_v34 = vsel %vm1301_vm5, %v2704_v58, %v1298_v29 }
 0x593   :  { %v1307_v45 = vsel %vm1304_vm6, %v1306_v7, %v1302_v34 }
 0x594   :  { %v1330_v60 = vmul.f32 %v2706_v35, %v1307_v45  ;;  %v2710_v12 = vpop.eup %2709  ;;  %v2907_v35 = vmov 6  }
 0x595   :  { %v2712_v16 = vpop.eup %2711  ;;  %v1314_v63 = vmul.f32 %v2710_v12, %v1312_v2  ;;  %vm1319_vm7 = vweird.f32 %v2710_v12  ;;  %2643 = vset.pattern.permute.xlu1 %v2907_v35 }
 0x596   :  { %1332 = vrot.lane.b32.xlu1 %v1330_v60, %s2901_s21  ;;  %v1240_v33 = vsub.f32 %v4074_v37, %v2712_v16  ;;  %v1245_v44 = vmul.f32 %v2712_v16, %v1243_v5  ;;  %vm1320_vm9 = vmor %vm1318_vm8, %vm1319_vm7 }
 0x597   :  { %v1315_v46 = vsub.f32 1.0, %v1314_v63 }
 0x598   :  { %v1246_v49 = vadd.f32 %v1245_v44, %v1240_v33 }
 0x599   :  { %v1316_v1 = vmul.f32 %v2710_v12, %v1315_v46 }
 0x59a   :  { %v1329_v22 = vmul.f32 %v1307_v45, %v1246_v49 }
 0x59b   :  { %v1317_v23 = vadd.f32 %v2710_v12, %v1316_v1 }
 0x59d   :  { %v1321_v37 = vsel %vm1320_vm9, %v2710_v12, %v1317_v23 }
 0x59e   :  { %v4199_v21 = vsel %vm1323_vm10, %v1325_v53, %v1321_v37  ;;  %1492 = vperm.xlu1 %2643, %v4187_v36   ;;  %v4241_v53 = vld [vmem:[%s4705_s5 + $0xa8] sm:$0xff] }
 0x608   :  { %v1333_v50 = vpop.permute.xlu1 %1332 }
 0x609   :  { %v4191_v51 = vadd.f32 %v1333_v50, %v1329_v22 }
 0x60b   :  { %2713 = vtanh.f32 %v4191_v51  ;;  %2589 = vmatmul.msk.f32.vlgmr.msra.gmra.mxu3 %vm717_vm4, %v4191_v51 }
 0x60c   :  { %1656 = vmatpush.msra.mxu3 %v4082_v13  ;;  %v1371_v13 = vrot.slane %v3926_v15, 4 }
 0x60e   :  { %1657 = vmatpush.msra.mxu3 %v4088_v9 }
 0x610   :  { %1658 = vmatpush.msra.mxu3 %v4094_v39 }
 0x611   :  { %v2714_v54 = vpop.eup %2713 }
 0x612   :  { %v1337_v27 = vmul.f32 %v2714_v54, %v4199_v21  ;;  %1659 = vmatpush.msra.mxu3 %v4103_v31  ;;  %v4249_v54 = vld [vmem:[%s4705_s5 + $0xa0] sm:$0xff] }
 0x614   :  { %2590 = vmatmul.msk.f32.vlgmr.msrb.gmra.mxu0 %vm717_vm4, %v1337_v27  ;;  %2591 = vmatmul.msk.f32.vlgmr.msrb.gmra.mxu1 %vm717_vm4, %v1337_v27  ;;  %v4257_v27 = vld [vmem:[%s4705_s5 + $0x98] sm:$0xff] }
 0x615   :  { %1660 = vmatpush.msra.mxu3 %v4111_v30  ;;  %1751 = vmatpush.msrb.mxu1 %v4229_v52 }
 0x617   :  { %1661 = vmatpush.msra.mxu3 %v4123_v0  ;;  %1752 = vmatpush.msrb.mxu1 %v4234_v19 }
 0x619   :  { %1662 = vmatpush.msra.mxu3 %v4135_v48  ;;  %1753 = vmatpush.msrb.mxu1 %v4241_v53 }
 0x61b   :  { %1663 = vmatpush.msra.mxu3 %v4147_v6  ;;  %1754 = vmatpush.msrb.mxu1 %v4249_v54 }
 0x61d   :  { %1755 = vmatpush.msrb.mxu1 %v4257_v27 }
 0x68e   :  { %v1358_v29 = vpop.f32.mrf.mxu3 }
 0x68f   :  { %v1359_v34 = vadd.f32 %v1358_v29, %v3948_v24 }
 0x691   :  { %v1395_v9 = vpop.f32.mrf.mxu0  ;;  %v1415_v56 = vpop.f32.mrf.mxu1 }
 0x692   :  { %v1396_v39 = vadd.f32 %v1395_v9, %v1371_v13  ;;  %v1416_v30 = vadd.f32 %v1415_v56, %v1372_v43  ;;  %v4265_v13 = vld [vmem:[%s4705_s5 + $0x90] sm:$0xff] }
 0x693   :  { %1756 = vmatpush.msrb.mxu1 %v4265_v13 }
 0x694   :  { %v2592_v42 = vmul.f32 -1.442695, %v1396_v39  ;;  %v2593_v25 = vmul.f32 -1.442695, %v1416_v30 }
 0x696   :  { %2715 = vpow2.f32 %v2592_v42 }
 0x69c   :  { %v2716_v55 = vpop.eup %2715 }
 0x69d   :  { %v1421_v31 = vadd.f32 1.0, %v2716_v55  ;;  %v4276_v55 = vadd.f32 %v3989_v8, %v3938_v59 }
 0x69f   :  { %2717 = vrcp.f32 %v1421_v31  ;;  %v1433_v48 = vand.u32 2147483648, %v1421_v31  ;;  %v1431_v6 = vand.u32 2147483647, %v1421_v31  ;;  %vm1427_vm12 = vweird.f32 %v1421_v31 }
 0x6a0   :  { %2719 = vtanh.f32 %v1416_v30 }
 0x6a1   :  { %v1434_v41 = vor.u32 1.1754944e-38, %v1433_v48  ;;  %vm1432_vm14 = vcmp.eq.f32.partialorder %v1431_v6, 8.507059e+37  ;;  %2721 = vpow2.f32 %v2593_v25 }
 0x6a5   :  { %v2718_v57 = vpop.eup %2717 }
 0x6a6   :  { %v1423_v20 = vmul.f32 %v2718_v57, %v1421_v31  ;;  %vm1428_vm11 = vweird.f32 %v2718_v57  ;;  %v2720_v11 = vpop.eup %2719 }
 0x6a7   :  { %vm1429_vm13 = vmor %vm1427_vm12, %vm1428_vm11  ;;  %v2722_v14 = vpop.eup %2721 }
 0x6a8   :  { %v1424_v0 = vsub.f32 1.0, %v1423_v20  ;;  %v1440_v7 = vadd.f32 1.0, %v2722_v14  ;;  %v4299_v14 = vld [vmem:[%s4707_s7 + $0x3] ss:$0 sm:$0xff] }
 0x6aa   :  { %v1425_v58 = vmul.f32 %v2718_v57, %v1424_v0  ;;  %2723 = vrcp.f32 %v1440_v7  ;;  %v1452_v33 = vand.u32 2147483648, %v1440_v7  ;;  %vm1446_vm0 = vweird.f32 %v1440_v7 }
 0x6ab   :  { %2725 = vtanh.f32 %v1359_v34  ;;  %v1450_v44 = vand.u32 2147483647, %v1440_v7 }
 0x6ac   :  { %v1426_v15 = vadd.f32 %v2718_v57, %v1425_v58  ;;  %v1453_v49 = vor.u32 1.1754944e-38, %v1452_v33 }
 0x6ad   :  { %vm1451_vm2 = vcmp.eq.f32.partialorder %v1450_v44, 8.507059e+37 }
 0x6ae   :  { %v1430_v4 = vsel %vm1429_vm13, %v2718_v57, %v1426_v15 }
 0x6af   :  { %v1435_v40 = vsel %vm1432_vm14, %v1434_v41, %v1430_v4  ;;  %v4283_v4 = vld [vmem:[%s4705_s5 + $0x88] sm:$0xff] }
 0x6b0   :  { %v1458_v18 = vmul.f32 %v2720_v11, %v1435_v40  ;;  %v2724_v45 = vpop.eup %2723  ;;  %1757 = vmatpush.msrb.mxu1 %v4283_v4  ;;  %v4290_v11 = vld [vmem:[%s4705_s5 + $0x80] sm:$0xff] }
 0x6b1   :  { %v2726_v60 = vpop.eup %2725  ;;  %v1442_v47 = vmul.f32 %v2724_v45, %v1440_v7  ;;  %vm1447_vm15 = vweird.f32 %v2724_v45 }
 0x6b2   :  { %1460 = vrot.lane.b32.xlu0 %v1458_v18, %s2901_s21  ;;  %v1362_v61 = vsub.f32 %v4191_v51, %v2726_v60  ;;  %v1367_v2 = vmul.f32 %v2726_v60, %v1365_v32  ;;  %vm1448_vm1 = vmor %vm1446_vm0, %vm1447_vm15  ;;  %1758 = vmatpush.msrb.mxu1 %v4290_v11  ;;  %v2908_v60 = vmov 7  }
 0x6b3   :  { %v1443_v10 = vsub.f32 1.0, %v1442_v47  ;;  %2644 = vset.pattern.permute.xlu0 %v2908_v60 }
 0x6b4   :  { %v1368_v62 = vadd.f32 %v1367_v2, %v1362_v61 }
 0x6b5   :  { %v1444_v12 = vmul.f32 %v2724_v45, %v1443_v10 }
 0x6b6   :  { %v1457_v16 = vmul.f32 %v1435_v40, %v1368_v62 }
 0x6b7   :  { %v1445_v24 = vadd.f32 %v2724_v45, %v1444_v12 }
 0x6b9   :  { %v1449_v46 = vsel %vm1448_vm1, %v2724_v45, %v1445_v24  ;;  %v1493_v45 = vpop.permute.xlu1 %1492 }
 0x6ba   :  { %v4220_v22 = vsel %vm1451_vm2, %v1453_v49, %v1449_v46  ;;  %1614 = vperm.xlu0 %2644, %v4187_v36  }
 0x724   :  { %v1461_v5 = vpop.permute.xlu0 %1460 }
 0x725   :  { %v4215_v63 = vadd.f32 %v1461_v5, %v1457_v16 }
 0x727   :  { %2727 = vtanh.f32 %v4215_v63  ;;  %2594 = vmatmul.msk.f32.vlgmr.msrb.gmra.mxu2 %vm717_vm4, %v4215_v63 }
 0x728   :  { %1782 = vmatpush.msrb.mxu2 %v4229_v52 }
 0x72a   :  { %1783 = vmatpush.msrb.mxu2 %v4234_v19 }
 0x72c   :  { %1784 = vmatpush.msrb.mxu2 %v4241_v53 }
 0x72d   :  { %v2728_v1 = vpop.eup %2727 }
 0x72e   :  { %v1465_v50 = vmul.f32 %v2728_v1, %v4220_v22  ;;  %1785 = vmatpush.msrb.mxu2 %v4249_v54 }
 0x730   :  { %2595 = vmatmul.msk.f32.vlgmr.msrb.gmra.mxu3 %vm717_vm4, %v1465_v50  ;;  %2596 = vmatmul.msk.f32.vlgmr.msra.gmra.mxu0 %vm717_vm4, %v1465_v50  ;;  %v1621_v50 = vrot.slane %v3928_v28, 4 }
 0x731   :  { %1812 = vmatpush.msrb.mxu3 %v4229_v52  ;;  %1786 = vmatpush.msrb.mxu2 %v4257_v27 }
 0x733   :  { %1813 = vmatpush.msrb.mxu3 %v4234_v19  ;;  %1787 = vmatpush.msrb.mxu2 %v4265_v13 }
 0x735   :  { %1814 = vmatpush.msrb.mxu3 %v4241_v53  ;;  %1788 = vmatpush.msrb.mxu2 %v4283_v4 }
 0x737   :  { %1815 = vmatpush.msrb.mxu3 %v4249_v54  ;;  %1789 = vmatpush.msrb.mxu2 %v4290_v11 }
 0x739   :  { %1816 = vmatpush.msrb.mxu3 %v4257_v27 }
 0x73b   :  { %1817 = vmatpush.msrb.mxu3 %v4265_v13 }
 0x73d   :  { %1818 = vmatpush.msrb.mxu3 %v4283_v4 }
 0x73f   :  { %1819 = vmatpush.msrb.mxu3 %v4290_v11 }
 0x7aa   :  { %v1486_v18 = vpop.f32.mrf.mxu2 }
 0x7ab   :  { %v1487_v29 = vadd.f32 %v4299_v14, %v1486_v18 }
 0x7ad   :  { %v1537_v42 = vpop.f32.mrf.mxu0 }
 0x7ae   :  { %v1538_v56 = vadd.f32 %v1537_v42, %v4276_v55  ;;  %v2514_v42 = vld [vmem:[%s4705_s5 + $0x68] sm:$0xff] }
 0x7b0   :  { %v2598_v8 = vmul.f32 -1.442695, %v1538_v56 }
 0x7b3   :  { %v1517_v51 = vpop.f32.mrf.mxu3 }
 0x7b4   :  { %v1518_v23 = vadd.f32 %v1517_v51, %v3928_v28  ;;  %v2513_v28 = vld [vmem:[%s4705_s5 + $0x60] sm:$0xff] }
 0x7b6   :  { %v2597_v37 = vmul.f32 -1.442695, %v1518_v23 }
 0x7b8   :  { %2729 = vpow2.f32 %v2597_v37  ;;  %v2516_v37 = vld [vmem:[%s4705_s5 + $0x78] sm:$0xff] }
 0x7b9   :  { %1727 = vmatpush.msrb.mxu0 %v2516_v37 }
 0x7be   :  { %v2730_v9 = vpop.eup %2729 }
 0x7bf   :  { %v1543_v39 = vadd.f32 1.0, %v2730_v9  ;;  %v2515_v9 = vld [vmem:[%s4705_s5 + $0x70] sm:$0xff] }
 0x7c0   :  { %1728 = vmatpush.msrb.mxu0 %v2515_v9 }
 0x7c1   :  { %2731 = vrcp.f32 %v1543_v39  ;;  %v1555_v30 = vand.u32 2147483648, %v1543_v39  ;;  %v1553_v0 = vand.u32 2147483647, %v1543_v39  ;;  %vm1549_vm5 = vweird.f32 %v1543_v39 }
 0x7c2   :  { %2733 = vtanh.f32 %v1538_v56  ;;  %1729 = vmatpush.msrb.mxu0 %v2514_v42  ;;  %v2511_v56 = vld [vmem:[%s4705_s5 + $0x50] sm:$0xff] }
 0x7c3   :  { %v1556_v58 = vor.u32 1.1754944e-38, %v1555_v30  ;;  %vm1554_vm7 = vcmp.eq.f32.partialorder %v1553_v0, 8.507059e+37  ;;  %2735 = vpow2.f32 %v2598_v8 }
 0x7c4   :  { %1730 = vmatpush.msrb.mxu0 %v2513_v28 }
 0x7c7   :  { %v2732_v31 = vpop.eup %2731 }
 0x7c8   :  { %v1545_v43 = vmul.f32 %v2732_v31, %v1543_v39  ;;  %vm1550_vm3 = vweird.f32 %v2732_v31  ;;  %v2734_v15 = vpop.eup %2733 }
 0x7c9   :  { %vm1551_vm6 = vmor %vm1549_vm5, %vm1550_vm3  ;;  %v2736_v40 = vpop.eup %2735  ;;  %vm1766_vm5 = vcmask 519168  }
 0x7ca   :  { %v1546_v57 = vsub.f32 1.0, %v1545_v43  ;;  %v1562_v25 = vadd.f32 1.0, %v2736_v40 }
 0x7cc   :  { %v1547_v20 = vmul.f32 %v2732_v31, %v1546_v57  ;;  %2737 = vrcp.f32 %v1562_v25  ;;  %v1574_v24 = vand.u32 2147483648, %v1562_v25  ;;  %vm1568_vm9 = vweird.f32 %v1562_v25  ;;  %v2510_v57 = vld [vmem:[%s4705_s5 + $0x48] sm:$0xff] }
 0x7cd   :  { %2739 = vtanh.f32 %v1487_v29  ;;  %v1572_v36 = vand.u32 2147483647, %v1562_v25 }
 0x7ce   :  { %v1548_v48 = vadd.f32 %v2732_v31, %v1547_v20  ;;  %v1575_v33 = vor.u32 1.1754944e-38, %v1574_v24  ;;  %v2509_v20 = vld [vmem:[%s4705_s5 + $0x40] sm:$0xff] }
 0x7cf   :  { %vm1573_vm11 = vcmp.eq.f32.partialorder %v1572_v36, 8.507059e+37 }
 0x7d0   :  { %v1552_v6 = vsel %vm1551_vm6, %v2732_v31, %v1548_v48  ;;  %v2512_v31 = vld [vmem:[%s4705_s5 + $0x58] sm:$0xff]  ;;  %v1622_v48 = vrot.slane %v4276_v55, 4 }
 0x7d1   :  { %v1557_v41 = vsel %vm1554_vm7, %v1556_v58, %v1552_v6  ;;  %1731 = vmatpush.msrb.mxu0 %v2512_v31 }
 0x7d2   :  { %v1580_v59 = vmul.f32 %v2734_v15, %v1557_v41  ;;  %v2738_v7 = vpop.eup %2737 }
 0x7d3   :  { %v2740_v34 = vpop.eup %2739  ;;  %v1564_v35 = vmul.f32 %v2738_v7, %v1562_v25  ;;  %vm1569_vm8 = vweird.f32 %v2738_v7  ;;  %1732 = vmatpush.msrb.mxu0 %v2511_v56 }
 0x7d4   :  { %1582 = vrot.lane.b32.xlu2 %v1580_v59, %s2901_s21  ;;  %v1490_v47 = vsub.f32 %v4215_v63, %v2740_v34  ;;  %v1495_v32 = vmul.f32 %v2740_v34, %v1493_v45  ;;  %vm1570_vm10 = vmor %vm1568_vm9, %vm1569_vm8 }
 0x7d5   :  { %v1565_v61 = vsub.f32 1.0, %v1564_v35  ;;  %1733 = vmatpush.msrb.mxu0 %v2510_v57 }
 0x7d6   :  { %v1496_v2 = vadd.f32 %v1495_v32, %v1490_v47 }
 0x7d7   :  { %v1566_v10 = vmul.f32 %v2738_v7, %v1565_v61  ;;  %1734 = vmatpush.msrb.mxu0 %v2509_v20 }
 0x7d8   :  { %v1579_v62 = vmul.f32 %v1557_v41, %v1496_v2 }
 0x7d9   :  { %v1567_v5 = vadd.f32 %v2738_v7, %v1566_v10  ;;  %1842 = vmatpush.msra.mxu0 %v4229_v52  ;;  %v1615_v10 = vpop.permute.xlu0 %1614 }
 0x7db   :  { %v1571_v63 = vsel %vm1570_vm10, %v2738_v7, %v1567_v5  ;;  %1843 = vmatpush.msra.mxu0 %v4234_v19  ;;  %vm2257_vm10 = vcmask 64512  }
 0x7dc   :  { %v1576_v46 = vsel %vm1573_vm11, %v1575_v33, %v1571_v63 }
 0x7dd   :  { %1844 = vmatpush.msra.mxu0 %v4241_v53 }
 0x7df   :  { %1845 = vmatpush.msra.mxu0 %v4249_v54 }
 0x7e1   :  { %1846 = vmatpush.msra.mxu0 %v4257_v27 }
 0x7e3   :  { %1847 = vmatpush.msra.mxu0 %v4265_v13 }
 0x7e5   :  { %1848 = vmatpush.msra.mxu0 %v4283_v4 }
 0x7e7   :  { %1849 = vmatpush.msra.mxu0 %v4290_v11 }
 0x82e   :  { %v1583_v12 = vpop.permute.xlu2 %1582 }
 0x82f   :  { %v4304_v16 = vadd.f32 %v1583_v12, %v1579_v62 }
 0x831   :  { %2741 = vtanh.f32 %v4304_v16  ;;  %2599 = vmatmul.msk.f32.vlgmr.msra.gmra.mxu1 %vm717_vm4, %v4304_v16 }
 0x832   :  { %2743 = vtanh.f32 %v3960_v3  ;;  %1872 = vmatpush.msra.mxu1 %v4229_v52 }
 0x833   :  { %2745 = vtanh.f32 %v4002_v26 }
 0x834   :  { %1873 = vmatpush.msra.mxu1 %v4234_v19  ;;  %2747 = vtanh.f32 %v4199_v21 }
 0x835   :  { %2749 = vtanh.f32 %v4042_v17 }
 0x836   :  { %1874 = vmatpush.msra.mxu1 %v4241_v53  ;;  %2751 = vtanh.f32 %v4220_v22 }
 0x837   :  { %v2742_v44 = vpop.eup %2741  ;;  %2753 = vtanh.f32 %v1576_v46 }
 0x838   :  { %v4313_v49 = vpop.eup %2743  ;;  %1875 = vmatpush.msra.mxu1 %v4249_v54  ;;  %v1587_v1 = vmul.f32 %v2742_v44, %v1576_v46 }
 0x839   :  { %2605 = vmatmul.msk.f32.vlgmr.msrb.gmra.mxu1 %vm717_vm4, %v4313_v49  ;;  %v4331_v3 = vpop.eup %2745 }
 0x83a   :  { %2600 = vmatmul.msk.f32.vlgmr.msra.gmra.mxu2 %vm717_vm4, %v1587_v1  ;;  %2601 = vmatmul.msk.f32.vlgmr.msra.gmra.mxu3 %vm717_vm4, %v1587_v1  ;;  %v4334_v26 = vpop.eup %2747 }
 0x83b   :  { %1876 = vmatpush.msra.mxu1 %v4257_v27  ;;  %1902 = vmatpush.msra.mxu2 %v4229_v52  ;;  %v4338_v17 = vpop.eup %2749 }
 0x83c   :  { %1932 = vmatpush.msra.mxu3 %v4229_v52  ;;  %v4354_v21 = vpop.eup %2751 }
 0x83d   :  { %1877 = vmatpush.msra.mxu1 %v4265_v13  ;;  %1903 = vmatpush.msra.mxu2 %v4234_v19  ;;  %v4356_v22 = vpop.eup %2753 }
 0x83e   :  { %1933 = vmatpush.msra.mxu3 %v4234_v19 }
 0x83f   :  { %1878 = vmatpush.msra.mxu1 %v4283_v4  ;;  %1904 = vmatpush.msra.mxu2 %v4241_v53 }
 0x840   :  { %1934 = vmatpush.msra.mxu3 %v4241_v53 }
 0x841   :  { %1879 = vmatpush.msra.mxu1 %v4290_v11  ;;  %1905 = vmatpush.msra.mxu2 %v4249_v54 }
 0x842   :  { %2609 = vmatmul.msk.f32.vlgmr.msra.gmra.mxu1 %vm717_vm4, %v4334_v26  ;;  %1935 = vmatpush.msra.mxu3 %v4249_v54 }
 0x843   :  { %2606 = vmatmul.msk.f32.vlgmr.msrb.gmra.mxu2 %vm717_vm4, %v4331_v3  ;;  %2607 = vmatmul.msk.f32.vlgmr.msrb.gmra.mxu3 %vm717_vm4, %v4338_v17 }
 0x844   :  { %1906 = vmatpush.msra.mxu2 %v4257_v27  ;;  %1936 = vmatpush.msra.mxu3 %v4257_v27 }
 0x846   :  { %1907 = vmatpush.msra.mxu2 %v4265_v13  ;;  %1937 = vmatpush.msra.mxu3 %v4265_v13 }
 0x848   :  { %1908 = vmatpush.msra.mxu2 %v4283_v4  ;;  %1938 = vmatpush.msra.mxu3 %v4283_v4 }
 0x84a   :  { %1909 = vmatpush.msra.mxu2 %v4290_v11  ;;  %1939 = vmatpush.msra.mxu3 %v4290_v11 }
 0x84b   :  { %2610 = vmatmul.msk.f32.vlgmr.msra.gmra.mxu2 %vm717_vm4, %v4354_v21  ;;  %2611 = vmatmul.msk.f32.vlgmr.msra.gmra.mxu3 %vm717_vm4, %v4356_v22 }
 0x8ae   :  { %v1608_v60 = vpop.f32.mrf.mxu1 }
 0x8af   :  { %v1609_v32 = vadd.f32 %v4299_v14, %v1608_v60 }
 0x8bd   :  { %v1645_v51 = vpop.f32.mrf.mxu2  ;;  %v1665_v0 = vpop.f32.mrf.mxu3 }
 0x8be   :  { %v1646_v23 = vadd.f32 %v1645_v51, %v1621_v50  ;;  %v1666_v6 = vadd.f32 %v1665_v0, %v1622_v48 }
 0x8c0   :  { %v2602_v39 = vmul.f32 -1.442695, %v1646_v23  ;;  %v2603_v35 = vmul.f32 -1.442695, %v1666_v6 }
 0x8c2   :  { %2755 = vpow2.f32 %v2602_v39 }
 0x8c8   :  { %v2756_v43 = vpop.eup %2755 }
 0x8c9   :  { %v1671_v30 = vadd.f32 1.0, %v2756_v43 }
 0x8cb   :  { %2757 = vrcp.f32 %v1671_v30  ;;  %v1683_v59 = vand.u32 2147483648, %v1671_v30  ;;  %v1681_v40 = vand.u32 2147483647, %v1671_v30  ;;  %vm1677_vm13 = vweird.f32 %v1671_v30 }
 0x8cc   :  { %2759 = vtanh.f32 %v1666_v6 }
 0x8cd   :  { %v1684_v55 = vor.u32 1.1754944e-38, %v1683_v59  ;;  %vm1682_vm15 = vcmp.eq.f32.partialorder %v1681_v40, 8.507059e+37  ;;  %2761 = vpow2.f32 %v2603_v35 }
 0x8d1   :  { %v2758_v58 = vpop.eup %2757 }
 0x8d2   :  { %v1673_v15 = vmul.f32 %v2758_v58, %v1671_v30  ;;  %vm1678_vm12 = vweird.f32 %v2758_v58  ;;  %v2760_v29 = vpop.eup %2759  ;;  %v143_v30 = vld [vmem:[%s4707_s7 + $0x7] ss:$0 sm:$0xff] }
 0x8d3   :  { %vm1679_vm14 = vmor %vm1677_vm13, %vm1678_vm12  ;;  %v2762_v45 = vpop.eup %2761 }
 0x8d4   :  { %v1674_v41 = vsub.f32 1.0, %v1673_v15  ;;  %v1690_v47 = vadd.f32 1.0, %v2762_v45 }
 0x8d6   :  { %v1675_v8 = vmul.f32 %v2758_v58, %v1674_v41  ;;  %2763 = vrcp.f32 %v1690_v47  ;;  %v1702_v50 = vand.u32 2147483648, %v1690_v47  ;;  %vm1696_vm1 = vweird.f32 %v1690_v47 }
 0x8d7   :  { %2765 = vtanh.f32 %v1609_v32  ;;  %v1700_v14 = vand.u32 2147483647, %v1690_v47 }
 0x8d8   :  { %v1676_v18 = vadd.f32 %v2758_v58, %v1675_v8  ;;  %v1703_v23 = vor.u32 1.1754944e-38, %v1702_v50 }
 0x8d9   :  { %vm1701_vm3 = vcmp.eq.f32.partialorder %v1700_v14, 8.507059e+37 }
 0x8da   :  { %v1680_v25 = vsel %vm1679_vm14, %v2758_v58, %v1676_v18 }
 0x8db   :  { %v1685_v7 = vsel %vm1682_vm15, %v1684_v55, %v1680_v25 }
 0x8dc   :  { %v1708_v34 = vmul.f32 %v2760_v29, %v1685_v7  ;;  %v2764_v61 = vpop.eup %2763 }
 0x8dd   :  { %v2766_v2 = vpop.eup %2765  ;;  %v1692_v62 = vmul.f32 %v2764_v61, %v1690_v47  ;;  %vm1697_vm0 = vweird.f32 %v2764_v61 }
 0x8de   :  { %1710 = vrot.lane.b32.xlu1 %v1708_v34, %s2901_s21  ;;  %v1612_v12 = vsub.f32 %v4304_v16, %v2766_v2  ;;  %v1617_v5 = vmul.f32 %v2766_v2, %v1615_v10  ;;  %vm1698_vm2 = vmor %vm1696_vm1, %vm1697_vm0 }
 0x8df   :  { %v1693_v24 = vsub.f32 1.0, %v1692_v62 }
 0x8e0   :  { %v1618_v36 = vadd.f32 %v1617_v5, %v1612_v12 }
 0x8e1   :  { %v1694_v63 = vmul.f32 %v2764_v61, %v1693_v24 }
 0x8e2   :  { %v1707_v33 = vmul.f32 %v1685_v7, %v1618_v36 }
 0x8e3   :  { %v1695_v1 = vadd.f32 %v2764_v61, %v1694_v63 }
 0x8e5   :  { %v1699_v51 = vsel %vm1698_vm2, %v2764_v61, %v1695_v1 }
 0x8e6   :  { %v1704_v9 = vsel %vm1701_vm3, %v1703_v23, %v1699_v51 }
 0x950   :  { %v1711_v44 = vpop.permute.xlu1 %1710 }
 0x951   :  { %v1713_v46 = vadd.f32 %v1711_v44, %v1707_v33 }
 0x953   :  { %2767 = vtanh.f32 %v1713_v46 }
 0x954   :  { %2769 = vtanh.f32 %v4097_v38 }
 0x955   :  { %2771 = vtanh.f32 %v1704_v9 }
 0x959   :  { %v2768_v37 = vpop.eup %2767 }
 0x95a   :  { %v1715_v16 = vmul.f32 %v2768_v37, %v1704_v9  ;;  %v4406_v39 = vpop.eup %2769 }
 0x95b   :  { %v4414_v38 = vpop.eup %2771 }
 0x95c   :  { %2604 = vmatmul.msk.f32.vlgmr.msrb.gmra.mxu0 %vm717_vm4, %v1715_v16 }
 0x95d   :  { %1962 = vmatpush.msrb.mxu0 %v4229_v52  ;;  %v1791_v52 = vpop.f32.mrf.mxu2 }
 0x95f   :  { %1963 = vmatpush.msrb.mxu0 %v4234_v19  ;;  %v1760_v19 = vpop.f32.mrf.mxu1 }
 0x961   :  { %1964 = vmatpush.msrb.mxu0 %v4241_v53  ;;  %v140_v53 = vld [vmem:[%s4707_s7 + $0x4] ss:$0 sm:$0xff] }
 0x963   :  { %1965 = vmatpush.msrb.mxu0 %v4249_v54 }
 0x964   :  { %2608 = vmatmul.msk.f32.vlgmr.msra.gmra.mxu0 %vm717_vm4, %v4406_v39 }
 0x965   :  { %1966 = vmatpush.msrb.mxu0 %v4257_v27  ;;  %v1821_v27 = vpop.f32.mrf.mxu3 }
 0x967   :  { %1967 = vmatpush.msrb.mxu0 %v4265_v13  ;;  %v1881_v56 = vpop.f32.mrf.mxu1 }
 0x969   :  { %1968 = vmatpush.msrb.mxu0 %v4283_v4  ;;  %v1911_v4 = vpop.f32.mrf.mxu2 }
 0x96b   :  { %1969 = vmatpush.msrb.mxu0 %v4290_v11 }
 0x96c   :  { %2612 = vmatmul.msk.f32.vlgmr.msrb.gmra.mxu0 %vm717_vm4, %v4414_v38 }
 0x96d   :  { %v1941_v35 = vpop.f32.mrf.mxu3 }
 0x9d9   :  { %v1736_v54 = vpop.f32.mrf.mxu0 }
 0x9da   :  { %v1737_v42 = vadd.f32 %v1736_v54, %v140_v53 }
 0x9dc   :  { %v1824_v28 = vadd.f32 %v1821_v27, %v1737_v42  ;;  %v1794_v13 = vadd.f32 %v1791_v52, %v1737_v42  ;;  %v1763_v31 = vadd.f32 %v1760_v19, %v1737_v42  ;;  %v1914_v11 = vadd.f32 %v1911_v4, %v1737_v42 }
 0x9dd   :  { %v1884_v43 = vadd.f32 %v1881_v56, %v1737_v42  ;;  %v1944_v60 = vadd.f32 %v1941_v35, %v1737_v42 }
 0x9de   :  { %2773 = vtanh.f32 %v1824_v28 }
 0x9df   :  { %2775 = vtanh.f32 %v1794_v13 }
 0x9e0   :  { %2777 = vtanh.f32 %v1763_v31 }
 0x9e1   :  { %v1851_v57 = vpop.f32.mrf.mxu0  ;;  %2779 = vtanh.f32 %v1914_v11 }
 0x9e2   :  { %2781 = vtanh.f32 %v1884_v43  ;;  %v1854_v15 = vadd.f32 %v1851_v57, %v1737_v42 }
 0x9e4   :  { %v2774_v20 = vpop.eup %2773  ;;  %2783 = vtanh.f32 %v1854_v15 }
 0x9e5   :  { %v2776_v0 = vpop.eup %2775  ;;  %v1826_v48 = vmul.f32 %v2774_v20, %v143_v30 }
 0x9e6   :  { %v2778_v58 = vpop.eup %2777  ;;  %v1796_v6 = vmul.f32 %v2776_v0, %v143_v30 }
 0x9e7   :  { %v1827_v41 = vsel %vm1766_vm5, %v1826_v48, 0.0  ;;  %v1765_v59 = vmul.f32 %v2778_v58, %v143_v30  ;;  %v2780_v40 = vpop.eup %2779 }
 0x9e8   :  { %1828 = vadd.xlane.f32.xlu0 %v1827_v41  ;;  %v1797_v8 = vsel %vm1766_vm5, %v1796_v6, 0.0  ;;  %v2782_v25 = vpop.eup %2781  ;;  %v1916_v7 = vmul.f32 %v2780_v40, %v143_v30 }
 0x9e9   :  { %1798 = vadd.xlane.f32.xlu1 %v1797_v8  ;;  %v1767_v18 = vsel %vm1766_vm5, %v1765_v59, 0.0  ;;  %v1971_v55 = vpop.f32.mrf.mxu0  ;;  %v1886_v34 = vmul.f32 %v2782_v25, %v143_v30 }
 0x9ea   :  { %1768 = vadd.xlane.f32.xlu2 %v1767_v18  ;;  %v1974_v29 = vadd.f32 %v1971_v55, %v1737_v42  ;;  %v1917_v45 = vsel %vm1766_vm5, %v1916_v7, 0.0  ;;  %v2784_v47 = vpop.eup %2783  ;;  %v2507_v7 = vld [vmem:[%s4704_s4 + $0xf0] sm:$0xff] }
 0x9eb   :  { %v1887_v32 = vsel %vm1766_vm5, %v1886_v34, 0.0  ;;  %v1856_v62 = vmul.f32 %v2784_v47, %v143_v30  ;;  %v2508_v34 = vld [vmem:[%s4704_s4 + $0xf8] sm:$0xff]  ;;  %2072 = vmatpush.msrb.mxu1 %v2507_v7  ;;  %v2506_v47 = vld [vmem:[%s4704_s4 + $0xe8] sm:$0xff] }
 0x9ec   :  { %2785 = vtanh.f32 %v1974_v29  ;;  %2092 = vmatpush.msrb.mxu2 %v2508_v34 }
 0x9ed   :  { %2787 = vtanh.f32 %v1944_v60  ;;  %v1857_v12 = vsel %vm1766_vm5, %v1856_v62, 0.0  ;;  %v2505_v60 = vld [vmem:[%s4704_s4 + $0xe0] sm:$0xff] }
 0x9ee   :  { %2073 = vmatpush.msrb.mxu1 %v2505_v60  ;;  %2093 = vmatpush.msrb.mxu2 %v2506_v47 }
 0x9f1   :  { %1918 = vadd.xlane.f32.xlu1 %v1917_v45 }
 0x9f2   :  { %v2786_v61 = vpop.eup %2785  ;;  %1888 = vadd.xlane.f32.xlu2 %v1887_v32 }
 0x9f3   :  { %v1976_v2 = vmul.f32 %v2786_v61, %v143_v30  ;;  %v2788_v5 = vpop.eup %2787 }
 0x9f4   :  { %v1946_v24 = vmul.f32 %v2788_v5, %v143_v30  ;;  %v2502_v5 = vld [vmem:[%s4704_s4 + $0xc8] sm:$0xff] }
 0x9f5   :  { %v1977_v10 = vsel %vm1766_vm5, %v1976_v2, 0.0  ;;  %v2503_v2 = vld [vmem:[%s4704_s4 + $0xd0] sm:$0xff] }
 0x9f6   :  { %1978 = vadd.xlane.f32.xlu0 %v1977_v10  ;;  %v1947_v36 = vsel %vm1766_vm5, %v1946_v24, 0.0  ;;  %v2504_v10 = vld [vmem:[%s4704_s4 + $0xd8] sm:$0xff]  ;;  %2074 = vmatpush.msrb.mxu1 %v2503_v2  ;;  %v2499_v24 = vld [vmem:[%s4704_s4 + $0xb0] sm:$0xff] }
 0x9f7   :  { %2094 = vmatpush.msrb.mxu2 %v2504_v10 }
 0x9f9   :  { %2095 = vmatpush.msrb.mxu2 %v2502_v5 }
 0x9fa   :  { %1858 = vadd.xlane.f32.xlu2 %v1857_v12  ;;  %v2501_v12 = vld [vmem:[%s4704_s4 + $0xc0] sm:$0xff] }
 0x9fb   :  { %2075 = vmatpush.msrb.mxu1 %v2501_v12 }
 0x9fd   :  { %2076 = vmatpush.msrb.mxu1 %v2499_v24 }
 0xa02   :  { %1948 = vadd.xlane.f32.xlu2 %v1947_v36  ;;  %v2500_v36 = vld [vmem:[%s4704_s4 + $0xb8] sm:$0xff] }
 0xa03   :  { %2096 = vmatpush.msrb.mxu2 %v2500_v36 }
 0xa5b   :  { %v1829_v1 = vpop.xlane.xlu0 %1828 }
 0xa5c   :  { %v1799_v33 = vpop.xlane.xlu1 %1798 }
 0xa5d   :  { %v1769_v63 = vpop.xlane.xlu2 %1768 }
 0xa5e   :  { %v1980_v46 = vmax.f32 %v1769_v63, %v1799_v33 }
 0xa60   :  { %v1981_v50 = vmax.f32 %v1980_v46, %v1829_v1  ;;  %v2496_v46 = vld [vmem:[%s4704_s4 + $0x98] sm:$0xff] }
 0xa64   :  { %v1919_v37 = vpop.xlane.xlu1 %1918 }
 0xa65   :  { %v1889_v44 = vpop.xlane.xlu2 %1888 }
 0xa69   :  { %v1979_v19 = vpop.xlane.xlu0 %1978 }
 0xa6d   :  { %v1859_v14 = vpop.xlane.xlu2 %1858 }
 0xa6e   :  { %v1982_v51 = vmax.f32 %v1981_v50, %v1859_v14  ;;  %v2494_v50 = vld [vmem:[%s4704_s4 + $0x88] sm:$0xff] }
 0xa70   :  { %v1983_v23 = vmax.f32 %v1982_v51, %v1889_v44  ;;  %v2250_v51 = vld [vmem:[%s4706_s6] sm:$0xff] }
 0xa72   :  { %v1984_v9 = vmax.f32 %v1983_v23, %v1919_v37 }
 0xa75   :  { %v1949_v16 = vpop.xlane.xlu2 %1948 }
 0xa76   :  { %v1985_v52 = vmax.f32 %v1984_v9, %v1949_v16 }
 0xa78   :  { %v1986_v53 = vmax.f32 %v1985_v52, %v1979_v19 }
 0xa7a   :  { %v1987_v54 = vsub.f32 %v1769_v63, %v1986_v53  ;;  %v1990_v42 = vsub.f32 %v1799_v33, %v1986_v53  ;;  %v1993_v27 = vsub.f32 %v1829_v1, %v1986_v53  ;;  %v1996_v28 = vsub.f32 %v1859_v14, %v1986_v53  ;;  %v2497_v63 = vld [vmem:[%s4704_s4 + $0xa0] sm:$0xff]  ;;  %v2498_v33 = vld [vmem:[%s4704_s4 + $0xa8] sm:$0xff] }
 0xa7b   :  { %v1999_v56 = vsub.f32 %v1889_v44, %v1986_v53  ;;  %v2002_v43 = vsub.f32 %v1919_v37, %v1986_v53  ;;  %v2005_v30 = vsub.f32 %v1949_v16, %v1986_v53  ;;  %v2008_v0 = vsub.f32 %v1979_v19, %v1986_v53  ;;  %v2495_v44 = vld [vmem:[%s4704_s4 + $0x90] sm:$0xff]  ;;  %2077 = vmatpush.msrb.mxu1 %v2497_v63  ;;  %v2493_v1 = vld [vmem:[%s4704_s4 + $0x80] sm:$0xff]  ;;  %v2251_v19 = vld [vmem:[%s4706_s6 + $0x8] sm:$0xff] }
 0xa7c   :  { %v1988_v13 = vmul.f32 1.442695, %v1987_v54  ;;  %v1991_v31 = vmul.f32 1.442695, %v1990_v42  ;;  %v1994_v4 = vmul.f32 1.442695, %v1993_v27  ;;  %2097 = vmatpush.msrb.mxu2 %v2498_v33 }
 0xa7d   :  { %v1997_v11 = vmul.f32 1.442695, %v1996_v28  ;;  %v2000_v57 = vmul.f32 1.442695, %v1999_v56  ;;  %v2003_v20 = vmul.f32 1.442695, %v2002_v43  ;;  %2078 = vmatpush.msrb.mxu1 %v2495_v44 }
 0xa7e   :  { %2789 = vpow2.f32 %v1988_v13  ;;  %v2006_v6 = vmul.f32 1.442695, %v2005_v30  ;;  %v2009_v59 = vmul.f32 1.442695, %v2008_v0  ;;  %2098 = vmatpush.msrb.mxu2 %v2496_v46 }
 0xa7f   :  { %2791 = vpow2.f32 %v1991_v31  ;;  %2079 = vmatpush.msrb.mxu1 %v2493_v1 }
 0xa80   :  { %2793 = vpow2.f32 %v1994_v4  ;;  %2099 = vmatpush.msrb.mxu2 %v2494_v50 }
 0xa81   :  { %2795 = vpow2.f32 %v1997_v11  ;;  %2276 = vmatpush.msra.mxu1 %v2250_v51 }
 0xa82   :  { %2797 = vpow2.f32 %v2000_v57  ;;  %2296 = vmatpush.msra.mxu2 %v2251_v19 }
 0xa83   :  { %2799 = vpow2.f32 %v2003_v20 }
 0xa84   :  { %v4433_v48 = vpop.eup %2789  ;;  %2801 = vpow2.f32 %v2006_v6 }
 0xa85   :  { %v4435_v58 = vpop.eup %2791  ;;  %2803 = vpow2.f32 %v2009_v59 }
 0xa86   :  { %v2011_v15 = vadd.f32 %v4435_v58, %v4433_v48  ;;  %v4439_v41 = vpop.eup %2793 }
 0xa87   :  { %v4442_v40 = vpop.eup %2795 }
 0xa88   :  { %v2012_v8 = vadd.f32 %v4439_v41, %v2011_v15  ;;  %v4445_v55 = vpop.eup %2797 }
 0xa89   :  { %v4448_v29 = vpop.eup %2799 }
 0xa8a   :  { %v2013_v18 = vadd.f32 %v4442_v40, %v2012_v8  ;;  %v4457_v45 = vpop.eup %2801 }
 0xa8b   :  { %v2804_v61 = vpop.eup %2803 }
 0xa8c   :  { %v2014_v25 = vadd.f32 %v4445_v55, %v2013_v18 }
 0xa8e   :  { %v2015_v35 = vadd.f32 %v4448_v29, %v2014_v25 }
 0xa90   :  { %v2016_v32 = vadd.f32 %v4457_v45, %v2015_v35 }
 0xa92   :  { %v2017_v62 = vadd.f32 %v2804_v61, %v2016_v32 }
 0xa94   :  { %2805 = vrcp.f32 %v2017_v62  ;;  %v2029_v9 = vand.u32 2147483648, %v2017_v62  ;;  %v2027_v52 = vand.u32 2147483647, %v2017_v62  ;;  %vm2023_vm7 = vweird.f32 %v2017_v62 }
 0xa96   :  { %v2030_v54 = vor.u32 1.1754944e-38, %v2029_v9  ;;  %vm2028_vm9 = vcmp.eq.f32.partialorder %v2027_v52, 8.507059e+37 }
 0xa9a   :  { %v2806_v14 = vpop.eup %2805 }
 0xa9b   :  { %v2019_v23 = vmul.f32 %v2806_v14, %v2017_v62  ;;  %vm2024_vm6 = vweird.f32 %v2806_v14 }
 0xa9c   :  { %vm2025_vm8 = vmor %vm2023_vm7, %vm2024_vm6 }
 0xa9d   :  { %v2020_v37 = vsub.f32 1.0, %v2019_v23 }
 0xa9f   :  { %v2021_v16 = vmul.f32 %v2806_v14, %v2020_v37 }
 0xaa1   :  { %v2022_v53 = vadd.f32 %v2806_v14, %v2021_v16 }
 0xaa3   :  { %v2026_v42 = vsel %vm2025_vm8, %v2806_v14, %v2022_v53 }
 0xaa4   :  { %v2031_v27 = vsel %vm2028_vm9, %v2030_v54, %v2026_v42 }
 0xaa5   :  { %v2033_v28 = vmul.f32 %v4433_v48, %v2031_v27  ;;  %v2035_v13 = vmul.f32 %v4435_v58, %v2031_v27  ;;  %v2038_v31 = vmul.f32 %v4439_v41, %v2031_v27  ;;  %v2041_v11 = vmul.f32 %v4442_v40, %v2031_v27 }
 0xaa6   :  { %v2044_v30 = vmul.f32 %v4445_v55, %v2031_v27  ;;  %v2047_v48 = vmul.f32 %v4448_v29, %v2031_v27  ;;  %v2050_v15 = vmul.f32 %v4457_v45, %v2031_v27  ;;  %v2053_v41 = vmul.f32 %v2804_v61, %v2031_v27 }
 0xaa7   :  { %v2034_v4 = vmul.f32 %v4313_v49, %v2033_v28  ;;  %v2036_v56 = vmul.f32 %v4331_v3, %v2035_v13  ;;  %v2039_v57 = vmul.f32 %v4338_v17, %v2038_v31  ;;  %v2042_v0 = vmul.f32 %v4406_v39, %v2041_v11 }
 0xaa8   :  { %v2045_v58 = vmul.f32 %v4334_v26, %v2044_v30  ;;  %v2048_v3 = vmul.f32 %v4354_v21, %v2047_v48  ;;  %v2051_v8 = vmul.f32 %v4356_v22, %v2050_v15  ;;  %v2054_v40 = vmul.f32 %v4414_v38, %v2053_v41  ;;  %v2249_v26 = vld [vmem:[%s4702_s2] sm:$0xf]  ;;  %v2539_v15 = vld [vmem:[%s4705_s5 + $0x130] sm:$0xff] }
 0xaa9   :  { %v2037_v43 = vadd.f32 %v2036_v56, %v2034_v4  ;;  %v2565_v21 = vld [vmem:[%s4707_s7 + $0x1] ss:$8 sm:$0x3]  ;;  %v2566_v38 = vld [vmem:[%s4707_s7 + $0x2] ss:$8 sm:$0x3] }
 0xaaa   :  { %v2057_v22 = vperm.slane %v2565_v21, 0  ;;  %v2253_v29 = vperm.slane %v2566_v38, 0  ;;  %v2058_v32 = vperm.slane %v2565_v21, 1  ;;  %v2254_v5 = vperm.slane %v2566_v38, 1  ;;  %v2537_v41 = vld [vmem:[%s4705_s5 + $0x120] sm:$0xff]  ;;  %v2534_v21 = vld [vmem:[%s4705_s5 + $0x108] sm:$0xff] }
 0xaab   :  { %v2040_v20 = vadd.f32 %v2039_v57, %v2037_v43 }
 0xaad   :  { %v2043_v6 = vadd.f32 %v2042_v0, %v2040_v20 }
 0xaaf   :  { %v2046_v49 = vadd.f32 %v2045_v58, %v2043_v6  ;;  %v2540_v58 = vld [vmem:[%s4705_s5 + $0x138] sm:$0xff] }
 0xab0   :  { %2164 = vmatpush.msrb.mxu3 %v2540_v58  ;;  %v144_v58 = vld [vmem:[%s4707_s7 + $0x10] ss:$0 sm:$0xff] }
 0xab1   :  { %v2049_v59 = vadd.f32 %v2048_v3, %v2046_v49  ;;  %v2538_v3 = vld [vmem:[%s4705_s5 + $0x128] sm:$0xff] }
 0xab2   :  { %2165 = vmatpush.msrb.mxu3 %v2539_v15 }
 0xab3   :  { %v2052_v17 = vadd.f32 %v2051_v8, %v2049_v59 }
 0xab4   :  { %2166 = vmatpush.msrb.mxu3 %v2538_v3 }
 0xab5   :  { %v2055_v18 = vadd.f32 %v2054_v40, %v2052_v17  ;;  %v2536_v17 = vld [vmem:[%s4705_s5 + $0x118] sm:$0xff] }
 0xab6   :  { %2167 = vmatpush.msrb.mxu3 %v2537_v41  ;;  %v142_v41 = vld [vmem:[%s4707_s7 + $0x6] ss:$0 sm:$0xff] }
 0xab7   :  { %2613 = vmatmul.msk.f32.vlgmr.msrb.gmra.mxu1 %vm717_vm4, %v2055_v18  ;;  %2614 = vmatmul.msk.f32.vlgmr.msrb.gmra.mxu2 %vm717_vm4, %v2055_v18  ;;  %v2535_v18 = vld [vmem:[%s4705_s5 + $0x110] sm:$0xff] }
 0xab8   :  { %2168 = vmatpush.msrb.mxu3 %v2536_v17 }
 0xaba   :  { %2169 = vmatpush.msrb.mxu3 %v2535_v18  ;;  %v145_v18 = vld [vmem:[%s4707_s7 + $0x11] ss:$0 sm:$0xff] }
 0xabc   :  { %2170 = vmatpush.msrb.mxu3 %v2534_v21 }
 0xabf   :  { %2619 = vmatmul.msk.f32.vlgmr.msra.gmra.mxu1 %vm2257_vm10, %v2249_v26  ;;  %2620 = vmatmul.msk.f32.vlgmr.msra.gmra.mxu2 %vm2257_vm10, %v2249_v26 }
 0xb34   :  { %v2081_v39 = vpop.f32.mrf.mxu1 }
 0xb35   :  { %v2082_v55 = vadd.f32 %v2081_v39, %v2057_v22  ;;  %v2533_v39 = vld [vmem:[%s4705_s5 + $0x100] sm:$0xff] }
 0xb36   :  { %2171 = vmatpush.msrb.mxu3 %v2533_v39 }
 0xb37   :  { %v2615_v25 = vmul.f32 -1.442695, %v2082_v55 }
 0xb39   :  { %2807 = vpow2.f32 %v2615_v25 }
 0xb3a   :  { %v2101_v47 = vpop.f32.mrf.mxu2 }
 0xb3b   :  { %v2102_v10 = vadd.f32 %v2101_v47, %v2058_v32 }
 0xb3c   :  { %v2278_v7 = vpop.f32.mrf.mxu1 }
 0xb3d   :  { %v2279_v34 = vadd.f32 %v2278_v7, %v2253_v29  ;;  %v2616_v43 = vmul.f32 -1.442695, %v2102_v10 }
 0xb3f   :  { %v2808_v35 = vpop.eup %2807  ;;  %v2621_v45 = vmul.f32 -1.442695, %v2279_v34 }
 0xb40   :  { %v2107_v60 = vadd.f32 1.0, %v2808_v35 }
 0xb41   :  { %2809 = vpow2.f32 %v2621_v45 }
 0xb42   :  { %2811 = vrcp.f32 %v2107_v60  ;;  %v2298_v36 = vpop.f32.mrf.mxu2  ;;  %v2119_v63 = vand.u32 2147483648, %v2107_v60  ;;  %v2117_v44 = vand.u32 2147483647, %v2107_v60  ;;  %vm2113_vm12 = vweird.f32 %v2107_v60 }
 0xb43   :  { %v2299_v46 = vadd.f32 %v2298_v36, %v2254_v5  ;;  %v2532_v36 = vld [vmem:[%s4705_s5 + $0xf8] sm:$0xff] }
 0xb44   :  { %v2120_v14 = vor.u32 1.1754944e-38, %v2119_v63  ;;  %vm2118_vm14 = vcmp.eq.f32.partialorder %v2117_v44, 8.507059e+37  ;;  %v2531_v63 = vld [vmem:[%s4705_s5 + $0xf0] sm:$0xff]  ;;  %2189 = vmatpush.msra.mxu0 %v2532_v36  ;;  %v2530_v44 = vld [vmem:[%s4705_s5 + $0xe8] sm:$0xff] }
 0xb45   :  { %v2622_v57 = vmul.f32 -1.442695, %v2299_v46 }
 0xb46   :  { %2190 = vmatpush.msra.mxu0 %v2531_v63 }
 0xb47   :  { %v2810_v61 = vpop.eup %2809 }
 0xb48   :  { %v2812_v2 = vpop.eup %2811  ;;  %v2304_v62 = vadd.f32 1.0, %v2810_v61  ;;  %2191 = vmatpush.msra.mxu0 %v2530_v44 }
 0xb49   :  { %v2109_v12 = vmul.f32 %v2812_v2, %v2107_v60  ;;  %vm2114_vm11 = vweird.f32 %v2812_v2 }
 0xb4a   :  { %2813 = vrcp.f32 %v2304_v62  ;;  %vm2115_vm13 = vmor %vm2113_vm12, %vm2114_vm11  ;;  %vm2310_vm15 = vweird.f32 %v2304_v62  ;;  %v2316_v16 = vand.u32 2147483648, %v2304_v62  ;;  %v2314_v53 = vand.u32 2147483647, %v2304_v62 }
 0xb4b   :  { %v2110_v24 = vsub.f32 1.0, %v2109_v12  ;;  %2815 = vtanh.f32 %v2102_v10 }
 0xb4c   :  { %2817 = vtanh.f32 %v2299_v46  ;;  %v2317_v42 = vor.u32 1.1754944e-38, %v2316_v16  ;;  %vm2315_vm2 = vcmp.eq.f32.partialorder %v2314_v53, 8.507059e+37  ;;  %v2555_v46 = vld [vmem:[%s4705_s5 + $0x1b0] sm:$0xff]  ;;  %v2552_v53 = vld [vmem:[%s4705_s5 + $0x198] sm:$0xff] }
 0xb4d   :  { %v2111_v33 = vmul.f32 %v2812_v2, %v2110_v24  ;;  %v2527_v16 = vld [vmem:[%s4705_s5 + $0xd0] sm:$0xff] }
 0xb4f   :  { %v2112_v1 = vadd.f32 %v2812_v2, %v2111_v33  ;;  %v2556_v33 = vld [vmem:[%s4705_s5 + $0x1b8] sm:$0xff] }
 0xb50   :  { %v2814_v50 = vpop.eup %2813  ;;  %2360 = vmatpush.msra.mxu3 %v2556_v33 }
 0xb51   :  { %v2116_v51 = vsel %vm2115_vm13, %v2812_v2, %v2112_v1  ;;  %v2306_v23 = vmul.f32 %v2814_v50, %v2304_v62  ;;  %v2816_v37 = vpop.eup %2815  ;;  %vm2311_vm0 = vweird.f32 %v2814_v50  ;;  %v2548_v1 = vld [vmem:[%s4705_s5 + $0x178] sm:$0xff]  ;;  %vm2207_vm13 = vcmask 1043456  }
 0xb52   :  { %v2121_v9 = vsel %vm2118_vm14, %v2120_v14, %v2116_v51  ;;  %vm2312_vm1 = vmor %vm2310_vm15, %vm2311_vm0  ;;  %v2818_v28 = vpop.eup %2817  ;;  %2380 = vmatpush.msrb.mxu1 %v2548_v1  ;;  %v2547_v14 = vld [vmem:[%s4705_s5 + $0x170] sm:$0xff]  ;;  %v2529_v51 = vld [vmem:[%s4705_s5 + $0xe0] sm:$0xff]  ;;  %2361 = vmatpush.msra.mxu3 %v2555_v46 }
 0xb53   :  { %v2124_v52 = vmul.f32 %v2816_v37, %v2121_v9  ;;  %v2307_v19 = vsub.f32 1.0, %v2306_v23  ;;  %v2546_v23 = vld [vmem:[%s4705_s5 + $0x168] sm:$0xff]  ;;  %v2553_v37 = vld [vmem:[%s4705_s5 + $0x1a0] sm:$0xff]  ;;  %v2528_v9 = vld [vmem:[%s4705_s5 + $0xd8] sm:$0xff]  ;;  %2192 = vmatpush.msra.mxu0 %v2529_v51 }
 0xb54   :  { %2381 = vmatpush.msrb.mxu1 %v2547_v14 }
 0xb55   :  { %2819 = vtanh.f32 %v2124_v52  ;;  %v2308_v54 = vmul.f32 %v2814_v50, %v2307_v19  ;;  %2193 = vmatpush.msra.mxu0 %v2528_v9  ;;  %v2526_v52 = vld [vmem:[%s4705_s5 + $0xc8] sm:$0xff]  ;;  %v2525_v19 = vld [vmem:[%s4705_s5 + $0xc0] sm:$0xff] }
 0xb56   :  { %2382 = vmatpush.msrb.mxu1 %v2546_v23 }
 0xb57   :  { %v2309_v27 = vadd.f32 %v2814_v50, %v2308_v54  ;;  %2194 = vmatpush.msra.mxu0 %v2527_v16  ;;  %v2545_v54 = vld [vmem:[%s4705_s5 + $0x160] sm:$0xff] }
 0xb58   :  { %2383 = vmatpush.msrb.mxu1 %v2545_v54 }
 0xb59   :  { %v2313_v13 = vsel %vm2312_vm1, %v2814_v50, %v2309_v27  ;;  %v2554_v50 = vld [vmem:[%s4705_s5 + $0x1a8] sm:$0xff]  ;;  %2195 = vmatpush.msra.mxu0 %v2526_v52  ;;  %v2544_v27 = vld [vmem:[%s4705_s5 + $0x158] sm:$0xff]  ;;  %vm2241_vm1 = vcmask 1043968  }
 0xb5a   :  { %v2318_v31 = vsel %vm2315_vm2, %v2317_v42, %v2313_v13  ;;  %2362 = vmatpush.msra.mxu3 %v2554_v50  ;;  %v2551_v42 = vld [vmem:[%s4705_s5 + $0x190] sm:$0xff]  ;;  %2384 = vmatpush.msrb.mxu1 %v2544_v27 }
 0xb5b   :  { %v2820_v4 = vpop.eup %2819  ;;  %v2321_v56 = vmul.f32 %v2818_v28, %v2318_v31  ;;  %2196 = vmatpush.msra.mxu0 %v2525_v19  ;;  %v2550_v28 = vld [vmem:[%s4705_s5 + $0x188] sm:$0xff]  ;;  %v2543_v13 = vld [vmem:[%s4705_s5 + $0x150] sm:$0xff]  ;;  %v2549_v31 = vld [vmem:[%s4705_s5 + $0x180] sm:$0xff] }
 0xb5c   :  { %2146 = vrot.lane.b32.xlu1 %v2820_v4, %s2901_s21  ;;  %2363 = vmatpush.msra.mxu3 %v2553_v37  ;;  %v2542_v4 = vld [vmem:[%s4705_s5 + $0x148] sm:$0xff] }
 0xb5d   :  { %2821 = vtanh.f32 %v2321_v56  ;;  %2385 = vmatpush.msrb.mxu1 %v2543_v13  ;;  %v2541_v56 = vld [vmem:[%s4705_s5 + $0x140] sm:$0xff] }
 0xb5e   :  { %2823 = vpow2.f32 %v2616_v43  ;;  %2364 = vmatpush.msra.mxu3 %v2552_v53 }
 0xb5f   :  { %2825 = vpow2.f32 %v2622_v57  ;;  %2386 = vmatpush.msrb.mxu1 %v2542_v4 }
 0xb60   :  { %2365 = vmatpush.msra.mxu3 %v2551_v42 }
 0xb61   :  { %2387 = vmatpush.msrb.mxu1 %v2541_v56 }
 0xb62   :  { %2366 = vmatpush.msra.mxu3 %v2550_v28 }
 0xb63   :  { %v2822_v11 = vpop.eup %2821 }
 0xb64   :  { %2343 = vrot.lane.b32.xlu1 %v2822_v11, %s2901_s21  ;;  %v2824_v30 = vpop.eup %2823  ;;  %2367 = vmatpush.msra.mxu3 %v2549_v31 }
 0xb65   :  { %v2128_v20 = vadd.f32 1.0, %v2824_v30  ;;  %v2826_v0 = vpop.eup %2825 }
 0xb66   :  { %v2325_v48 = vadd.f32 1.0, %v2826_v0 }
 0xb67   :  { %2827 = vrcp.f32 %v2128_v20  ;;  %v2140_v38 = vand.u32 2147483648, %v2128_v20  ;;  %vm2134_vm6 = vweird.f32 %v2128_v20  ;;  %v2138_v25 = vand.u32 2147483647, %v2128_v20 }
 0xb68   :  { %2829 = vrcp.f32 %v2325_v48  ;;  %vm2331_vm8 = vweird.f32 %v2325_v48  ;;  %v2337_v35 = vand.u32 2147483648, %v2325_v48  ;;  %v2335_v60 = vand.u32 2147483647, %v2325_v48 }
 0xb69   :  { %v2141_v34 = vor.u32 1.1754944e-38, %v2140_v38  ;;  %vm2139_vm10 = vcmp.eq.f32.partialorder %v2138_v25, 8.507059e+37 }
 0xb6a   :  { %v2338_v2 = vor.u32 1.1754944e-38, %v2337_v35  ;;  %vm2336_vm12 = vcmp.eq.f32.partialorder %v2335_v60, 8.507059e+37 }
 0xb6d   :  { %v2828_v6 = vpop.eup %2827 }
 0xb6e   :  { %v2130_v49 = vmul.f32 %v2828_v6, %v2128_v20  ;;  %v2830_v59 = vpop.eup %2829  ;;  %vm2135_vm3 = vweird.f32 %v2828_v6  ;;  %v141_v20 = vld [vmem:[%s4707_s7 + $0x5] ss:$0 sm:$0xff] }
 0xb6f   :  { %v2327_v40 = vmul.f32 %v2830_v59, %v2325_v48  ;;  %vm2136_vm7 = vmor %vm2134_vm6, %vm2135_vm3  ;;  %vm2332_vm9 = vweird.f32 %v2830_v59 }
 0xb70   :  { %v2131_v8 = vsub.f32 1.0, %v2130_v49  ;;  %vm2333_vm11 = vmor %vm2331_vm8, %vm2332_vm9  ;;  %vm2468_vm8 = vcmask 516096  }
 0xb71   :  { %v2328_v22 = vsub.f32 1.0, %v2327_v40 }
 0xb72   :  { %v2132_v26 = vmul.f32 %v2828_v6, %v2131_v8 }
 0xb73   :  { %v2329_v29 = vmul.f32 %v2830_v59, %v2328_v22 }
 0xb74   :  { %v2133_v55 = vadd.f32 %v2828_v6, %v2132_v26 }
 0xb75   :  { %v2330_v45 = vadd.f32 %v2830_v59, %v2329_v29 }
 0xb76   :  { %v2137_v7 = vsel %vm2136_vm7, %v2828_v6, %v2133_v55 }
 0xb77   :  { %v2142_v47 = vsel %vm2139_vm10, %v2141_v34, %v2137_v7  ;;  %v2334_v10 = vsel %vm2333_vm11, %v2830_v59, %v2330_v45 }
 0xb78   :  { %v2339_v62 = vsel %vm2336_vm12, %v2338_v2, %v2334_v10 }
 0xbce   :  { %v2147_v32 = vpop.permute.xlu1 %2146 }
 0xbcf   :  { %v2149_v61 = vmul.f32 %v2147_v32, %v2142_v47 }
 0xbd1   :  { %2831 = vtanh.f32 %v2149_v61  ;;  %2177 = vrot.lane.b32.xlu0 %v2149_v61, %s2901_s21 }
 0xbd6   :  { %v2344_v12 = vpop.permute.xlu1 %2343 }
 0xbd7   :  { %v4561_v5 = vpop.eup %2831  ;;  %v4563_v24 = vmul.f32 %v2344_v12, %v2339_v62 }
 0xbd8   :  { %2152 = vrot.lane.b32.xlu2 %v4561_v5, %s2901_s21 }
 0xbd9   :  { %2348 = vrot.lane.b32.xlu0 %v4563_v24, %s2901_s21 }
 0xc32   :  { %v2153_v11 = vpop.permute.xlu2 %2152 }
 0xc33   :  { %2617 = vmatmul.msk.f32.vlgmr.msrb.gmra.mxu3 %vm717_vm4, %v2153_v11 }
 0xc43   :  { %v2178_v43 = vpop.permute.xlu0 %2177 }
 0xc44   :  { %2618 = vmatmul.msk.f32.vlgmr.msra.gmra.mxu0 %vm717_vm4, %v2178_v43 }
 0xc4b   :  { %v2349_v57 = vpop.permute.xlu0 %2348 }
 0xc4c   :  { %2623 = vmatmul.msk.f32.vlgmr.msra.gmra.mxu3 %vm717_vm4, %v2349_v57  ;;  %2624 = vmatmul.msk.f32.vlgmr.msrb.gmra.mxu1 %vm717_vm4, %v2349_v57 }
 0xcb6   :  { %v2173_v30 = vpop.f32.mrf.mxu3 }
 0xcc1   :  { %v2198_v0 = vpop.f32.mrf.mxu0 }
 0xcc2   :  { %v2199_v48 = vadd.f32 %v2198_v0, %v2173_v30  ;;  %v2564_v0 = vld [vmem:[%s4705_s5 + $0x1f8] sm:$0xff] }
 0xcc3   :  { %2451 = vmatpush.msrb.mxu2 %v2564_v0 }
 0xcc4   :  { %v2201_v6 = vadd.f32 %v2199_v48, %v141_v20  ;;  %v2563_v48 = vld [vmem:[%s4705_s5 + $0x1f0] sm:$0xff] }
 0xcc5   :  { %2452 = vmatpush.msrb.mxu2 %v2563_v48 }
 0xcc6   :  { %2833 = vtanh.f32 %v2201_v6 }
 0xcc9   :  { %v2389_v3 = vpop.f32.mrf.mxu1 }
 0xccc   :  { %v2834_v15 = vpop.eup %2833 }
 0xccd   :  { %v2203_v49 = vmul.f32 %v2834_v15, %v144_v58  ;;  %v2562_v58 = vld [vmem:[%s4705_s5 + $0x1e8] sm:$0xff] }
 0xcce   :  { %2453 = vmatpush.msrb.mxu2 %v2562_v58 }
 0xccf   :  { %v2369_v59 = vpop.f32.mrf.mxu3  ;;  %v2204_v8 = vsel %vm1766_vm5, %v2203_v49, 0.0 }
 0xcd0   :  { %v2390_v17 = vadd.f32 %v2389_v3, %v2369_v59  ;;  %2205 = vadd.xlane.f32.xlu2 %v2204_v8  ;;  %v2561_v3 = vld [vmem:[%s4705_s5 + $0x1e0] sm:$0xff] }
 0xcd1   :  { %2454 = vmatpush.msrb.mxu2 %v2561_v3 }
 0xcd2   :  { %v2392_v40 = vadd.f32 %v2390_v17, %v142_v41  ;;  %v2560_v17 = vld [vmem:[%s4705_s5 + $0x1d8] sm:$0xff] }
 0xcd3   :  { %2455 = vmatpush.msrb.mxu2 %v2560_v17 }
 0xcd4   :  { %2835 = vtanh.f32 %v2392_v40 }
 0xcda   :  { %v2836_v26 = vpop.eup %2835 }
 0xcdb   :  { %v2394_v21 = vmul.f32 %v2836_v26, %v145_v18 }
 0xcdd   :  { %v2395_v22 = vsel %vm1766_vm5, %v2394_v21, 0.0 }
 0xcde   :  { %2396 = vadd.xlane.f32.xlu0 %v2395_v22 }
 0xd43   :  { %v2206_v39 = vpop.xlane.xlu2 %2205 }
 0xd44   :  { %v2208_v55 = vsel %vm2207_vm13, %v2206_v39, -inf }
 0xd45   :  { %v2209_v38 = vrot.slane %v2208_v55, 4 }
 0xd47   :  { %v2210_v25 = vmax.f32 %v2208_v55, %v2209_v38  ;;  %v2558_v55 = vld [vmem:[%s4705_s5 + $0x1c8] sm:$0xff] }
 0xd49   :  { %v2211_v29 = vrot.slane %v2210_v25, 2 }
 0xd4b   :  { %v2212_v7 = vmax.f32 %v2210_v25, %v2211_v29 }
 0xd4d   :  { %v2213_v34 = vrot.slane %v2212_v7, 1 }
 0xd4f   :  { %v2214_v35 = vmax.f32 %v2212_v7, %v2213_v34  ;;  %v2557_v7 = vld [vmem:[%s4705_s5 + $0x1c0] sm:$0xff] }
 0xd51   :  { %v2215_v45 = vsub.f32 %v2206_v39, %v2214_v35  ;;  %v2397_v60 = vpop.xlane.xlu0 %2396 }
 0xd52   :  { %v2398_v47 = vsel %vm2207_vm13, %v2397_v60, -inf }
 0xd53   :  { %v2216_v32 = vmul.f32 1.442695, %v2215_v45  ;;  %v2399_v61 = vrot.slane %v2398_v47, 4 }
 0xd55   :  { %2837 = vpow2.f32 %v2216_v32  ;;  %v2400_v2 = vmax.f32 %v2398_v47, %v2399_v61 }
 0xd57   :  { %v2401_v10 = vrot.slane %v2400_v2, 2 }
 0xd59   :  { %v2402_v62 = vmax.f32 %v2400_v2, %v2401_v10 }
 0xd5b   :  { %v2838_v12 = vpop.eup %2837  ;;  %v2403_v36 = vrot.slane %v2402_v62, 1 }
 0xd5c   :  { %v2218_v63 = vsel %vm2207_vm13, %v2838_v12, 0.0 }
 0xd5d   :  { %v2219_v33 = vrot.slane %v2218_v63, 4  ;;  %v2404_v44 = vmax.f32 %v2402_v62, %v2403_v36 }
 0xd5f   :  { %v2220_v46 = vadd.f32 %v2219_v33, %v2218_v63  ;;  %v2405_v1 = vsub.f32 %v2397_v60, %v2404_v44 }
 0xd61   :  { %v2221_v50 = vrot.slane %v2220_v46, 2  ;;  %v2406_v14 = vmul.f32 1.442695, %v2405_v1 }
 0xd63   :  { %v2222_v51 = vadd.f32 %v2221_v50, %v2220_v46  ;;  %2839 = vpow2.f32 %v2406_v14  ;;  %v146_v50 = vld [vmem:[%s4707_s7 + $0x12] ss:$0 sm:$0xff] }
 0xd65   :  { %v2223_v23 = vrot.slane %v2222_v51, 1 }
 0xd67   :  { %v2224_v37 = vadd.f32 %v2223_v23, %v2222_v51 }
 0xd69   :  { %v2840_v9 = vpop.eup %2839  ;;  %2841 = vrcp.f32 %v2224_v37  ;;  %v2236_v13 = vand.u32 2147483648, %v2224_v37  ;;  %v2234_v56 = vand.u32 2147483647, %v2224_v37  ;;  %vm2230_vm14 = vweird.f32 %v2224_v37 }
 0xd6a   :  { %v2408_v16 = vsel %vm2207_vm13, %v2840_v9, 0.0 }
 0xd6b   :  { %v2409_v52 = vrot.slane %v2408_v16, 4  ;;  %v2237_v57 = vor.u32 1.1754944e-38, %v2236_v13  ;;  %vm2235_vm0 = vcmp.eq.f32.partialorder %v2234_v56, 8.507059e+37 }
 0xd6d   :  { %v2410_v19 = vadd.f32 %v2409_v52, %v2408_v16 }
 0xd6f   :  { %v2842_v53 = vpop.eup %2841  ;;  %v2411_v54 = vrot.slane %v2410_v19, 2 }
 0xd70   :  { %v2226_v42 = vmul.f32 %v2842_v53, %v2224_v37  ;;  %vm2231_vm5 = vweird.f32 %v2842_v53 }
 0xd71   :  { %v2412_v27 = vadd.f32 %v2411_v54, %v2410_v19  ;;  %vm2232_vm15 = vmor %vm2230_vm14, %vm2231_vm5 }
 0xd72   :  { %v2227_v28 = vsub.f32 1.0, %v2226_v42 }
 0xd73   :  { %v2413_v31 = vrot.slane %v2412_v27, 1 }
 0xd74   :  { %v2228_v4 = vmul.f32 %v2842_v53, %v2227_v28 }
 0xd75   :  { %v2414_v11 = vadd.f32 %v2413_v31, %v2412_v27 }
 0xd76   :  { %v2229_v43 = vadd.f32 %v2842_v53, %v2228_v4 }
 0xd77   :  { %2843 = vrcp.f32 %v2414_v11  ;;  %v2426_v18 = vand.u32 2147483648, %v2414_v11  ;;  %v2424_v22 = vand.u32 2147483647, %v2414_v11  ;;  %vm2420_vm3 = vweird.f32 %v2414_v11 }
 0xd78   :  { %v2233_v30 = vsel %vm2232_vm15, %v2842_v53, %v2229_v43 }
 0xd79   :  { %v2238_v20 = vsel %vm2235_vm0, %v2237_v57, %v2233_v30  ;;  %v2427_v25 = vor.u32 1.1754944e-38, %v2426_v18  ;;  %vm2425_vm7 = vcmp.eq.f32.partialorder %v2424_v22, 8.507059e+37 }
 0xd7a   :  { %v2239_v6 = vmul.f32 %v2838_v12, %v2238_v20 }
 0xd7c   :  { %v2240_v15 = vmul.f32 %v4561_v5, %v2239_v6  ;;  %v2559_v5 = vld [vmem:[%s4705_s5 + $0x1d0] sm:$0xff] }
 0xd7d   :  { %v2844_v49 = vpop.eup %2843  ;;  %2456 = vmatpush.msrb.mxu2 %v2559_v5 }
 0xd7e   :  { %v2416_v41 = vmul.f32 %v2844_v49, %v2414_v11  ;;  %v2242_v59 = vsel %vm2241_vm1, %v2240_v15, 0.0  ;;  %vm2421_vm2 = vweird.f32 %v2844_v49 }
 0xd7f   :  { %v2243_v8 = vrot.slane %v2242_v59, 4  ;;  %vm2422_vm6 = vmor %vm2420_vm3, %vm2421_vm2  ;;  %2457 = vmatpush.msrb.mxu2 %v2558_v55 }
 0xd80   :  { %v2417_v40 = vsub.f32 1.0, %v2416_v41 }
 0xd81   :  { %v2244_v26 = vadd.f32 %v2243_v8, %v2242_v59  ;;  %2458 = vmatpush.msrb.mxu2 %v2557_v7 }
 0xd82   :  { %v2418_v21 = vmul.f32 %v2844_v49, %v2417_v40 }
 0xd83   :  { %v2245_v39 = vrot.slane %v2244_v26, 2 }
 0xd84   :  { %v2419_v38 = vadd.f32 %v2844_v49, %v2418_v21 }
 0xd85   :  { %v2246_v29 = vadd.f32 %v2245_v39, %v2244_v26 }
 0xd86   :  { %v2423_v34 = vsel %vm2422_vm6, %v2844_v49, %v2419_v38 }
 0xd87   :  { %v2428_v35 = vsel %vm2425_vm7, %v2427_v25, %v2423_v34  ;;  %v2247_v45 = vrot.slane %v2246_v29, 1 }
 0xd88   :  { %v2429_v60 = vmul.f32 %v2840_v9, %v2428_v35 }
 0xd89   :  { %v2248_v47 = vadd.f32 %v2247_v45, %v2246_v29 }
 0xd8a   :  { %v2430_v32 = vmul.f32 %v2429_v60, %v4563_v24 }
 0xd8b   :  { %2439 = vrot.lane.b32.xlu1 %v2248_v47, %s2901_s21 }
 0xd8c   :  { %v2431_v61 = vsel %vm2241_vm1, %v2430_v32, 0.0 }
 0xd8d   :  { %v2432_v2 = vrot.slane %v2431_v61, 4 }
 0xd8f   :  { %v2433_v10 = vadd.f32 %v2432_v2, %v2431_v61 }
 0xd91   :  { %v2434_v62 = vrot.slane %v2433_v10, 2 }
 0xd93   :  { %v2435_v12 = vadd.f32 %v2434_v62, %v2433_v10 }
 0xd95   :  { %v2436_v36 = vrot.slane %v2435_v12, 1 }
 0xd97   :  { %v2437_v63 = vadd.f32 %v2436_v36, %v2435_v12 }
 0xd99   :  { %2464 = vrot.lane.b32.xlu1 %v2437_v63, %s2901_s21 }
 0xdfd   :  { %v2440_v33 = vpop.permute.xlu1 %2439 }
 0xdfe   :  { %2625 = vmatmul.msk.f32.vlgmr.msrb.gmra.mxu2 %vm717_vm4, %v2440_v33  ;;  %vm2475_vm4 = vcmask 0  }
 0xe0b   :  { %v2465_v44 = vpop.permute.xlu1 %2464 }
 0xe81   :  { %v2460_v46 = vpop.f32.mrf.mxu2 }
 0xe82   :  { %v2467_v1 = vmul.f32 %v2465_v44, %v2460_v46 }
 0xe84   :  { %v2469_v24 = vsel %vm2468_vm8, %v2467_v1, 0.0 }
 0xe85   :  { %2470 = vadd.xlane.f32.xlu1 %v2469_v24 }
 0xef8   :  { %v2471_v14 = vpop.xlane.xlu1 %2470 }
 0xef9   :  { %v2472_v51 = vadd.f32 %v2471_v14, %v146_v50 }
 0xefb   :  { %2845 = vtanh.f32 %v2472_v51 }
 0xf01   :  { %v2846_v23 = vpop.eup %2845 }
 0xf02   :  { %v2474_v37 = vmul.f32 3.0, %v2846_v23 }
 0xf04   :  { %2476 = vst.msk [vmem:[#allocation2] sm:$0x1] %vm2475_vm4, %v2474_v37 }
 0xf05   :  { %2487 = dma.vmem_to_hbm [thread:$0]  %s2483_s17, 16, %s2485_s19, [#allocation3]  }
 0xf06   :  { %2897 = dma.done.wait [#allocation3], 16  }
 0xf07   :  { %2898 = vsyncadd [#allocation3], 4294967280 }
 0xf08   :  { %2492 = vsyncpa [#allocation3], 1 }

</bundles_post_ra>
